<compile_context>
chip_gen: v7x
topology: tpu7x:2x2x1
jax: 0.10.0
libtpu: 0.0.40
codegen_flags: <defaults>
</compile_context>

<pallas_src>
import jax
import jax.numpy as jnp
from jax import lax
from jax.experimental import pallas as pl
from jax.experimental.pallas import tpu as pltpu

EPS = 1e-5
LANE = 128


def _round_up(x, m):
    return (x + m - 1) // m * m


# --------------------------------------------------------------------------
# in-kernel helpers
# --------------------------------------------------------------------------

def _bn_scale_shift(stats, gamma, beta, count):
    """Fold global train-mode batch statistics into per-channel scale/shift.

    stats: (G, 2, C) per-grid-block partial [sum, sum-of-squares] (f32).
    gamma, beta: (1, C) f32.  Returns (scale, shift), each (1, C) f32.
    """
    tot = jnp.sum(stats, axis=0)                       # (2, C)
    mean = tot[0:1, :] * (1.0 / count)
    ex2 = tot[1:2, :] * (1.0 / count)
    var = jnp.maximum(ex2 - mean * mean, 0.0)          # biased (train-mode) var
    inv = lax.rsqrt(var + EPS)                         # EUP slot
    scale = gamma * inv
    shift = beta - mean * scale
    return scale, shift


def _partial_stats(acc):
    """Stack per-channel [sum; sum-of-squares] of an (M, C) f32 tile -> (2, C)."""
    return jnp.concatenate(
        [jnp.sum(acc, axis=0, keepdims=True),
         jnp.sum(acc * acc, axis=0, keepdims=True)], axis=0)


# --------------------------------------------------------------------------
# kernels
# --------------------------------------------------------------------------

def _make_pass1_kernel(stride, TB, Ho, Wo, cin_p, with_proj):
    """conv1 (3x3, stride) as one K=9*cin_p bf16 matmul (+ fused 1x1 shortcut)."""
    s = stride
    nph = s * s
    TM = TB * Ho * Wo

    def conv_patches(ph_refs):
        taps = []
        for kh in range(3):
            for kw in range(3):
                ref = ph_refs[(kh % s) * s + (kw % s)]
                t = ref[:, kh // s: kh // s + Ho, kw // s: kw // s + Wo, :]
                taps.append(t.reshape(TM, cin_p).astype(jnp.bfloat16))
        return jnp.concatenate(taps, axis=-1)          # (TM, 9*cin_p) bf16

    def kernel(*refs):
        ph_refs = refs[:nph]
        if with_proj:
            w1_ref, xs_ref, ws_ref, a1_ref, s1_ref, ash_ref, ssh_ref = refs[nph:]
        else:
            w1_ref, a1_ref, s1_ref = refs[nph:]

        patches = conv_patches(ph_refs)
        acc = jnp.dot(patches, w1_ref[...], preferred_element_type=jnp.float32)
        a1_ref[...] = acc.astype(jnp.bfloat16)
        s1_ref[...] = _partial_stats(acc).reshape(s1_ref.shape)

        if with_proj:                                  # 1x1 stride-s shortcut conv
            sacc = jnp.dot(xs_ref[...], ws_ref[...],
                           preferred_element_type=jnp.float32)
            ash_ref[...] = sacc.astype(jnp.bfloat16)
            ssh_ref[...] = _partial_stats(sacc).reshape(ssh_ref.shape)

    return kernel


def _make_pass2_kernel(TB, Ho, Wo, cp, count):
    """BN1 (global stats) + ReLU + conv2 (3x3, stride 1, K=9*cp matmul) + stats."""
    TM = TB * Ho * Wo

    def kernel(a1_ref, s1_ref, g1_ref, b1_ref, w2_ref, a2_ref, s2_ref, ypad):
        scale, shift = _bn_scale_shift(s1_ref[...], g1_ref[...], b1_ref[...], count)
        y1 = jnp.maximum(a1_ref[...].astype(jnp.float32) * scale + shift, 0.0)

        # zero-padded activation tile in VMEM scratch (halo = conv2's padding)
        ypad[...] = jnp.zeros(ypad.shape, ypad.dtype)
        ypad[:, 1:Ho + 1, 1:Wo + 1, :] = y1.reshape(TB, Ho, Wo, cp)

        taps = []
        for kh in range(3):
            for kw in range(3):
                t = ypad[:, kh:kh + Ho, kw:kw + Wo, :]
                taps.append(t.reshape(TM, cp).astype(jnp.bfloat16))
        patches = jnp.concatenate(taps, axis=-1)       # (TM, 9*cp) bf16

        acc = jnp.dot(patches, w2_ref[...], preferred_element_type=jnp.float32)
        a2_ref[...] = acc.astype(jnp.bfloat16)
        s2_ref[...] = _partial_stats(acc).reshape(s2_ref.shape)

    return kernel


def _make_pass3_kernel(count, with_proj):
    """BN2 (+ shortcut BN) + residual add + ReLU."""

    def kernel(*refs):
        if with_proj:
            a2_ref, s2_ref, g2_ref, b2_ref, ash_ref, ssh_ref, gs_ref, bs_ref, o_ref = refs
        else:
            a2_ref, s2_ref, g2_ref, b2_ref, xid_ref, o_ref = refs

        sc2, sh2 = _bn_scale_shift(s2_ref[...], g2_ref[...], b2_ref[...], count)
        r = a2_ref[...].astype(jnp.float32) * sc2 + sh2
        if with_proj:
            scs, shs = _bn_scale_shift(ssh_ref[...], gs_ref[...], bs_ref[...], count)
            short = ash_ref[...].astype(jnp.float32) * scs + shs
        else:
            short = xid_ref[...].astype(jnp.float32)
        o_ref[...] = jnp.maximum(r + short, 0.0)

    return kernel


# --------------------------------------------------------------------------
# wrapper (layout glue only; all compute runs inside the Pallas kernels)
# --------------------------------------------------------------------------

def basic_block_forward(x_nchw, params, stride=1, block_rows=1024):
    """Forward pass of the PyTorch BasicBlock (train-mode BatchNorm)."""
    B, Cin, H, W = x_nchw.shape
    Cout = params["w1"].shape[0]
    s = int(stride)
    Ho = (H - 1) // s + 1
    Wo = (W - 1) // s + 1
    cin_p = _round_up(Cin, LANE)
    cout_p = _round_up(Cout, LANE)

    if Wo % 8 != 0:
        raise ValueError("W/stride must be a multiple of 8 (CIFAR ResNet: 32/16/8)")

    # row tiling: TM = TB*Ho*Wo rows per grid step (TB = images per step)
    target = max(int(block_rows), Ho * Wo)
    TB = 1
    for d in range(1, B + 1):
        if B % d == 0 and d * Ho * Wo <= target:
            TB = d
    G = B // TB
    TM = TB * Ho * Wo
    Mtot = B * Ho * Wo
    assert TM % 8 == 0

    needs_proj = (s != 1) or (Cin != Cout)

    # ---- layout prep ---------------------------------------------------------
    x = jnp.transpose(x_nchw, (0, 2, 3, 1)).astype(jnp.float32)        # NHWC
    x_c = jnp.pad(x, ((0, 0), (0, 0), (0, 0), (0, cin_p - Cin)))       # lane pad

    # Phase-decomposed zero-padded input: tap (kh, kw) of the stride-s 3x3 conv
    # is an *unstrided* static window of phase (kh%s, kw%s); this partitions the
    # padded input (no 9x im2col expansion in HBM).
    ph_h = Ho + 2 // s
    ph_w = Wo + 2 // s
    Hpad = max(H + 2, s * ph_h)
    Wpad = max(W + 2, s * ph_w)
    xp = jnp.pad(x_c, ((0, 0), (1, Hpad - H - 1), (1, Wpad - W - 1), (0, 0)))
    phases = [xp[:, r::s, c::s, :][:, :ph_h, :ph_w, :]
              for r in range(s) for c in range(s)]
    nph = len(phases)

    def fold3x3(w, ci_p, co_p):
        co, ci = w.shape[0], w.shape[1]
        wt = jnp.transpose(w, (2, 3, 1, 0))                            # (3,3,ci,co)
        wt = jnp.pad(wt, ((0, 0), (0, 0), (0, ci_p - ci), (0, co_p - co)))
        return wt.reshape(9 * ci_p, co_p).astype(jnp.bfloat16)

    def pad_vec(v, cp):
        return jnp.pad(v.astype(jnp.float32).reshape(1, -1),
                       ((0, 0), (0, cp - v.shape[0])))

    w1 = fold3x3(params["w1"], cin_p, cout_p)
    w2 = fold3x3(params["w2"], cout_p, cout_p)
    g1, b1 = pad_vec(params["g1"], cout_p), pad_vec(params["b1"], cout_p)
    g2, b2 = pad_vec(params["g2"], cout_p), pad_vec(params["b2"], cout_p)

    # ---- specs ---------------------------------------------------------------
    row_spec = pl.BlockSpec((TM, cout_p), lambda g: (g, 0))
    stat_out = pl.BlockSpec((1, 2, cout_p), lambda g: (g, 0, 0))
    stat_in = pl.BlockSpec((G, 2, cout_p), lambda g: (0, 0, 0))
    vec = pl.BlockSpec((1, cout_p), lambda g: (0, 0))
    phase_spec = pl.BlockSpec((TB, ph_h, ph_w, cin_p), lambda g: (g, 0, 0, 0))
    w1_spec = pl.BlockSpec((9 * cin_p, cout_p), lambda g: (0, 0))
    w2_spec = pl.BlockSpec((9 * cout_p, cout_p), lambda g: (0, 0))

    cparams = pltpu.CompilerParams(
        dimension_semantics=("parallel",),      # batch groups are independent
        vmem_limit_bytes=32 * 1024 * 1024,      # fits v7x's 64 MiB/TC with margin
    )

    conv1_flops = 2 * Mtot * 9 * cin_p * cout_p
    conv2_flops = 2 * Mtot * 9 * cout_p * cout_p
    proj_flops = (2 * Mtot * cin_p * cout_p) if needs_proj else 0

    # ---- pass 1: conv1 (+ fused projection shortcut) + partial BN stats ------
    p1_kernel = _make_pass1_kernel(s, TB, Ho, Wo, cin_p, needs_proj)
    if needs_proj:
        xs = x_c[:, ::s, ::s, :][:, :Ho, :Wo, :]
        xs = xs.reshape(Mtot, cin_p).astype(jnp.bfloat16)
        ws = jnp.transpose(params["ws"], (2, 3, 1, 0)).reshape(Cin, Cout)
        ws = jnp.pad(ws, ((0, cin_p - Cin), (0, cout_p - Cout))).astype(jnp.bfloat16)
        a1, s1, ash, ssh = pl.pallas_call(
            p1_kernel,
            grid=(G,),
            in_specs=[phase_spec] * nph + [
                w1_spec,
                pl.BlockSpec((TM, cin_p), lambda g: (g, 0)),
                pl.BlockSpec((cin_p, cout_p), lambda g: (0, 0)),
            ],
            out_specs=[row_spec, stat_out, row_spec, stat_out],
            out_shape=[
                jax.ShapeDtypeStruct((Mtot, cout_p), jnp.bfloat16),
                jax.ShapeDtypeStruct((G, 2, cout_p), jnp.float32),
                jax.ShapeDtypeStruct((Mtot, cout_p), jnp.bfloat16),
                jax.ShapeDtypeStruct((G, 2, cout_p), jnp.float32),
            ],
            compiler_params=cparams,
            cost_estimate=pl.CostEstimate(
                flops=conv1_flops + proj_flops, transcendentals=0,
                bytes_accessed=Mtot * (4 * cin_p + 2 * cin_p + 4 * cout_p)),
        )(*phases, w1, xs, ws)
    else:
        a1, s1 = pl.pallas_call(
            p1_kernel,
            grid=(G,),
            in_specs=[phase_spec] * nph + [w1_spec],
            out_specs=[row_spec, stat_out],
            out_shape=[
                jax.ShapeDtypeStruct((Mtot, cout_p), jnp.bfloat16),
                jax.ShapeDtypeStruct((G, 2, cout_p), jnp.float32),
            ],
            compiler_params=cparams,
            cost_estimate=pl.CostEstimate(
                flops=conv1_flops, transcendentals=0,
                bytes_accessed=Mtot * (4 * cin_p + 2 * cout_p)),
        )(*phases, w1)

    # ---- pass 2: BN1 + ReLU + conv2 + partial BN stats ------------------------
    a2, s2 = pl.pallas_call(
        _make_pass2_kernel(TB, Ho, Wo, cout_p, float(Mtot)),
        grid=(G,),
        in_specs=[row_spec, stat_in, vec, vec, w2_spec],
        out_specs=[row_spec, stat_out],
        out_shape=[
            jax.ShapeDtypeStruct((Mtot, cout_p), jnp.bfloat16),
            jax.ShapeDtypeStruct((G, 2, cout_p), jnp.float32),
        ],
        scratch_shapes=[pltpu.VMEM((TB, Ho + 2, Wo + 2, cout_p), jnp.float32)],
        compiler_params=cparams,
        cost_estimate=pl.CostEstimate(
            flops=conv2_flops, transcendentals=cout_p,
            bytes_accessed=4 * Mtot * cout_p),
    )(a1, s1, g1, b1, w2)

    # ---- pass 3: BN2 (+ shortcut BN) + residual add + ReLU --------------------
    p3_kernel = _make_pass3_kernel(float(Mtot), needs_proj)
    if needs_proj:
        gs, bs = pad_vec(params["gs"], cout_p), pad_vec(params["bs"], cout_p)
        out = pl.pallas_call(
            p3_kernel,
            grid=(G,),
            in_specs=[row_spec, stat_in, vec, vec, row_spec, stat_in, vec, vec],
            out_specs=row_spec,
            out_shape=jax.ShapeDtypeStruct((Mtot, cout_p), jnp.float32),
            compiler_params=cparams,
            cost_estimate=pl.CostEstimate(
                flops=8 * Mtot * cout_p, transcendentals=2 * cout_p,
                bytes_accessed=8 * Mtot * cout_p),
        )(a2, s2, g2, b2, ash, ssh, gs, bs)
    else:
        x_id = x_c.reshape(Mtot, cout_p)                 # identity: Cin == Cout
        out = pl.pallas_call(
            p3_kernel,
            grid=(G,),
            in_specs=[row_spec, stat_in, vec, vec, row_spec],
            out_specs=row_spec,
            out_shape=jax.ShapeDtypeStruct((Mtot, cout_p), jnp.float32),
            compiler_params=cparams,
            cost_estimate=pl.CostEstimate(
                flops=5 * Mtot * cout_p, transcendentals=cout_p,
                bytes_accessed=10 * Mtot * cout_p),
        )(a2, s2, g2, b2, x_id)

    out = out.reshape(B, Ho, Wo, cout_p)[:, :, :, :Cout]
    return jnp.transpose(out, (0, 3, 1, 2))              # back to NCHW


# --------------------------------------------------------------------------
# pure-XLA reference (matches the PyTorch module in train() mode) + params
# --------------------------------------------------------------------------

def reference_forward(x_nchw, params, stride):
    x = jnp.transpose(x_nchw, (0, 2, 3, 1)).astype(jnp.float32)
    Cin = x.shape[-1]
    Cout = params["w1"].shape[0]

    def conv(v, w, s, pad):
        wt = jnp.transpose(w, (2, 3, 1, 0))              # OIHW -> HWIO
        return lax.conv_general_dilated(
            v, wt, (s, s), pad, dimension_numbers=("NHWC", "HWIO", "NHWC"),
            precision=lax.Precision.HIGHEST)

    def bn(v, g, b):
        mean = jnp.mean(v, axis=(0, 1, 2), keepdims=True)
        var = jnp.mean((v - mean) ** 2, axis=(0, 1, 2), keepdims=True)
        return (v - mean) * lax.rsqrt(var + EPS) * g + b

    r = conv(x, params["w1"], stride, ((1, 1), (1, 1)))
    r = jax.nn.relu(bn(r, params["g1"], params["b1"]))
    r = conv(r, params["w2"], 1, ((1, 1), (1, 1)))
    r = bn(r, params["g2"], params["b2"])
    if stride != 1 or Cin != Cout:
        sc = conv(x, params["ws"], stride, ((0, 0), (0, 0)))
        sc = bn(sc, params["gs"], params["bs"])
    else:
        sc = x
    return jnp.transpose(jax.nn.relu(r + sc), (0, 3, 1, 2))


def init_params(key, in_channels, out_channels):
    ks = jax.random.split(key, 8)
    return {
        "w1": 0.1 * jax.random.normal(ks[0], (out_channels, in_channels, 3, 3), jnp.float32),
        "g1": 1.0 + 0.1 * jax.random.normal(ks[1], (out_channels,), jnp.float32),
        "b1": 0.1 * jax.random.normal(ks[2], (out_channels,), jnp.float32),
        "w2": 0.1 * jax.random.normal(ks[3], (out_channels, out_channels, 3, 3), jnp.float32),
        "g2": 1.0 + 0.1 * jax.random.normal(ks[4], (out_channels,), jnp.float32),
        "b2": 0.1 * jax.random.normal(ks[5], (out_channels,), jnp.float32),
        # projection shortcut (used when stride != 1 or channels change)
        "ws": 0.1 * jax.random.normal(ks[6], (out_channels, in_channels, 1, 1), jnp.float32),
        "gs": jnp.ones((out_channels,), jnp.float32),
        "bs": 0.1 * jax.random.normal(ks[7], (out_channels,), jnp.float32),
    }


if __name__ == "__main__":
    key = jax.random.PRNGKey(0)
    kx1, kp1, kx2, kp2 = jax.random.split(key, 4)

    fwd = jax.jit(basic_block_forward, static_argnames=("stride", "block_rows"))

    # 1) downsampling block: stride 2 + channel change -> projection shortcut
    B, Cin, H, W, Cout, stride = 4, 4, 16, 16, 8, 2
    x = jax.random.normal(kx1, (B, Cin, H, W), jnp.float32)
    params = init_params(kp1, Cin, Cout)
    y = jax.block_until_ready(fwd(x, params, stride=stride, block_rows=128))
    y_ref = jax.block_until_ready(reference_forward(x, params, stride))
    assert y.shape == (B, Cout, H // stride, W // stride)
    assert bool(jnp.all(y >= 0.0)) and bool(jnp.all(jnp.isfinite(y)))
    err = float(jnp.max(jnp.abs(y - y_ref)))
    assert err < 2e-1, f"projection-block mismatch vs reference: {err}"

    # 2) identity block: stride 1, same channels -> identity shortcut
    B, C, H, W = 2, 8, 8, 8
    x = jax.random.normal(kx2, (B, C, H, W), jnp.float32)
    params = init_params(kp2, C, C)
    y = jax.block_until_ready(fwd(x, params, stride=1, block_rows=64))
    y_ref = jax.block_until_ready(reference_forward(x, params, 1))
    assert y.shape == (B, C, H, W)
    assert bool(jnp.all(y >= 0.0)) and bool(jnp.all(jnp.isfinite(y)))
    err = float(jnp.max(jnp.abs(y - y_ref)))
    assert err < 2e-1, f"identity-block mismatch vs reference: {err}"

    print("KERNEL_OK")
</pallas_src>

<mosaic_0001>
module attributes {stable_mosaic.version = 11 : i64} {
  func.func @kernel(%arg0: i32, %arg1: memref<2x9x9x128xf32, #tpu.memory_space<vmem>>, %arg2: memref<2x9x9x128xf32, #tpu.memory_space<vmem>>, %arg3: memref<2x9x9x128xf32, #tpu.memory_space<vmem>>, %arg4: memref<2x9x9x128xf32, #tpu.memory_space<vmem>>, %arg5: memref<1152x128xbf16, #tpu.memory_space<vmem>>, %arg6: memref<128x128xbf16, #tpu.memory_space<vmem>>, %arg7: memref<128x128xbf16, #tpu.memory_space<vmem>>, %arg8: memref<128x128xbf16, #tpu.memory_space<vmem>>, %arg9: memref<1x2x128xf32, #tpu.memory_space<vmem>>, %arg10: memref<128x128xbf16, #tpu.memory_space<vmem>>, %arg11: memref<1x2x128xf32, #tpu.memory_space<vmem>>) attributes {dimension_semantics = [#tpu.dimension_semantics<parallel>], iteration_bounds = array<i64: 2>, scalar_prefetch = 0 : i64, scratch_operands = 0 : i64, tpu.core_type = #tpu.core_type<tc>, window_params = [{transform_indices = @transform_0, window_bounds = array<i64: 2, 9, 9, 128>}, {transform_indices = @transform_1, window_bounds = array<i64: 2, 9, 9, 128>}, {transform_indices = @transform_2, window_bounds = array<i64: 2, 9, 9, 128>}, {transform_indices = @transform_3, window_bounds = array<i64: 2, 9, 9, 128>}, {pipeline_mode = #tpu.pipeline_mode<synchronous>, transform_indices = @transform_4, window_bounds = array<i64: 1152, 128>}, {transform_indices = @transform_5, window_bounds = array<i64: 128, 128>}, {pipeline_mode = #tpu.pipeline_mode<synchronous>, transform_indices = @transform_6, window_bounds = array<i64: 128, 128>}, {transform_indices = @transform_7, window_bounds = array<i64: 128, 128>}, {transform_indices = @transform_8, window_bounds = array<i64: 1, 2, 128>}, {transform_indices = @transform_9, window_bounds = array<i64: 128, 128>}, {transform_indices = @transform_10, window_bounds = array<i64: 1, 2, 128>}]} {
    %c0 = arith.constant 0 : index
    %c0_0 = arith.constant 0 : index
    %c0_1 = arith.constant 0 : index
    %c0_2 = arith.constant 0 : index
    %0 = vector.load %arg1[%c0, %c0_0, %c0_1, %c0_2] : memref<2x9x9x128xf32, #tpu.memory_space<vmem>>, vector<2x8x8x128xf32>
    %1 = vector.shape_cast %0 : vector<2x8x8x128xf32> to vector<128x128xf32>
    %2 = arith.truncf %1 : vector<128x128xf32> to vector<128x128xbf16>
    %c0_3 = arith.constant 0 : index
    %c0_4 = arith.constant 0 : index
    %c0_5 = arith.constant 0 : index
    %c0_6 = arith.constant 0 : index
    %3 = vector.load %arg2[%c0_3, %c0_4, %c0_5, %c0_6] : memref<2x9x9x128xf32, #tpu.memory_space<vmem>>, vector<2x8x8x128xf32>
    %4 = vector.shape_cast %3 : vector<2x8x8x128xf32> to vector<128x128xf32>
    %5 = arith.truncf %4 : vector<128x128xf32> to vector<128x128xbf16>
    %c0_7 = arith.constant 0 : index
    %c0_8 = arith.constant 0 : index
    %c1 = arith.constant 1 : index
    %c0_9 = arith.constant 0 : index
    %6 = vector.load %arg1[%c0_7, %c0_8, %c1, %c0_9] : memref<2x9x9x128xf32, #tpu.memory_space<vmem>>, vector<2x8x8x128xf32>
    %7 = vector.shape_cast %6 : vector<2x8x8x128xf32> to vector<128x128xf32>
    %8 = arith.truncf %7 : vector<128x128xf32> to vector<128x128xbf16>
    %c0_10 = arith.constant 0 : index
    %c0_11 = arith.constant 0 : index
    %c0_12 = arith.constant 0 : index
    %c0_13 = arith.constant 0 : index
    %9 = vector.load %arg3[%c0_10, %c0_11, %c0_12, %c0_13] : memref<2x9x9x128xf32, #tpu.memory_space<vmem>>, vector<2x8x8x128xf32>
    %10 = vector.shape_cast %9 : vector<2x8x8x128xf32> to vector<128x128xf32>
    %11 = arith.truncf %10 : vector<128x128xf32> to vector<128x128xbf16>
    %c0_14 = arith.constant 0 : index
    %c0_15 = arith.constant 0 : index
    %c0_16 = arith.constant 0 : index
    %c0_17 = arith.constant 0 : index
    %12 = vector.load %arg4[%c0_14, %c0_15, %c0_16, %c0_17] : memref<2x9x9x128xf32, #tpu.memory_space<vmem>>, vector<2x8x8x128xf32>
    %13 = vector.shape_cast %12 : vector<2x8x8x128xf32> to vector<128x128xf32>
    %14 = arith.truncf %13 : vector<128x128xf32> to vector<128x128xbf16>
    %c0_18 = arith.constant 0 : index
    %c0_19 = arith.constant 0 : index
    %c1_20 = arith.constant 1 : index
    %c0_21 = arith.constant 0 : index
    %15 = vector.load %arg3[%c0_18, %c0_19, %c1_20, %c0_21] : memref<2x9x9x128xf32, #tpu.memory_space<vmem>>, vector<2x8x8x128xf32>
    %16 = vector.shape_cast %15 : vector<2x8x8x128xf32> to vector<128x128xf32>
    %17 = arith.truncf %16 : vector<128x128xf32> to vector<128x128xbf16>
    %c0_22 = arith.constant 0 : index
    %c1_23 = arith.constant 1 : index
    %c0_24 = arith.constant 0 : index
    %c0_25 = arith.constant 0 : index
    %18 = vector.load %arg1[%c0_22, %c1_23, %c0_24, %c0_25] : memref<2x9x9x128xf32, #tpu.memory_space<vmem>>, vector<2x8x8x128xf32>
    %19 = vector.shape_cast %18 : vector<2x8x8x128xf32> to vector<128x128xf32>
    %20 = arith.truncf %19 : vector<128x128xf32> to vector<128x128xbf16>
    %c0_26 = arith.constant 0 : index
    %c1_27 = arith.constant 1 : index
    %c0_28 = arith.constant 0 : index
    %c0_29 = arith.constant 0 : index
    %21 = vector.load %arg2[%c0_26, %c1_27, %c0_28, %c0_29] : memref<2x9x9x128xf32, #tpu.memory_space<vmem>>, vector<2x8x8x128xf32>
    %22 = vector.shape_cast %21 : vector<2x8x8x128xf32> to vector<128x128xf32>
    %23 = arith.truncf %22 : vector<128x128xf32> to vector<128x128xbf16>
    %c0_30 = arith.constant 0 : index
    %c1_31 = arith.constant 1 : index
    %c1_32 = arith.constant 1 : index
    %c0_33 = arith.constant 0 : index
    %24 = vector.load %arg1[%c0_30, %c1_31, %c1_32, %c0_33] : memref<2x9x9x128xf32, #tpu.memory_space<vmem>>, vector<2x8x8x128xf32>
    %25 = vector.shape_cast %24 : vector<2x8x8x128xf32> to vector<128x128xf32>
    %26 = arith.truncf %25 : vector<128x128xf32> to vector<128x128xbf16>
    %27 = tpu.concatenate %2, %5, %8, %11, %14, %17, %20, %23, %26 in 1 : vector<128x128xbf16>, vector<128x128xbf16>, vector<128x128xbf16>, vector<128x128xbf16>, vector<128x128xbf16>, vector<128x128xbf16>, vector<128x128xbf16>, vector<128x128xbf16>, vector<128x128xbf16> -> vector<128x1152xbf16>
    %c0_34 = arith.constant 0 : index
    %c0_35 = arith.constant 0 : index
    %28 = vector.load %arg5[%c0_34, %c0_35] : memref<1152x128xbf16, #tpu.memory_space<vmem>>, vector<1152x128xbf16>
    %cst = arith.constant dense<0.000000e+00> : vector<128x128xf32>
    %29 = tpu.matmul %27, %28, %cst {dimension_numbers = #tpu.dot_dimension_numbers<[1], [0], [0], [1], [0, 0, 1, 1], [], []>} : vector<128x1152xbf16>, vector<1152x128xbf16>, vector<128x128xf32> -> vector<128x128xf32>
    %30 = arith.truncf %29 : vector<128x128xf32> to vector<128x128xbf16>
    %c0_36 = arith.constant 0 : index
    %c0_37 = arith.constant 0 : index
    %31 = vector.load %arg8[%c0_36, %c0_37] : memref<128x128xbf16, #tpu.memory_space<vmem>>, vector<128x128xbf16>
    tpu.vector_store %arg8[%c0_36, %c0_37], %30 {strides = array<i32>} : memref<128x128xbf16, #tpu.memory_space<vmem>>, vector<128x128xbf16>,
    %cst_38 = arith.constant dense<0.000000e+00> : vector<128xf32>
    %32 = vector.multi_reduction <add>, %29, %cst_38 [0] : vector<128x128xf32> to vector<128xf32>
    %33 = vector.shape_cast %32 : vector<128xf32> to vector<1x128xf32>
    %34 = arith.mulf %29, %29 : vector<128x128xf32>
    %cst_39 = arith.constant dense<0.000000e+00> : vector<128xf32>
    %35 = vector.multi_reduction <add>, %34, %cst_39 [0] : vector<128x128xf32> to vector<128xf32>
    %36 = vector.shape_cast %35 : vector<128xf32> to vector<1x128xf32>
    %37 = tpu.concatenate %33, %36 in 0 : vector<1x128xf32>, vector<1x128xf32> -> vector<2x128xf32>
    %38 = vector.shape_cast %37 : vector<2x128xf32> to vector<1x2x128xf32>
    %c0_40 = arith.constant 0 : index
    %c0_41 = arith.constant 0 : index
    %c0_42 = arith.constant 0 : index
    %39 = vector.load %arg9[%c0_40, %c0_41, %c0_42] : memref<1x2x128xf32, #tpu.memory_space<vmem>>, vector<1x2x128xf32>
    tpu.vector_store %arg9[%c0_40, %c0_41, %c0_42], %38 {strides = array<i32>} : memref<1x2x128xf32, #tpu.memory_space<vmem>>, vector<1x2x128xf32>,
    %c0_43 = arith.constant 0 : index
    %c0_44 = arith.constant 0 : index
    %40 = vector.load %arg6[%c0_43, %c0_44] : memref<128x128xbf16, #tpu.memory_space<vmem>>, vector<128x128xbf16>
    %c0_45 = arith.constant 0 : index
    %c0_46 = arith.constant 0 : index
    %41 = vector.load %arg7[%c0_45, %c0_46] : memref<128x128xbf16, #tpu.memory_space<vmem>>, vector<128x128xbf16>
    %cst_47 = arith.constant dense<0.000000e+00> : vector<128x128xf32>
    %42 = tpu.matmul %40, %41, %cst_47 {dimension_numbers = #tpu.dot_dimension_numbers<[1], [0], [0], [1], [0, 0, 1, 1], [], []>} : vector<128x128xbf16>, vector<128x128xbf16>, vector<128x128xf32> -> vector<128x128xf32>
    %43 = arith.truncf %42 : vector<128x128xf32> to vector<128x128xbf16>
    %c0_48 = arith.constant 0 : index
    %c0_49 = arith.constant 0 : index
    %44 = vector.load %arg10[%c0_48, %c0_49] : memref<128x128xbf16, #tpu.memory_space<vmem>>, vector<128x128xbf16>
    tpu.vector_store %arg10[%c0_48, %c0_49], %43 {strides = array<i32>} : memref<128x128xbf16, #tpu.memory_space<vmem>>, vector<128x128xbf16>,
    %cst_50 = arith.constant dense<0.000000e+00> : vector<128xf32>
    %45 = vector.multi_reduction <add>, %42, %cst_50 [0] : vector<128x128xf32> to vector<128xf32>
    %46 = vector.shape_cast %45 : vector<128xf32> to vector<1x128xf32>
    %47 = arith.mulf %42, %42 : vector<128x128xf32>
    %cst_51 = arith.constant dense<0.000000e+00> : vector<128xf32>
    %48 = vector.multi_reduction <add>, %47, %cst_51 [0] : vector<128x128xf32> to vector<128xf32>
    %49 = vector.shape_cast %48 : vector<128xf32> to vector<1x128xf32>
    %50 = tpu.concatenate %46, %49 in 0 : vector<1x128xf32>, vector<1x128xf32> -> vector<2x128xf32>
    %51 = vector.shape_cast %50 : vector<2x128xf32> to vector<1x2x128xf32>
    %c0_52 = arith.constant 0 : index
    %c0_53 = arith.constant 0 : index
    %c0_54 = arith.constant 0 : index
    %52 = vector.load %arg11[%c0_52, %c0_53, %c0_54] : memref<1x2x128xf32, #tpu.memory_space<vmem>>, vector<1x2x128xf32>
    tpu.vector_store %arg11[%c0_52, %c0_53, %c0_54], %51 {strides = array<i32>} : memref<1x2x128xf32, #tpu.memory_space<vmem>>, vector<1x2x128xf32>,
    return
  }
  func.func @transform_0(%arg0: i32) -> (i32, i32, i32, i32) {
    %c0_i32 = arith.constant 0 : i32
    %c0_i32_0 = arith.constant 0 : i32
    %c0_i32_1 = arith.constant 0 : i32
    %c0_i32_2 = arith.constant 0 : i32
    return %arg0, %c0_i32, %c0_i32_0, %c0_i32_1 : i32, i32, i32, i32
  }
  func.func @transform_1(%arg0: i32) -> (i32, i32, i32, i32) {
    %c0_i32 = arith.constant 0 : i32
    %c0_i32_0 = arith.constant 0 : i32
    %c0_i32_1 = arith.constant 0 : i32
    %c0_i32_2 = arith.constant 0 : i32
    return %arg0, %c0_i32, %c0_i32_0, %c0_i32_1 : i32, i32, i32, i32
  }
  func.func @transform_2(%arg0: i32) -> (i32, i32, i32, i32) {
    %c0_i32 = arith.constant 0 : i32
    %c0_i32_0 = arith.constant 0 : i32
    %c0_i32_1 = arith.constant 0 : i32
    %c0_i32_2 = arith.constant 0 : i32
    return %arg0, %c0_i32, %c0_i32_0, %c0_i32_1 : i32, i32, i32, i32
  }
  func.func @transform_3(%arg0: i32) -> (i32, i32, i32, i32) {
    %c0_i32 = arith.constant 0 : i32
    %c0_i32_0 = arith.constant 0 : i32
    %c0_i32_1 = arith.constant 0 : i32
    %c0_i32_2 = arith.constant 0 : i32
    return %arg0, %c0_i32, %c0_i32_0, %c0_i32_1 : i32, i32, i32, i32
  }
  func.func @transform_4(%arg0: i32) -> (i32, i32) {
    %c0_i32 = arith.constant 0 : i32
    %c0_i32_0 = arith.constant 0 : i32
    %c0_i32_1 = arith.constant 0 : i32
    return %c0_i32, %c0_i32_0 : i32, i32
  }
  func.func @transform_5(%arg0: i32) -> (i32, i32) {
    %c0_i32 = arith.constant 0 : i32
    %c0_i32_0 = arith.constant 0 : i32
    return %arg0, %c0_i32 : i32, i32
  }
  func.func @transform_6(%arg0: i32) -> (i32, i32) {
    %c0_i32 = arith.constant 0 : i32
    %c0_i32_0 = arith.constant 0 : i32
    %c0_i32_1 = arith.constant 0 : i32
    return %c0_i32, %c0_i32_0 : i32, i32
  }
  func.func @transform_7(%arg0: i32) -> (i32, i32) {
    %c0_i32 = arith.constant 0 : i32
    %c0_i32_0 = arith.constant 0 : i32
    return %arg0, %c0_i32 : i32, i32
  }
  func.func @transform_8(%arg0: i32) -> (i32, i32, i32) {
    %c0_i32 = arith.constant 0 : i32
    %c0_i32_0 = arith.constant 0 : i32
    %c0_i32_1 = arith.constant 0 : i32
    return %arg0, %c0_i32, %c0_i32_0 : i32, i32, i32
  }
  func.func @transform_9(%arg0: i32) -> (i32, i32) {
    %c0_i32 = arith.constant 0 : i32
    %c0_i32_0 = arith.constant 0 : i32
    return %arg0, %c0_i32 : i32, i32
  }
  func.func @transform_10(%arg0: i32) -> (i32, i32, i32) {
    %c0_i32 = arith.constant 0 : i32
    %c0_i32_0 = arith.constant 0 : i32
    %c0_i32_1 = arith.constant 0 : i32
    return %arg0, %c0_i32, %c0_i32_0 : i32, i32, i32
  }
}

module attributes {stable_mosaic.version = 11 : i64} {
  func.func @kernel(%arg0: i32, %arg1: memref<128x128xbf16, #tpu.memory_space<vmem>>, %arg2: memref<2x2x128xf32, #tpu.memory_space<vmem>>, %arg3: memref<1x128xf32, #tpu.memory_space<vmem>>, %arg4: memref<1x128xf32, #tpu.memory_space<vmem>>, %arg5: memref<1152x128xbf16, #tpu.memory_space<vmem>>, %arg6: memref<128x128xbf16, #tpu.memory_space<vmem>>, %arg7: memref<1x2x128xf32, #tpu.memory_space<vmem>>, %arg8: memref<2x10x10x128xf32, #tpu.memory_space<vmem>>) attributes {dimension_semantics = [#tpu.dimension_semantics<parallel>], iteration_bounds = array<i64: 2>, scalar_prefetch = 0 : i64, scratch_operands = 1 : i64, tpu.core_type = #tpu.core_type<tc>, window_params = [{transform_indices = @transform_0, window_bounds = array<i64: 128, 128>}, {pipeline_mode = #tpu.pipeline_mode<synchronous>, transform_indices = @transform_1, window_bounds = array<i64: 2, 2, 128>}, {pipeline_mode = #tpu.pipeline_mode<synchronous>, transform_indices = @transform_2, window_bounds = array<i64: 1, 128>}, {pipeline_mode = #tpu.pipeline_mode<synchronous>, transform_indices = @transform_3, window_bounds = array<i64: 1, 128>}, {pipeline_mode = #tpu.pipeline_mode<synchronous>, transform_indices = @transform_4, window_bounds = array<i64: 1152, 128>}, {transform_indices = @transform_5, window_bounds = array<i64: 128, 128>}, {transform_indices = @transform_6, window_bounds = array<i64: 1, 2, 128>}]} {
    %c0 = arith.constant 0 : index
    %c0_0 = arith.constant 0 : index
    %c0_1 = arith.constant 0 : index
    %0 = vector.load %arg2[%c0, %c0_0, %c0_1] : memref<2x2x128xf32, #tpu.memory_space<vmem>>, vector<2x2x128xf32>
    %c0_2 = arith.constant 0 : index
    %c0_3 = arith.constant 0 : index
    %1 = vector.load %arg3[%c0_2, %c0_3] : memref<1x128xf32, #tpu.memory_space<vmem>>, vector<1x128xf32>
    %c0_4 = arith.constant 0 : index
    %c0_5 = arith.constant 0 : index
    %2 = vector.load %arg4[%c0_4, %c0_5] : memref<1x128xf32, #tpu.memory_space<vmem>>, vector<1x128xf32>
    %cst = arith.constant dense<0.000000e+00> : vector<2x128xf32>
    %3 = vector.multi_reduction <add>, %0, %cst [0] : vector<2x2x128xf32> to vector<2x128xf32>
    %4 = vector.extract_strided_slice %3 {offsets = [0, 0], sizes = [1, 128], strides = [1, 1]} : vector<2x128xf32> to vector<1x128xf32>
    %cst_6 = arith.constant 3.906250e-03 : f32
    %5 = vector.broadcast %cst_6 : f32 to vector<1x128xf32>
    %6 = arith.mulf %4, %5 : vector<1x128xf32>
    %7 = vector.extract_strided_slice %3 {offsets = [1, 0], sizes = [1, 128], strides = [1, 1]} : vector<2x128xf32> to vector<1x128xf32>
    %cst_7 = arith.constant 3.906250e-03 : f32
    %8 = vector.broadcast %cst_7 : f32 to vector<1x128xf32>
    %9 = arith.mulf %7, %8 : vector<1x128xf32>
    %10 = arith.mulf %6, %6 : vector<1x128xf32>
    %11 = arith.subf %9, %10 : vector<1x128xf32>
    %cst_8 = arith.constant 0.000000e+00 : f32
    %12 = vector.broadcast %cst_8 : f32 to vector<1x128xf32>
    %13 = arith.maximumf %11, %12 : vector<1x128xf32>
    %cst_9 = arith.constant 9.99999974E-6 : f32
    %14 = vector.broadcast %cst_9 : f32 to vector<1x128xf32>
    %15 = arith.addf %13, %14 : vector<1x128xf32>
    %16 = math.rsqrt %15 : vector<1x128xf32>
    %17 = arith.mulf %1, %16 : vector<1x128xf32>
    %18 = arith.mulf %6, %17 : vector<1x128xf32>
    %19 = arith.subf %2, %18 : vector<1x128xf32>
    %c0_10 = arith.constant 0 : index
    %c0_11 = arith.constant 0 : index
    %20 = vector.load %arg1[%c0_10, %c0_11] : memref<128x128xbf16, #tpu.memory_space<vmem>>, vector<128x128xbf16>
    %21 = arith.extf %20 : vector<128x128xbf16> to vector<128x128xf32>
    %22 = vector.broadcast %17 : vector<1x128xf32> to vector<128x128xf32>
    %23 = arith.mulf %21, %22 : vector<128x128xf32>
    %24 = vector.broadcast %19 : vector<1x128xf32> to vector<128x128xf32>
    %25 = arith.addf %23, %24 : vector<128x128xf32>
    %cst_12 = arith.constant 0.000000e+00 : f32
    %26 = vector.broadcast %cst_12 : f32 to vector<128x128xf32>
    %27 = arith.maximumf %25, %26 : vector<128x128xf32>
    %cst_13 = arith.constant 0.000000e+00 : f32
    %28 = vector.broadcast %cst_13 : f32 to vector<2x10x10x128xf32>
    %c0_14 = arith.constant 0 : index
    %c0_15 = arith.constant 0 : index
    %c0_16 = arith.constant 0 : index
    %c0_17 = arith.constant 0 : index
    %29 = vector.load %arg8[%c0_14, %c0_15, %c0_16, %c0_17] : memref<2x10x10x128xf32, #tpu.memory_space<vmem>>, vector<2x10x10x128xf32>
    tpu.vector_store %arg8[%c0_14, %c0_15, %c0_16, %c0_17], %28 {strides = array<i32>} : memref<2x10x10x128xf32, #tpu.memory_space<vmem>>, vector<2x10x10x128xf32>,
    %30 = vector.shape_cast %27 : vector<128x128xf32> to vector<2x8x8x128xf32>
    %c0_18 = arith.constant 0 : index
    %c1 = arith.constant 1 : index
    %c1_19 = arith.constant 1 : index
    %c0_20 = arith.constant 0 : index
    %31 = vector.load %arg8[%c0_18, %c1, %c1_19, %c0_20] : memref<2x10x10x128xf32, #tpu.memory_space<vmem>>, vector<2x8x8x128xf32>
    tpu.vector_store %arg8[%c0_18, %c1, %c1_19, %c0_20], %30 {strides = array<i32>} : memref<2x10x10x128xf32, #tpu.memory_space<vmem>>, vector<2x8x8x128xf32>,
    %c0_21 = arith.constant 0 : index
    %c0_22 = arith.constant 0 : index
    %c0_23 = arith.constant 0 : index
    %c0_24 = arith.constant 0 : index
    %32 = vector.load %arg8[%c0_21, %c0_22, %c0_23, %c0_24] : memref<2x10x10x128xf32, #tpu.memory_space<vmem>>, vector<2x8x8x128xf32>
    %33 = vector.shape_cast %32 : vector<2x8x8x128xf32> to vector<128x128xf32>
    %34 = arith.truncf %33 : vector<128x128xf32> to vector<128x128xbf16>
    %c0_25 = arith.constant 0 : index
    %c0_26 = arith.constant 0 : index
    %c1_27 = arith.constant 1 : index
    %c0_28 = arith.constant 0 : index
    %35 = vector.load %arg8[%c0_25, %c0_26, %c1_27, %c0_28] : memref<2x10x10x128xf32, #tpu.memory_space<vmem>>, vector<2x8x8x128xf32>
    %36 = vector.shape_cast %35 : vector<2x8x8x128xf32> to vector<128x128xf32>
    %37 = arith.truncf %36 : vector<128x128xf32> to vector<128x128xbf16>
    %c0_29 = arith.constant 0 : index
    %c0_30 = arith.constant 0 : index
    %c2 = arith.constant 2 : index
    %c0_31 = arith.constant 0 : index
    %38 = vector.load %arg8[%c0_29, %c0_30, %c2, %c0_31] : memref<2x10x10x128xf32, #tpu.memory_space<vmem>>, vector<2x8x8x128xf32>
    %39 = vector.shape_cast %38 : vector<2x8x8x128xf32> to vector<128x128xf32>
    %40 = arith.truncf %39 : vector<128x128xf32> to vector<128x128xbf16>
    %c0_32 = arith.constant 0 : index
    %c1_33 = arith.constant 1 : index
    %c0_34 = arith.constant 0 : index
    %c0_35 = arith.constant 0 : index
    %41 = vector.load %arg8[%c0_32, %c1_33, %c0_34, %c0_35] : memref<2x10x10x128xf32, #tpu.memory_space<vmem>>, vector<2x8x8x128xf32>
    %42 = vector.shape_cast %41 : vector<2x8x8x128xf32> to vector<128x128xf32>
    %43 = arith.truncf %42 : vector<128x128xf32> to vector<128x128xbf16>
    %c0_36 = arith.constant 0 : index
    %c1_37 = arith.constant 1 : index
    %c1_38 = arith.constant 1 : index
    %c0_39 = arith.constant 0 : index
    %44 = vector.load %arg8[%c0_36, %c1_37, %c1_38, %c0_39] : memref<2x10x10x128xf32, #tpu.memory_space<vmem>>, vector<2x8x8x128xf32>
    %45 = vector.shape_cast %44 : vector<2x8x8x128xf32> to vector<128x128xf32>
    %46 = arith.truncf %45 : vector<128x128xf32> to vector<128x128xbf16>
    %c0_40 = arith.constant 0 : index
    %c1_41 = arith.constant 1 : index
    %c2_42 = arith.constant 2 : index
    %c0_43 = arith.constant 0 : index
    %47 = vector.load %arg8[%c0_40, %c1_41, %c2_42, %c0_43] : memref<2x10x10x128xf32, #tpu.memory_space<vmem>>, vector<2x8x8x128xf32>
    %48 = vector.shape_cast %47 : vector<2x8x8x128xf32> to vector<128x128xf32>
    %49 = arith.truncf %48 : vector<128x128xf32> to vector<128x128xbf16>
    %c0_44 = arith.constant 0 : index
    %c2_45 = arith.constant 2 : index
    %c0_46 = arith.constant 0 : index
    %c0_47 = arith.constant 0 : index
    %50 = vector.load %arg8[%c0_44, %c2_45, %c0_46, %c0_47] : memref<2x10x10x128xf32, #tpu.memory_space<vmem>>, vector<2x8x8x128xf32>
    %51 = vector.shape_cast %50 : vector<2x8x8x128xf32> to vector<128x128xf32>
    %52 = arith.truncf %51 : vector<128x128xf32> to vector<128x128xbf16>
    %c0_48 = arith.constant 0 : index
    %c2_49 = arith.constant 2 : index
    %c1_50 = arith.constant 1 : index
    %c0_51 = arith.constant 0 : index
    %53 = vector.load %arg8[%c0_48, %c2_49, %c1_50, %c0_51] : memref<2x10x10x128xf32, #tpu.memory_space<vmem>>, vector<2x8x8x128xf32>
    %54 = vector.shape_cast %53 : vector<2x8x8x128xf32> to vector<128x128xf32>
    %55 = arith.truncf %54 : vector<128x128xf32> to vector<128x128xbf16>
    %c0_52 = arith.constant 0 : index
    %c2_53 = arith.constant 2 : index
    %c2_54 = arith.constant 2 : index
    %c0_55 = arith.constant 0 : index
    %56 = vector.load %arg8[%c0_52, %c2_53, %c2_54, %c0_55] : memref<2x10x10x128xf32, #tpu.memory_space<vmem>>, vector<2x8x8x128xf32>
    %57 = vector.shape_cast %56 : vector<2x8x8x128xf32> to vector<128x128xf32>
    %58 = arith.truncf %57 : vector<128x128xf32> to vector<128x128xbf16>
    %59 = tpu.concatenate %34, %37, %40, %43, %46, %49, %52, %55, %58 in 1 : vector<128x128xbf16>, vector<128x128xbf16>, vector<128x128xbf16>, vector<128x128xbf16>, vector<128x128xbf16>, vector<128x128xbf16>, vector<128x128xbf16>, vector<128x128xbf16>, vector<128x128xbf16> -> vector<128x1152xbf16>
    %c0_56 = arith.constant 0 : index
    %c0_57 = arith.constant 0 : index
    %60 = vector.load %arg5[%c0_56, %c0_57] : memref<1152x128xbf16, #tpu.memory_space<vmem>>, vector<1152x128xbf16>
    %cst_58 = arith.constant dense<0.000000e+00> : vector<128x128xf32>
    %61 = tpu.matmul %59, %60, %cst_58 {dimension_numbers = #tpu.dot_dimension_numbers<[1], [0], [0], [1], [0, 0, 1, 1], [], []>} : vector<128x1152xbf16>, vector<1152x128xbf16>, vector<128x128xf32> -> vector<128x128xf32>
    %62 = arith.truncf %61 : vector<128x128xf32> to vector<128x128xbf16>
    %c0_59 = arith.constant 0 : index
    %c0_60 = arith.constant 0 : index
    %63 = vector.load %arg6[%c0_59, %c0_60] : memref<128x128xbf16, #tpu.memory_space<vmem>>, vector<128x128xbf16>
    tpu.vector_store %arg6[%c0_59, %c0_60], %62 {strides = array<i32>} : memref<128x128xbf16, #tpu.memory_space<vmem>>, vector<128x128xbf16>,
    %cst_61 = arith.constant dense<0.000000e+00> : vector<128xf32>
    %64 = vector.multi_reduction <add>, %61, %cst_61 [0] : vector<128x128xf32> to vector<128xf32>
    %65 = vector.shape_cast %64 : vector<128xf32> to vector<1x128xf32>
    %66 = arith.mulf %61, %61 : vector<128x128xf32>
    %cst_62 = arith.constant dense<0.000000e+00> : vector<128xf32>
    %67 = vector.multi_reduction <add>, %66, %cst_62 [0] : vector<128x128xf32> to vector<128xf32>
    %68 = vector.shape_cast %67 : vector<128xf32> to vector<1x128xf32>
    %69 = tpu.concatenate %65, %68 in 0 : vector<1x128xf32>, vector<1x128xf32> -> vector<2x128xf32>
    %70 = vector.shape_cast %69 : vector<2x128xf32> to vector<1x2x128xf32>
    %c0_63 = arith.constant 0 : index
    %c0_64 = arith.constant 0 : index
    %c0_65 = arith.constant 0 : index
    %71 = vector.load %arg7[%c0_63, %c0_64, %c0_65] : memref<1x2x128xf32, #tpu.memory_space<vmem>>, vector<1x2x128xf32>
    tpu.vector_store %arg7[%c0_63, %c0_64, %c0_65], %70 {strides = array<i32>} : memref<1x2x128xf32, #tpu.memory_space<vmem>>, vector<1x2x128xf32>,
    return
  }
  func.func @transform_0(%arg0: i32) -> (i32, i32) {
    %c0_i32 = arith.constant 0 : i32
    %c0_i32_0 = arith.constant 0 : i32
    return %arg0, %c0_i32 : i32, i32
  }
  func.func @transform_1(%arg0: i32) -> (i32, i32, i32) {
    %c0_i32 = arith.constant 0 : i32
    %c0_i32_0 = arith.constant 0 : i32
    %c0_i32_1 = arith.constant 0 : i32
    %c0_i32_2 = arith.constant 0 : i32
    return %c0_i32, %c0_i32_0, %c0_i32_1 : i32, i32, i32
  }
  func.func @transform_2(%arg0: i32) -> (i32, i32) {
    %c0_i32 = arith.constant 0 : i32
    %c0_i32_0 = arith.constant 0 : i32
    %c0_i32_1 = arith.constant 0 : i32
    return %c0_i32, %c0_i32_0 : i32, i32
  }
  func.func @transform_3(%arg0: i32) -> (i32, i32) {
    %c0_i32 = arith.constant 0 : i32
    %c0_i32_0 = arith.constant 0 : i32
    %c0_i32_1 = arith.constant 0 : i32
    return %c0_i32, %c0_i32_0 : i32, i32
  }
  func.func @transform_4(%arg0: i32) -> (i32, i32) {
    %c0_i32 = arith.constant 0 : i32
    %c0_i32_0 = arith.constant 0 : i32
    %c0_i32_1 = arith.constant 0 : i32
    return %c0_i32, %c0_i32_0 : i32, i32
  }
  func.func @transform_5(%arg0: i32) -> (i32, i32) {
    %c0_i32 = arith.constant 0 : i32
    %c0_i32_0 = arith.constant 0 : i32
    return %arg0, %c0_i32 : i32, i32
  }
  func.func @transform_6(%arg0: i32) -> (i32, i32, i32) {
    %c0_i32 = arith.constant 0 : i32
    %c0_i32_0 = arith.constant 0 : i32
    %c0_i32_1 = arith.constant 0 : i32
    return %arg0, %c0_i32, %c0_i32_0 : i32, i32, i32
  }
}

module attributes {stable_mosaic.version = 11 : i64} {
  func.func @kernel(%arg0: i32, %arg1: memref<128x128xbf16, #tpu.memory_space<vmem>>, %arg2: memref<2x2x128xf32, #tpu.memory_space<vmem>>, %arg3: memref<1x128xf32, #tpu.memory_space<vmem>>, %arg4: memref<1x128xf32, #tpu.memory_space<vmem>>, %arg5: memref<128x128xbf16, #tpu.memory_space<vmem>>, %arg6: memref<2x2x128xf32, #tpu.memory_space<vmem>>, %arg7: memref<1x128xf32, #tpu.memory_space<vmem>>, %arg8: memref<1x128xf32, #tpu.memory_space<vmem>>, %arg9: memref<128x128xf32, #tpu.memory_space<vmem>>) attributes {dimension_semantics = [#tpu.dimension_semantics<parallel>], iteration_bounds = array<i64: 2>, scalar_prefetch = 0 : i64, scratch_operands = 0 : i64, tpu.core_type = #tpu.core_type<tc>, window_params = [{transform_indices = @transform_0, window_bounds = array<i64: 128, 128>}, {pipeline_mode = #tpu.pipeline_mode<synchronous>, transform_indices = @transform_1, window_bounds = array<i64: 2, 2, 128>}, {pipeline_mode = #tpu.pipeline_mode<synchronous>, transform_indices = @transform_2, window_bounds = array<i64: 1, 128>}, {pipeline_mode = #tpu.pipeline_mode<synchronous>, transform_indices = @transform_3, window_bounds = array<i64: 1, 128>}, {transform_indices = @transform_4, window_bounds = array<i64: 128, 128>}, {pipeline_mode = #tpu.pipeline_mode<synchronous>, transform_indices = @transform_5, window_bounds = array<i64: 2, 2, 128>}, {pipeline_mode = #tpu.pipeline_mode<synchronous>, transform_indices = @transform_6, window_bounds = array<i64: 1, 128>}, {pipeline_mode = #tpu.pipeline_mode<synchronous>, transform_indices = @transform_7, window_bounds = array<i64: 1, 128>}, {transform_indices = @transform_8, window_bounds = array<i64: 128, 128>}]} {
    %c0 = arith.constant 0 : index
    %c0_0 = arith.constant 0 : index
    %c0_1 = arith.constant 0 : index
    %0 = vector.load %arg2[%c0, %c0_0, %c0_1] : memref<2x2x128xf32, #tpu.memory_space<vmem>>, vector<2x2x128xf32>
    %c0_2 = arith.constant 0 : index
    %c0_3 = arith.constant 0 : index
    %1 = vector.load %arg3[%c0_2, %c0_3] : memref<1x128xf32, #tpu.memory_space<vmem>>, vector<1x128xf32>
    %c0_4 = arith.constant 0 : index
    %c0_5 = arith.constant 0 : index
    %2 = vector.load %arg4[%c0_4, %c0_5] : memref<1x128xf32, #tpu.memory_space<vmem>>, vector<1x128xf32>
    %cst = arith.constant dense<0.000000e+00> : vector<2x128xf32>
    %3 = vector.multi_reduction <add>, %0, %cst [0] : vector<2x2x128xf32> to vector<2x128xf32>
    %4 = vector.extract_strided_slice %3 {offsets = [0, 0], sizes = [1, 128], strides = [1, 1]} : vector<2x128xf32> to vector<1x128xf32>
    %cst_6 = arith.constant 3.906250e-03 : f32
    %5 = vector.broadcast %cst_6 : f32 to vector<1x128xf32>
    %6 = arith.mulf %4, %5 : vector<1x128xf32>
    %7 = vector.extract_strided_slice %3 {offsets = [1, 0], sizes = [1, 128], strides = [1, 1]} : vector<2x128xf32> to vector<1x128xf32>
    %cst_7 = arith.constant 3.906250e-03 : f32
    %8 = vector.broadcast %cst_7 : f32 to vector<1x128xf32>
    %9 = arith.mulf %7, %8 : vector<1x128xf32>
    %10 = arith.mulf %6, %6 : vector<1x128xf32>
    %11 = arith.subf %9, %10 : vector<1x128xf32>
    %cst_8 = arith.constant 0.000000e+00 : f32
    %12 = vector.broadcast %cst_8 : f32 to vector<1x128xf32>
    %13 = arith.maximumf %11, %12 : vector<1x128xf32>
    %cst_9 = arith.constant 9.99999974E-6 : f32
    %14 = vector.broadcast %cst_9 : f32 to vector<1x128xf32>
    %15 = arith.addf %13, %14 : vector<1x128xf32>
    %16 = math.rsqrt %15 : vector<1x128xf32>
    %17 = arith.mulf %1, %16 : vector<1x128xf32>
    %18 = arith.mulf %6, %17 : vector<1x128xf32>
    %19 = arith.subf %2, %18 : vector<1x128xf32>
    %c0_10 = arith.constant 0 : index
    %c0_11 = arith.constant 0 : index
    %20 = vector.load %arg1[%c0_10, %c0_11] : memref<128x128xbf16, #tpu.memory_space<vmem>>, vector<128x128xbf16>
    %21 = arith.extf %20 : vector<128x128xbf16> to vector<128x128xf32>
    %22 = vector.broadcast %17 : vector<1x128xf32> to vector<128x128xf32>
    %23 = arith.mulf %21, %22 : vector<128x128xf32>
    %24 = vector.broadcast %19 : vector<1x128xf32> to vector<128x128xf32>
    %25 = arith.addf %23, %24 : vector<128x128xf32>
    %c0_12 = arith.constant 0 : index
    %c0_13 = arith.constant 0 : index
    %c0_14 = arith.constant 0 : index
    %26 = vector.load %arg6[%c0_12, %c0_13, %c0_14] : memref<2x2x128xf32, #tpu.memory_space<vmem>>, vector<2x2x128xf32>
    %c0_15 = arith.constant 0 : index
    %c0_16 = arith.constant 0 : index
    %27 = vector.load %arg7[%c0_15, %c0_16] : memref<1x128xf32, #tpu.memory_space<vmem>>, vector<1x128xf32>
    %c0_17 = arith.constant 0 : index
    %c0_18 = arith.constant 0 : index
    %28 = vector.load %arg8[%c0_17, %c0_18] : memref<1x128xf32, #tpu.memory_space<vmem>>, vector<1x128xf32>
    %cst_19 = arith.constant dense<0.000000e+00> : vector<2x128xf32>
    %29 = vector.multi_reduction <add>, %26, %cst_19 [0] : vector<2x2x128xf32> to vector<2x128xf32>
    %30 = vector.extract_strided_slice %29 {offsets = [0, 0], sizes = [1, 128], strides = [1, 1]} : vector<2x128xf32> to vector<1x128xf32>
    %cst_20 = arith.constant 3.906250e-03 : f32
    %31 = vector.broadcast %cst_20 : f32 to vector<1x128xf32>
    %32 = arith.mulf %30, %31 : vector<1x128xf32>
    %33 = vector.extract_strided_slice %29 {offsets = [1, 0], sizes = [1, 128], strides = [1, 1]} : vector<2x128xf32> to vector<1x128xf32>
    %cst_21 = arith.constant 3.906250e-03 : f32
    %34 = vector.broadcast %cst_21 : f32 to vector<1x128xf32>
    %35 = arith.mulf %33, %34 : vector<1x128xf32>
    %36 = arith.mulf %32, %32 : vector<1x128xf32>
    %37 = arith.subf %35, %36 : vector<1x128xf32>
    %cst_22 = arith.constant 0.000000e+00 : f32
    %38 = vector.broadcast %cst_22 : f32 to vector<1x128xf32>
    %39 = arith.maximumf %37, %38 : vector<1x128xf32>
    %cst_23 = arith.constant 9.99999974E-6 : f32
    %40 = vector.broadcast %cst_23 : f32 to vector<1x128xf32>
    %41 = arith.addf %39, %40 : vector<1x128xf32>
    %42 = math.rsqrt %41 : vector<1x128xf32>
    %43 = arith.mulf %27, %42 : vector<1x128xf32>
    %44 = arith.mulf %32, %43 : vector<1x128xf32>
    %45 = arith.subf %28, %44 : vector<1x128xf32>
    %c0_24 = arith.constant 0 : index
    %c0_25 = arith.constant 0 : index
    %46 = vector.load %arg5[%c0_24, %c0_25] : memref<128x128xbf16, #tpu.memory_space<vmem>>, vector<128x128xbf16>
    %47 = arith.extf %46 : vector<128x128xbf16> to vector<128x128xf32>
    %48 = vector.broadcast %43 : vector<1x128xf32> to vector<128x128xf32>
    %49 = arith.mulf %47, %48 : vector<128x128xf32>
    %50 = vector.broadcast %45 : vector<1x128xf32> to vector<128x128xf32>
    %51 = arith.addf %49, %50 : vector<128x128xf32>
    %52 = arith.addf %25, %51 : vector<128x128xf32>
    %cst_26 = arith.constant 0.000000e+00 : f32
    %53 = vector.broadcast %cst_26 : f32 to vector<128x128xf32>
    %54 = arith.maximumf %52, %53 : vector<128x128xf32>
    %c0_27 = arith.constant 0 : index
    %c0_28 = arith.constant 0 : index
    %55 = vector.load %arg9[%c0_27, %c0_28] : memref<128x128xf32, #tpu.memory_space<vmem>>, vector<128x128xf32>
    tpu.vector_store %arg9[%c0_27, %c0_28], %54 {strides = array<i32>} : memref<128x128xf32, #tpu.memory_space<vmem>>, vector<128x128xf32>,
    return
  }
  func.func @transform_0(%arg0: i32) -> (i32, i32) {
    %c0_i32 = arith.constant 0 : i32
    %c0_i32_0 = arith.constant 0 : i32
    return %arg0, %c0_i32 : i32, i32
  }
  func.func @transform_1(%arg0: i32) -> (i32, i32, i32) {
    %c0_i32 = arith.constant 0 : i32
    %c0_i32_0 = arith.constant 0 : i32
    %c0_i32_1 = arith.constant 0 : i32
    %c0_i32_2 = arith.constant 0 : i32
    return %c0_i32, %c0_i32_0, %c0_i32_1 : i32, i32, i32
  }
  func.func @transform_2(%arg0: i32) -> (i32, i32) {
    %c0_i32 = arith.constant 0 : i32
    %c0_i32_0 = arith.constant 0 : i32
    %c0_i32_1 = arith.constant 0 : i32
    return %c0_i32, %c0_i32_0 : i32, i32
  }
  func.func @transform_3(%arg0: i32) -> (i32, i32) {
    %c0_i32 = arith.constant 0 : i32
    %c0_i32_0 = arith.constant 0 : i32
    %c0_i32_1 = arith.constant 0 : i32
    return %c0_i32, %c0_i32_0 : i32, i32
  }
  func.func @transform_4(%arg0: i32) -> (i32, i32) {
    %c0_i32 = arith.constant 0 : i32
    %c0_i32_0 = arith.constant 0 : i32
    return %arg0, %c0_i32 : i32, i32
  }
  func.func @transform_5(%arg0: i32) -> (i32, i32, i32) {
    %c0_i32 = arith.constant 0 : i32
    %c0_i32_0 = arith.constant 0 : i32
    %c0_i32_1 = arith.constant 0 : i32
    %c0_i32_2 = arith.constant 0 : i32
    return %c0_i32, %c0_i32_0, %c0_i32_1 : i32, i32, i32
  }
  func.func @transform_6(%arg0: i32) -> (i32, i32) {
    %c0_i32 = arith.constant 0 : i32
    %c0_i32_0 = arith.constant 0 : i32
    %c0_i32_1 = arith.constant 0 : i32
    return %c0_i32, %c0_i32_0 : i32, i32
  }
  func.func @transform_7(%arg0: i32) -> (i32, i32) {
    %c0_i32 = arith.constant 0 : i32
    %c0_i32_0 = arith.constant 0 : i32
    %c0_i32_1 = arith.constant 0 : i32
    return %c0_i32, %c0_i32_0 : i32, i32
  }
  func.func @transform_8(%arg0: i32) -> (i32, i32) {
    %c0_i32 = arith.constant 0 : i32
    %c0_i32_0 = arith.constant 0 : i32
    return %arg0, %c0_i32 : i32, i32
  }
}

</mosaic_0001>

<bundles_post_ra>
// kernel: basic_block_forward.5
= control target key start
LH: loop header
LB: loop body
LE: loop exit
PB: predicated region body
PF: predicated region fallthrough
CT: control target
= control target key end

     0   :  { %s830_s27 = smov 0   ;;  %s1114_s0 = inlined_call_operand.vmem [shape: bf16[256,128], index: 0, kind: input, shape index: {}]   ;;  %s1115_s1 = inlined_call_operand.vmem [shape: f32[2,2,128], index: 1, kind: input, shape index: {}]   ;;  %s1116_s2 = inlined_call_operand.vmem [shape: f32[1,128], index: 2, kind: input, shape index: {}]   ;;  %s1117_s3 = inlined_call_operand.vmem [shape: f32[1,128], index: 3, kind: input, shape index: {}]   ;;  %s1118_s4 = inlined_call_operand.vmem [shape: bf16[256,128], index: 4, kind: input, shape index: {}]   ;;  %s1119_s5 = inlined_call_operand.vmem [shape: f32[2,2,128], index: 5, kind: input, shape index: {}]   ;;  %s1120_s6 = inlined_call_operand.vmem [shape: f32[1,128], index: 6, kind: input, shape index: {}]   ;;  %s1121_s7 = inlined_call_operand.vmem [shape: f32[1,128], index: 7, kind: input, shape index: {}]   ;;  %s1122_s8 = inlined_call_operand.vmem [shape: f32[256,128], index: 8, kind: output, shape index: {}]  }
   0x1 LB: > { %s672_s28 = sadd.s32 4294967295, %s782_s27   ;;  %p676_p0 = scmp.ge.s32.totalorder %s782_s27, 1  ;;  %s782_s27 = sphi %s830_s27, %s18_s27  }
   0x2   : > { %p274_p1 = scmp.lt.s32.totalorder %s782_s27, 3 }
   0x4   : > { %p275_p2 = pnand %p676_p0, %p274_p1 }
   0x5   : > { %v331_v0 = vld [vmem:[%s1115_s1] sm:$0x3] (!%p275_p2)  ;;  %v332_v1 = vld [vmem:[%s1115_s1 + $0x2] sm:$0x3] (!%p275_p2)  ;;  %vm335_vm0 = vcmask (!%p275_p2), 1041408   ;;  %s677_s15 = sshll.u32 (!%p275_p2), %s672_s28, 4  ;;  %v352_v23 = vlaneseq (!%p275_p2) }
   0x6   : > { %278 = sbr.rel (%p275_p2) target bundleno = 74 (0x4a), region = 52  ;;  %v336_v2 = vsel (!%p275_p2), %vm335_vm0, %v331_v0, 0.0  ;;  %v337_v3 = vsel (!%p275_p2), %vm335_vm0, %v332_v1, 0.0  ;;  %v444_v4 = vld [vmem:[%s1119_s5] sm:$0x3] (!%p275_p2)  ;;  %p314_p3 = scmp.lt.s32.totalorder (!%p275_p2), %s677_s15, 31 }
   0x7   : > { %v338_v5 = vadd.f32 (!%p275_p2), %v337_v3, %v336_v2  ;;  %v445_v6 = vld [vmem:[%s1119_s5 + $0x2] sm:$0x3] (!%p275_p2)  ;;  %v448_v7 = vsel (!%p275_p2), %vm335_vm0, %v444_v4, 0.0  ;;  %v784_v21 = vmov (!%p275_p2), 1966171168   ;;  %v353_v26 = vshrl.u32 (!%p275_p2), %v352_v23, 7 }
   0x8   : > { %v449_v8 = vsel (!%p275_p2), %vm335_vm0, %v445_v6, 0.0  ;;  %v350_v22 = vunpack.c.l.s4 (!%p275_p2), %v784_v21  ;;  %v333_v56 = vld [vmem:[%s1116_s2] sm:$0x1] (!%p275_p2) }
   0x9   : > { %v850_v9 = vmul.f32 (!%p275_p2), 0.00390625, %v338_v5  ;;  %v450_v10 = vadd.f32 (!%p275_p2), %v449_v8, %v448_v7  ;;  %v889_v35 = vsub.s32 (!%p275_p2), 0, %v353_v26  ;;  %v446_v4 = vld [vmem:[%s1120_s6] sm:$0x1] (!%p275_p2) }
   0xa   : > { %v351_v25 = vunpack.c.0.s8 (!%p275_p2), %v350_v22 }
   0xb   : > { %v340_v11 = vmul.f32 (!%p275_p2), %v850_v9, %v850_v9  ;;  %v854_v12 = vmul.f32 (!%p275_p2), 0.00390625, %v450_v10 }
   0xc   : > { %v354_v27 = vsub.s32 (!%p275_p2), %v351_v25, %v353_v26  ;;  %v447_v26 = vld [vmem:[%s1121_s7] sm:$0x1] (!%p275_p2) }
   0xd   : > { %v342_v13 = vrot.slane %v340_v11, 7  ;;  %v452_v14 = vmul.f32 %v854_v12, %v854_v12  ;;  %s1124_s15 = smov (!%p314_p3, %s677_s15), 31 }
   0xe   : > { %s678_s16 = sshll.u32 %s1124_s15, 2  ;;  %s682_s10 = sshll.u32 %s1124_s15, 3 }
   0xf   : > { %v344_v15 = vsub.f32 %v850_v9, %v342_v13  ;;  %v454_v16 = vrot.slane %v452_v14, 7  ;;  %s866_s19 = scalar_lea.vmem %s1114_s0, %s678_s16  ;;  %s871_s22 = scalar_lea.vmem %s1118_s4, %s678_s16 }
  0x10   : > { %v874_v28 = vld [vmem:[%s866_s19] sm:$0xff]   ;;  %v880_v30 = vld [vmem:[%s866_s19 + $0x8] sm:$0xff]   ;;  %v886_v32 = vld [vmem:[%s866_s19 + $0x10] sm:$0xff]   ;;  %s1019_s13 = scalar_lea.vmem %s1122_s8, %s682_s10 }
  0x11   : > { %v345_v17 = vmax.f32 %v344_v15, 0.0  ;;  %v456_v18 = vsub.f32 %v854_v12, %v454_v16  ;;  %v877_v29 = vld [vmem:[%s871_s22] sm:$0xff]   ;;  %v883_v31 = vld [vmem:[%s871_s22 + $0x8] sm:$0xff]   ;;  %v687_v34 = vunpack.c.l.bf16 %v874_v28  ;;  %v893_v37 = vld [vmem:[%s871_s22 + $0x10] sm:$0xff]   ;;  %v688_v39 = vunpack.c.h.bf16 %v874_v28 }
  0x12   : > { %v719_v36 = vunpack.c.l.bf16 %v877_v29  ;;  %v720_v40 = vunpack.c.h.bf16 %v877_v29  ;;  %v691_v41 = vunpack.c.l.bf16 %v880_v30  ;;  %v899_v42 = vld [vmem:[%s866_s19 + $0x18] sm:$0xff]   ;;  %v723_v45 = vunpack.c.l.bf16 %v883_v31  ;;  %v909_v49 = vld [vmem:[%s866_s19 + $0x20] sm:$0xff]   ;;  %v917_v55 = vld [vmem:[%s866_s19 + $0x28] sm:$0xff]  }
  0x13   : > { %v346_v19 = vadd.f32 1e-05, %v345_v17  ;;  %v457_v20 = vmax.f32 %v456_v18, 0.0  ;;  %v902_v43 = vld [vmem:[%s871_s22 + $0x18] sm:$0xff]   ;;  %v692_v46 = vunpack.c.h.bf16 %v880_v30  ;;  %v724_v47 = vunpack.c.h.bf16 %v883_v31  ;;  %v914_v54 = vld [vmem:[%s871_s22 + $0x20] sm:$0xff]   ;;  %v927_v61 = vld [vmem:[%s871_s22 + $0x28] sm:$0xff]  }
  0x14   : > { %v695_v48 = vunpack.c.l.bf16 %v886_v32  ;;  %v727_v52 = vunpack.c.l.bf16 %v893_v37  ;;  %v696_v53 = vunpack.c.h.bf16 %v886_v32  ;;  %v728_v57 = vunpack.c.h.bf16 %v893_v37  ;;  %v932_v2 = vld [vmem:[%s866_s19 + $0x30] sm:$0xff]   ;;  %v947_v15 = vld [vmem:[%s866_s19 + $0x38] sm:$0xff]   ;;  %v334_v17 = vld [vmem:[%s1117_s3] sm:$0x1] }
  0x15   : > { %772 = vrsqrt.f32 %v346_v19  ;;  %v458_v24 = vadd.f32 1e-05, %v457_v20  ;;  %v699_v58 = vunpack.c.l.bf16 %v899_v42  ;;  %v731_v59 = vunpack.c.l.bf16 %v902_v43  ;;  %v935_v3 = vld [vmem:[%s871_s22 + $0x30] sm:$0xff]   ;;  %v950_v16 = vld [vmem:[%s871_s22 + $0x38] sm:$0xff]  }
  0x16   : > { %v700_v60 = vunpack.c.h.bf16 %v899_v42  ;;  %v732_v0 = vunpack.c.h.bf16 %v902_v43  ;;  %v703_v1 = vunpack.c.l.bf16 %v909_v49  ;;  %v735_v5 = vunpack.c.l.bf16 %v914_v54 }
  0x17   : > { %774 = vrsqrt.f32 %v458_v24  ;;  %v704_v6 = vunpack.c.h.bf16 %v909_v49  ;;  %v736_v7 = vunpack.c.h.bf16 %v914_v54  ;;  %v707_v8 = vunpack.c.l.bf16 %v917_v55 }
  0x18   : > { %v739_v13 = vunpack.c.l.bf16 %v927_v61  ;;  %v708_v14 = vunpack.c.h.bf16 %v917_v55  ;;  %v740_v18 = vunpack.c.h.bf16 %v927_v61  ;;  %v711_v19 = vunpack.c.l.bf16 %v932_v2 }
  0x19   : > { %v743_v20 = vunpack.c.l.bf16 %v935_v3  ;;  %v712_v21 = vunpack.c.h.bf16 %v932_v2  ;;  %v744_v25 = vunpack.c.h.bf16 %v935_v3  ;;  %v747_v28 = vunpack.c.l.bf16 %v950_v16 }
  0x1a   : > { %v716_v30 = vunpack.c.h.bf16 %v947_v15  ;;  %v748_v31 = vunpack.c.h.bf16 %v950_v16 }
  0x1f   : > { %v773_v33 = vpop.eup %772 }
  0x20   : > { %v355_v38 = vrot.slane %v773_v33, %v354_v27 }
  0x21   : > { %v775_v44 = vpop.eup %774 }
  0x22   : > { %v356_v50 = vcombine.high %v355_v38, %v355_v38  ;;  %v467_v51 = vrot.slane %v775_v44, %v354_v27 }
  0x24   : > { %v363_v62 = vrot.slane %v356_v50, %v354_v27  ;;  %v468_v63 = vcombine.high %v467_v51, %v467_v51 }
  0x26   : > { %v365_v10 = vmul.f32 %v363_v62, %v333_v56  ;;  %v475_v11 = vrot.slane %v468_v63, %v354_v27  ;;  %v715_v27 = vunpack.c.l.bf16 %v947_v15 }
  0x28   : > { %v366_v22 = vmul.f32 %v365_v10, %v850_v9  ;;  %v961_v23 = vrot.slane %v365_v10, %v889_v35  ;;  %v477_v24 = vmul.f32 %v475_v11, %v446_v4 }
  0x2a   : > { %v367_v32 = vsub.f32 %v334_v17, %v366_v22  ;;  %v406_v9 = vmul.f32 %v687_v34, %v961_v23  ;;  %v478_v33 = vmul.f32 %v477_v24, %v854_v12  ;;  %v974_v37 = vrot.slane %v477_v24, %v889_v35 }
  0x2b   : > { %v407_v38 = vmul.f32 %v688_v39, %v961_v23  ;;  %v408_v44 = vmul.f32 %v691_v41, %v961_v23  ;;  %v409_v50 = vmul.f32 %v692_v46, %v961_v23  ;;  %v410_v51 = vmul.f32 %v695_v48, %v961_v23 }
  0x2c   : > { %v981_v56 = vrot.slane %v367_v32, %v889_v35  ;;  %v479_v62 = vsub.f32 %v447_v26, %v478_v33  ;;  %v518_v12 = vmul.f32 %v719_v36, %v974_v37  ;;  %v519_v34 = vmul.f32 %v720_v40, %v974_v37 }
  0x2d   : > { %v520_v39 = vmul.f32 %v723_v45, %v974_v37  ;;  %v521_v41 = vmul.f32 %v724_v47, %v974_v37  ;;  %v522_v46 = vmul.f32 %v727_v52, %v974_v37  ;;  %v411_v48 = vmul.f32 %v696_v53, %v961_v23 }
  0x2e   : > { %v428_v63 = vadd.f32 %v981_v56, %v406_v9  ;;  %v995_v4 = vrot.slane %v479_v62, %v889_v35  ;;  %v429_v10 = vadd.f32 %v981_v56, %v407_v38  ;;  %v430_v36 = vadd.f32 %v981_v56, %v408_v44 }
  0x2f   : > { %v431_v29 = vadd.f32 %v981_v56, %v409_v50  ;;  %v432_v40 = vadd.f32 %v981_v56, %v410_v51  ;;  %v433_v45 = vadd.f32 %v981_v56, %v411_v48  ;;  %v523_v47 = vmul.f32 %v728_v57, %v974_v37 }
  0x30   : > { %v540_v52 = vadd.f32 %v995_v4, %v518_v12  ;;  %v541_v53 = vadd.f32 %v995_v4, %v519_v34  ;;  %v542_v35 = vadd.f32 %v995_v4, %v520_v39  ;;  %v543_v11 = vadd.f32 %v995_v4, %v521_v41 }
  0x31   : > { %v544_v17 = vadd.f32 %v995_v4, %v522_v46  ;;  %v545_v22 = vadd.f32 %v995_v4, %v523_v47  ;;  %v412_v24 = vmul.f32 %v699_v58, %v961_v23  ;;  %v524_v57 = vmul.f32 %v731_v59, %v974_v37 }
  0x32   : > { %v556_v26 = vadd.f32 %v540_v52, %v428_v63  ;;  %v557_v32 = vadd.f32 %v541_v53, %v429_v10  ;;  %v558_v9 = vadd.f32 %v542_v35, %v430_v36  ;;  %v559_v33 = vadd.f32 %v543_v11, %v431_v29 }
  0x33   : > { %v560_v38 = vadd.f32 %v544_v17, %v432_v40  ;;  %v561_v44 = vadd.f32 %v545_v22, %v433_v45  ;;  %v434_v58 = vadd.f32 %v981_v56, %v412_v24  ;;  %v546_v50 = vadd.f32 %v995_v4, %v524_v57 }
  0x34   : > { %v572_v59 = vmax.f32 %v556_v26, 0.0  ;;  %v573_v51 = vmax.f32 %v557_v32, 0.0  ;;  %v574_v62 = vmax.f32 %v558_v9, 0.0  ;;  %v575_v12 = vmax.f32 %v559_v33, 0.0 }
  0x35   : > { %v576_v34 = vmax.f32 %v560_v38, 0.0  ;;  %v577_v39 = vmax.f32 %v561_v44, 0.0  ;;  %v562_v41 = vadd.f32 %v546_v50, %v434_v58  ;;  %v413_v46 = vmul.f32 %v700_v60, %v961_v23 }
  0x36   : > { %588 = vst [vmem:[%s1019_s13] sm:$0xff] %v572_v59  ;;  %589 = vst [vmem:[%s1019_s13 + $0x8] sm:$0xff] %v573_v51  ;;  %v525_v48 = vmul.f32 %v732_v0, %v974_v37  ;;  %v414_v63 = vmul.f32 %v703_v1, %v961_v23  ;;  %v526_v10 = vmul.f32 %v735_v5, %v974_v37 }
  0x37   : > { %590 = vst [vmem:[%s1019_s13 + $0x10] sm:$0xff] %v574_v62  ;;  %591 = vst [vmem:[%s1019_s13 + $0x18] sm:$0xff] %v575_v12  ;;  %v415_v42 = vmul.f32 %v704_v6, %v961_v23  ;;  %v578_v60 = vmax.f32 %v562_v41, 0.0  ;;  %v435_v36 = vadd.f32 %v981_v56, %v413_v46  ;;  %v527_v43 = vmul.f32 %v736_v7, %v974_v37 }
  0x38   : > { %592 = vst [vmem:[%s1019_s13 + $0x20] sm:$0xff] %v576_v34  ;;  %593 = vst [vmem:[%s1019_s13 + $0x28] sm:$0xff] %v577_v39  ;;  %v416_v0 = vmul.f32 %v707_v8, %v961_v23  ;;  %v547_v1 = vadd.f32 %v995_v4, %v525_v48  ;;  %v436_v5 = vadd.f32 %v981_v56, %v414_v63 }
  0x39   : > { %v548_v49 = vadd.f32 %v995_v4, %v526_v10  ;;  %v437_v6 = vadd.f32 %v981_v56, %v415_v42  ;;  %594 = vst [vmem:[%s1019_s13 + $0x30] sm:$0xff] %v578_v60  ;;  %v549_v29 = vadd.f32 %v995_v4, %v527_v43  ;;  %v528_v54 = vmul.f32 %v739_v13, %v974_v37 }
  0x3a   : > { %v438_v40 = vadd.f32 %v981_v56, %v416_v0  ;;  %v417_v7 = vmul.f32 %v708_v14, %v961_v23  ;;  %v563_v8 = vadd.f32 %v547_v1, %v435_v36  ;;  %v529_v47 = vmul.f32 %v740_v18, %v974_v37 }
  0x3b   : > { %v564_v45 = vadd.f32 %v548_v49, %v436_v5  ;;  %v418_v52 = vmul.f32 %v711_v19, %v961_v23  ;;  %v565_v53 = vadd.f32 %v549_v29, %v437_v6  ;;  %v550_v35 = vadd.f32 %v995_v4, %v528_v54 }
  0x3c   : > { %v439_v13 = vadd.f32 %v981_v56, %v417_v7  ;;  %v530_v55 = vmul.f32 %v743_v20, %v974_v37  ;;  %v579_v14 = vmax.f32 %v563_v8, 0.0  ;;  %v551_v61 = vadd.f32 %v995_v4, %v529_v47 }
  0x3d   : > { %v580_v11 = vmax.f32 %v564_v45, 0.0  ;;  %v440_v18 = vadd.f32 %v981_v56, %v418_v52  ;;  %v581_v17 = vmax.f32 %v565_v53, 0.0  ;;  %v566_v22 = vadd.f32 %v550_v35, %v438_v40 }
  0x3e   : > { %v552_v19 = vadd.f32 %v995_v4, %v530_v55  ;;  %v419_v24 = vmul.f32 %v712_v21, %v961_v23  ;;  %595 = vst [vmem:[%s1019_s13 + $0x38] sm:$0xff] %v579_v14  ;;  %v567_v57 = vadd.f32 %v551_v61, %v439_v13  ;;  %v531_v20 = vmul.f32 %v744_v25, %v974_v37 }
  0x3f   : > { %596 = vst [vmem:[%s1019_s13 + $0x40] sm:$0xff] %v580_v11  ;;  %v420_v26 = vmul.f32 %v715_v27, %v961_v23  ;;  %v532_v32 = vmul.f32 %v747_v28, %v974_v37  ;;  %597 = vst [vmem:[%s1019_s13 + $0x48] sm:$0xff] %v581_v17  ;;  %v582_v2 = vmax.f32 %v566_v22, 0.0  ;;  %v421_v3 = vmul.f32 %v716_v30, %v961_v23 }
  0x40   : > { %v568_v21 = vadd.f32 %v552_v19, %v440_v18  ;;  %v441_v9 = vadd.f32 %v981_v56, %v419_v24  ;;  %v583_v25 = vmax.f32 %v567_v57, 0.0  ;;  %v553_v33 = vadd.f32 %v995_v4, %v531_v20 }
  0x41   : > { %v442_v27 = vadd.f32 %v981_v56, %v420_v26  ;;  %v554_v38 = vadd.f32 %v995_v4, %v532_v32  ;;  %598 = vst [vmem:[%s1019_s13 + $0x50] sm:$0xff] %v582_v2  ;;  %v443_v44 = vadd.f32 %v981_v56, %v421_v3  ;;  %v533_v58 = vmul.f32 %v748_v31, %v974_v37 }
  0x42   : > { %v584_v28 = vmax.f32 %v568_v21, 0.0  ;;  %599 = vst [vmem:[%s1019_s13 + $0x58] sm:$0xff] %v583_v25  ;;  %v569_v15 = vadd.f32 %v553_v33, %v441_v9 }
  0x43   : > { %v570_v23 = vadd.f32 %v554_v38, %v442_v27  ;;  %v555_v30 = vadd.f32 %v995_v4, %v533_v58 }
  0x44   : > { %600 = vst [vmem:[%s1019_s13 + $0x60] sm:$0xff] %v584_v28  ;;  %v585_v50 = vmax.f32 %v569_v15, 0.0 }
  0x45   : > { %v586_v59 = vmax.f32 %v570_v23, 0.0  ;;  %v571_v51 = vadd.f32 %v555_v30, %v443_v44 }
  0x46   : > { %601 = vst [vmem:[%s1019_s13 + $0x68] sm:$0xff] %v585_v50 }
  0x47   : > { %602 = vst [vmem:[%s1019_s13 + $0x70] sm:$0xff] %v586_v59  ;;  %v587_v62 = vmax.f32 %v571_v51, 0.0 }
  0x49   : > { %603 = vst [vmem:[%s1019_s13 + $0x78] sm:$0xff] %v587_v62 }
  0x4a PF: > { %s18_s27 = sadd.s32 1, %s782_s27  }
  0x4b   : > { %p15_p4 = scmp.ge.s32.totalorder %s18_s27, 4  }
  0x4d   :  { %17 = sbr.rel (!%p15_p4) target bundleno = 1 (0x1), region = 85 }

// kernel: basic_block_forward.4
= control target key start
LH: loop header
LB: loop body
LE: loop exit
PB: predicated region body
PF: predicated region fallthrough
CT: control target
= control target key end

     0   :  { %s2611_s21 = smov 0   ;;  %s3267_s0 = inlined_call_operand.vmem [shape: bf16[256,128], index: 0, kind: input, shape index: {}]   ;;  %s3268_s1 = inlined_call_operand.vmem [shape: f32[2,2,128], index: 1, kind: input, shape index: {}]   ;;  %s3269_s2 = inlined_call_operand.vmem [shape: f32[1,128], index: 2, kind: input, shape index: {}]   ;;  %s3270_s3 = inlined_call_operand.vmem [shape: f32[1,128], index: 3, kind: input, shape index: {}]   ;;  %s3271_s4 = inlined_call_operand.vmem [shape: bf16[1152,128], index: 4, kind: input, shape index: {}]   ;;  %s3272_s5 = inlined_call_operand.vmem [shape: bf16[256,128], index: 5, kind: output, shape index: {0}]   ;;  %s3273_s6 = inlined_call_operand.vmem [shape: f32[2,2,128], index: 6, kind: output, shape index: {1}]  }
   0x1 LB: > { %s2617_s22 = sadd.s32 4294967295, %s2572_s21   ;;  %p1963_p0 = scmp.ge.s32.totalorder %s2572_s21, 1  ;;  %s2572_s21 = sphi %s2611_s21, %s17_s21  }
   0x2   : > { %p216_p1 = scmp.lt.s32.totalorder %s2572_s21, 3 }
   0x4   : > { %p217_p2 = pnand %p1963_p0, %p216_p1 }
   0x5   : > { %v2491_v0 = vld [vmem:[%s3271_s4 + $0x40] sm:$0xff] (!%p217_p2)   ;;  %v2495_v4 = vld [vmem:[%s3271_s4 + $0x48] sm:$0xff] (!%p217_p2)   ;;  %v2499_v8 = vld [vmem:[%s3271_s4 + $0x50] sm:$0xff] (!%p217_p2)   ;;  %v2574_v9 = vmov (!%p217_p2), 0.0   ;;  %vm271_vm0 = vcmask (!%p217_p2), 1041408   ;;  %s1964_s29 = sshll.u32 (!%p217_p2), %s2617_s22, 4  ;;  %v288_v48 = vlaneseq (!%p217_p2) }
   0x6   : > { %220 = sbr.rel (%p217_p2) target bundleno = 468 (0x1d4), region = 40  ;;  %v2492_v1 = vld [vmem:[%s3271_s4] sm:$0xff] (!%p217_p2)   ;;  %2161 = vmatprep.subr.bf16.mxu0 (!%p217_p2), %v2491_v0  ;;  %v2496_v5 = vld [vmem:[%s3271_s4 + $0x8] sm:$0xff] (!%p217_p2)   ;;  %396 = vst [vmem:[#allocation2] sm:$0xff] (!%p217_p2), %v2574_v9  ;;  %397 = vst [vmem:[#allocation2 + $0x8] sm:$0x3] (!%p217_p2), %v2574_v9 }
   0x7   : > { %v2493_v2 = vld [vmem:[%s3271_s4 + $0xc0] sm:$0xff] (!%p217_p2)   ;;  %2162 = vmatpush3.bf16.msra.mxu0 (!%p217_p2), %v2492_v1  ;;  %v2497_v6 = vld [vmem:[%s3271_s4 + $0xc8] sm:$0xff] (!%p217_p2)   ;;  %398 = vst [vmem:[#allocation2 + $0x10] sm:$0xff] (!%p217_p2), %v2574_v9  ;;  %399 = vst [vmem:[#allocation2 + $0x18] sm:$0x3] (!%p217_p2), %v2574_v9  ;;  %p251_p3 = scmp.lt.s32.totalorder (!%p217_p2), %s1964_s29, 31 }
   0x8   : > { %v2494_v3 = vld [vmem:[%s3271_s4 + $0x80] sm:$0xff] (!%p217_p2)   ;;  %2225 = vmatprep.subr.bf16.mxu1 (!%p217_p2), %v2493_v2  ;;  %2163 = vmatprep.subr.bf16.mxu0 (!%p217_p2), %v2495_v4  ;;  %v2498_v7 = vld [vmem:[%s3271_s4 + $0x88] sm:$0xff] (!%p217_p2)   ;;  %400 = vst [vmem:[#allocation2 + $0x20] sm:$0xff] (!%p217_p2), %v2574_v9  ;;  %401 = vst [vmem:[#allocation2 + $0x28] sm:$0x3] (!%p217_p2), %v2574_v9  ;;  %v289_v50 = vshrl.u32 (!%p217_p2), %v288_v48, 7 }
   0x9   : > { %2226 = vmatpush3.bf16.msra.mxu1 (!%p217_p2), %v2494_v3  ;;  %402 = vst [vmem:[#allocation2 + $0x30] sm:$0xff] (!%p217_p2), %v2574_v9  ;;  %403 = vst [vmem:[#allocation2 + $0x38] sm:$0x3] (!%p217_p2), %v2574_v9  ;;  %v2500_v10 = vld [vmem:[%s3271_s4 + $0x10] sm:$0xff] (!%p217_p2)   ;;  %v2503_v13 = vld [vmem:[%s3271_s4 + $0x58] sm:$0xff] (!%p217_p2)   ;;  %p262_p4 = scmp.lt.s32.totalorder (!%p217_p2), %s2617_s22, 1 }
   0xa   : > { %2227 = vmatprep.subr.bf16.mxu1 (!%p217_p2), %v2497_v6  ;;  %404 = vst [vmem:[#allocation2 + $0x40] sm:$0xff] (!%p217_p2), %v2574_v9  ;;  %405 = vst [vmem:[#allocation2 + $0x48] sm:$0x3] (!%p217_p2), %v2574_v9  ;;  %v2501_v11 = vld [vmem:[%s3271_s4 + $0xd0] sm:$0xff] (!%p217_p2)   ;;  %v2504_v14 = vld [vmem:[%s3271_s4 + $0x18] sm:$0xff] (!%p217_p2)   ;;  %v339_v62 = vsub.s32 (!%p217_p2), 0, %v289_v50 }
   0xb   : > { %2164 = vmatpush3.bf16.msra.mxu0 (!%p217_p2), %v2496_v5  ;;  %406 = vst [vmem:[#allocation2 + $0x50] sm:$0xff] (!%p217_p2), %v2574_v9  ;;  %407 = vst [vmem:[#allocation2 + $0x58] sm:$0x3] (!%p217_p2), %v2574_v9  ;;  %v2502_v12 = vld [vmem:[%s3271_s4 + $0x90] sm:$0xff] (!%p217_p2)   ;;  %v2505_v15 = vld [vmem:[%s3271_s4 + $0xd8] sm:$0xff] (!%p217_p2)   ;;  %vm1869_vm1 = vcmask (!%p217_p2), 1040384  }
   0xc   : > { %408 = vst [vmem:[#allocation2 + $0x60] sm:$0xff] (!%p217_p2), %v2574_v9  ;;  %409 = vst [vmem:[#allocation2 + $0x68] sm:$0x3] (!%p217_p2), %v2574_v9  ;;  %2165 = vmatprep.subr.bf16.mxu0 (!%p217_p2), %v2499_v8  ;;  %v2506_v16 = vld [vmem:[%s3271_s4 + $0x98] sm:$0xff] (!%p217_p2)   ;;  %v2507_v17 = vld [vmem:[%s3271_s4 + $0x60] sm:$0xff] (!%p217_p2)  }
   0xd   : > { %410 = vst [vmem:[#allocation2 + $0x70] sm:$0xff] %v2574_v9  ;;  %411 = vst [vmem:[#allocation2 + $0x78] sm:$0x3] %v2574_v9  ;;  %2228 = vmatpush3.bf16.msra.mxu1 %v2498_v7  ;;  %v2508_v18 = vld [vmem:[%s3271_s4 + $0x20] sm:$0xff]   ;;  %v2511_v21 = vld [vmem:[%s3271_s4 + $0x68] sm:$0xff]   ;;  %s3275_s29 = smov (!%p251_p3, %s1964_s29), 31 }
   0xe   : > { %412 = vst [vmem:[#allocation2 + $0x80] sm:$0xff] %v2574_v9  ;;  %413 = vst [vmem:[#allocation2 + $0x88] sm:$0x3] %v2574_v9  ;;  %2229 = vmatprep.subr.bf16.mxu1 %v2501_v11  ;;  %v2509_v19 = vld [vmem:[%s3271_s4 + $0xe0] sm:$0xff]   ;;  %v2512_v22 = vld [vmem:[%s3271_s4 + $0x28] sm:$0xff]   ;;  %s1965_s30 = sshll.u32 %s3275_s29, 2 }
   0xf   : > { %414 = vst [vmem:[#allocation2 + $0x90] sm:$0xff] %v2574_v9  ;;  %415 = vst [vmem:[#allocation2 + $0x98] sm:$0x3] %v2574_v9  ;;  %2166 = vmatpush3.bf16.msra.mxu0 %v2500_v10  ;;  %v2510_v20 = vld [vmem:[%s3271_s4 + $0xa0] sm:$0xff]   ;;  %v2513_v23 = vld [vmem:[%s3271_s4 + $0xe8] sm:$0xff]   ;;  %s254_s9 = scalar_lea.vmem %s3267_s0, %s1965_s30  ;;  %s3228_s12 = scalar_lea.vmem %s3272_s5, %s1965_s30 }
  0x10   : > { %416 = vst [vmem:[#allocation2 + $0xa0] sm:$0xff] %v2574_v9  ;;  %417 = vst [vmem:[#allocation2 + $0xa8] sm:$0x3] %v2574_v9  ;;  %2167 = vmatprep.subr.bf16.mxu0 %v2503_v13  ;;  %v2514_v24 = vld [vmem:[%s3271_s4 + $0xa8] sm:$0xff]   ;;  %v2515_v25 = vld [vmem:[%s3271_s4 + $0x70] sm:$0xff]   ;;  %s3277_s22 = smov (!%p262_p4, %s2617_s22), 1 }
  0x11   : > { %418 = vst [vmem:[#allocation2 + $0xb0] sm:$0xff] %v2574_v9  ;;  %419 = vst [vmem:[#allocation2 + $0xb8] sm:$0x3] %v2574_v9  ;;  %2230 = vmatpush3.bf16.msra.mxu1 %v2502_v12  ;;  %v2516_v26 = vld [vmem:[%s3271_s4 + $0x30] sm:$0xff]   ;;  %v2519_v29 = vld [vmem:[%s3271_s4 + $0x78] sm:$0xff]   ;;  %s1968_s29 = sshll.u32 %s3277_s22, 1 }
  0x12   : > { %420 = vst [vmem:[#allocation2 + $0xc0] sm:$0xff] %v2574_v9  ;;  %421 = vst [vmem:[#allocation2 + $0xc8] sm:$0x3] %v2574_v9  ;;  %2231 = vmatprep.subr.bf16.mxu1 %v2505_v15  ;;  %v2517_v27 = vld [vmem:[%s3271_s4 + $0xf0] sm:$0xff]   ;;  %v2520_v30 = vld [vmem:[%s3271_s4 + $0x38] sm:$0xff]   ;;  %s265_s14 = scalar_lea.vmem %s3273_s6, %s1968_s29 }
  0x13   : > { %422 = vst [vmem:[#allocation2 + $0xd0] sm:$0xff] %v2574_v9  ;;  %423 = vst [vmem:[#allocation2 + $0xd8] sm:$0x3] %v2574_v9  ;;  %2168 = vmatpush3.bf16.msra.mxu0 %v2504_v14  ;;  %v2518_v28 = vld [vmem:[%s3271_s4 + $0xb0] sm:$0xff]   ;;  %v2521_v31 = vld [vmem:[%s3271_s4 + $0xf8] sm:$0xff]  }
  0x14   : > { %424 = vst [vmem:[#allocation2 + $0xe0] sm:$0xff] %v2574_v9  ;;  %425 = vst [vmem:[#allocation2 + $0xe8] sm:$0x3] %v2574_v9  ;;  %2169 = vmatprep.subr.bf16.mxu0 %v2507_v17  ;;  %v2522_v32 = vld [vmem:[%s3271_s4 + $0xb8] sm:$0xff]   ;;  %v267_v33 = vld [vmem:[%s3268_s1] sm:$0x3] }
  0x15   : > { %426 = vst [vmem:[#allocation2 + $0xf0] sm:$0xff] %v2574_v9  ;;  %427 = vst [vmem:[#allocation2 + $0xf8] sm:$0x3] %v2574_v9  ;;  %2232 = vmatpush3.bf16.msra.mxu1 %v2506_v16  ;;  %v268_v34 = vld [vmem:[%s3268_s1 + $0x2] sm:$0x3]  ;;  %v272_v35 = vsel %vm271_vm0, %v267_v33, 0.0 }
  0x16   : > { %428 = vst [vmem:[#allocation2 + $0x100] sm:$0xff] %v2574_v9  ;;  %429 = vst [vmem:[#allocation2 + $0x108] sm:$0x3] %v2574_v9  ;;  %2233 = vmatprep.subr.bf16.mxu1 %v2509_v19  ;;  %v273_v36 = vsel %vm271_vm0, %v268_v34, 0.0  ;;  %v2523_v38 = vld [vmem:[%s3271_s4 + $0x140] sm:$0xff]   ;;  %v2147_v55 = vld [vmem:[%s254_s9 + $0x8] sm:$0xff]  }
  0x17   : > { %430 = vst [vmem:[#allocation2 + $0x110] sm:$0xff] %v2574_v9  ;;  %431 = vst [vmem:[#allocation2 + $0x118] sm:$0x3] %v2574_v9  ;;  %2170 = vmatpush3.bf16.msra.mxu0 %v2508_v18  ;;  %v274_v37 = vadd.f32 %v273_v36, %v272_v35  ;;  %v2528_v42 = vld [vmem:[%s3271_s4 + $0x1c0] sm:$0xff]   ;;  %v2575_v46 = vmov 1966171168   ;;  %v2081_v2 = vunpack.c.l.bf16 %v2147_v55  ;;  %v2082_v5 = vunpack.c.h.bf16 %v2147_v55 }
  0x18   : > { %432 = vst [vmem:[#allocation2 + $0x120] sm:$0xff] %v2574_v9  ;;  %433 = vst [vmem:[#allocation2 + $0x128] sm:$0x3] %v2574_v9  ;;  %2171 = vmatprep.subr.bf16.mxu0 %v2511_v21  ;;  %v286_v47 = vunpack.c.l.s4 %v2575_v46  ;;  %v2076_v54 = vld [vmem:[%s254_s9] sm:$0xff]   ;;  %v2148_v57 = vld [vmem:[%s254_s9 + $0x10] sm:$0xff]  }
  0x19   : > { %434 = vst [vmem:[#allocation2 + $0x130] sm:$0xff] %v2574_v9  ;;  %435 = vst [vmem:[#allocation2 + $0x138] sm:$0x3] %v2574_v9  ;;  %2234 = vmatpush3.bf16.msra.mxu1 %v2510_v20  ;;  %v275_v39 = vmul.f32 0.00390625, %v274_v37  ;;  %v269_v56 = vld [vmem:[%s3269_s2] sm:$0x1]  ;;  %v2077_v0 = vunpack.c.l.bf16 %v2076_v54  ;;  %v2078_v1 = vunpack.c.h.bf16 %v2076_v54  ;;  %v2085_v6 = vunpack.c.l.bf16 %v2148_v57 }
  0x1a   : > { %2235 = vmatprep.subr.bf16.mxu1 %v2513_v23  ;;  %v287_v49 = vunpack.c.0.s8 %v286_v47  ;;  %v2149_v59 = vld [vmem:[%s254_s9 + $0x18] sm:$0xff]   ;;  %v2150_v60 = vld [vmem:[%s254_s9 + $0x20] sm:$0xff]   ;;  %v2151_v63 = vld [vmem:[%s254_s9 + $0x28] sm:$0xff]   ;;  %v2086_v7 = vunpack.c.h.bf16 %v2148_v57 }
  0x1b   : > { %2172 = vmatpush3.bf16.msra.mxu0 %v2512_v22  ;;  %v276_v40 = vmul.f32 %v275_v39, %v275_v39  ;;  %v2152_v3 = vld [vmem:[%s254_s9 + $0x30] sm:$0xff]   ;;  %v2781_v8 = vld [vmem:[%s254_s9 + $0x38] sm:$0xff]   ;;  %v270_v10 = vld [vmem:[%s3270_s3] sm:$0x1]  ;;  %v2089_v11 = vunpack.c.l.bf16 %v2149_v59  ;;  %v2090_v12 = vunpack.c.h.bf16 %v2149_v59  ;;  %v2093_v13 = vunpack.c.l.bf16 %v2150_v60 }
  0x1c   : > { %2173 = vmatprep.subr.bf16.mxu0 %v2515_v25  ;;  %v290_v51 = vsub.s32 %v287_v49, %v289_v50  ;;  %v2094_v14 = vunpack.c.h.bf16 %v2150_v60  ;;  %v2097_v17 = vunpack.c.l.bf16 %v2151_v63  ;;  %v2098_v18 = vunpack.c.h.bf16 %v2151_v63 }
  0x1d   : > { %2236 = vmatpush3.bf16.msra.mxu1 %v2514_v24  ;;  %v278_v41 = vrot.slane %v276_v40, 7  ;;  %v2101_v19 = vunpack.c.l.bf16 %v2152_v3  ;;  %v2102_v20 = vunpack.c.h.bf16 %v2152_v3  ;;  %v2105_v21 = vunpack.c.l.bf16 %v2781_v8 }
  0x1e   : > { %2237 = vmatprep.subr.bf16.mxu1 %v2517_v27  ;;  %v2106_v22 = vunpack.c.h.bf16 %v2781_v8  ;;  %v501_v8 = vld [vmem:[#allocation2 + $0x2] sm:$0xff] }
  0x1f   : > { %2174 = vmatpush3.bf16.msra.mxu0 %v2516_v26  ;;  %v280_v43 = vsub.f32 %v275_v39, %v278_v41 }
  0x20   : > { %2175 = vmatprep.subr.bf16.mxu0 %v2519_v29 }
  0x21   : > { %2238 = vmatpush3.bf16.msra.mxu1 %v2518_v28  ;;  %v281_v44 = vmax.f32 %v280_v43, 0.0  ;;  %v477_v43 = vld [vmem:[#allocation2 + $0x1] sm:$0xff] }
  0x22   : > { %2239 = vmatprep.subr.bf16.mxu1 %v2521_v31 }
  0x23   : > { %2176 = vmatpush3.bf16.msra.mxu0 %v2520_v30  ;;  %v282_v45 = vadd.f32 1e-05, %v281_v44 }
  0x24   : > { %2289 = vmatprep.subr.bf16.mxu0 %v2523_v38 }
  0x25   : > { %2240 = vmatpush3.bf16.msra.mxu1 %v2522_v32  ;;  %2563 = vrsqrt.f32 %v282_v45 }
  0x26   : > { %2353 = vmatprep.subr.bf16.mxu1 %v2528_v42 }
  0x2f   : > { %v2564_v52 = vpop.eup %2563 }
  0x30   : > { %v291_v53 = vrot.slane %v2564_v52, %v290_v51 }
  0x32   : > { %v292_v58 = vcombine.high %v291_v53, %v291_v53 }
  0x34   : > { %v299_v61 = vrot.slane %v292_v58, %v290_v51 }
  0x36   : > { %v301_v4 = vmul.f32 %v299_v61, %v269_v56 }
  0x38   : > { %v302_v15 = vmul.f32 %v301_v4, %v275_v39  ;;  %v340_v16 = vrot.slane %v301_v4, %v339_v62 }
  0x3a   : > { %v303_v23 = vsub.f32 %v270_v10, %v302_v15  ;;  %v342_v24 = vmul.f32 %v2077_v0, %v340_v16  ;;  %v343_v25 = vmul.f32 %v2078_v1, %v340_v16  ;;  %v344_v26 = vmul.f32 %v2081_v2, %v340_v16 }
  0x3b   : > { %v345_v27 = vmul.f32 %v2082_v5, %v340_v16  ;;  %v346_v28 = vmul.f32 %v2085_v6, %v340_v16  ;;  %v347_v29 = vmul.f32 %v2086_v7, %v340_v16  ;;  %v348_v30 = vmul.f32 %v2089_v11, %v340_v16 }
  0x3c   : > { %v362_v31 = vrot.slane %v303_v23, %v339_v62  ;;  %v349_v32 = vmul.f32 %v2090_v12, %v340_v16  ;;  %v350_v33 = vmul.f32 %v2093_v13, %v340_v16  ;;  %v351_v34 = vmul.f32 %v2094_v14, %v340_v16  ;;  %v2524_v13 = vld [vmem:[%s3271_s4 + $0x100] sm:$0xff]  }
  0x3d   : > { %v352_v35 = vmul.f32 %v2097_v17, %v340_v16  ;;  %v353_v36 = vmul.f32 %v2098_v18, %v340_v16  ;;  %v354_v37 = vmul.f32 %v2101_v19, %v340_v16  ;;  %v355_v38 = vmul.f32 %v2102_v20, %v340_v16 }
  0x3e   : > { %v364_v39 = vadd.f32 %v362_v31, %v342_v24  ;;  %v365_v40 = vadd.f32 %v362_v31, %v343_v25  ;;  %v366_v41 = vadd.f32 %v362_v31, %v344_v26  ;;  %v367_v42 = vadd.f32 %v362_v31, %v345_v27 }
  0x3f   : > { %v368_v44 = vadd.f32 %v362_v31, %v346_v28  ;;  %v369_v45 = vadd.f32 %v362_v31, %v347_v29  ;;  %v370_v46 = vadd.f32 %v362_v31, %v348_v30  ;;  %v371_v47 = vadd.f32 %v362_v31, %v349_v32  ;;  %v2530_v32 = vld [vmem:[%s3271_s4 + $0x180] sm:$0xff]  }
  0x40   : > { %v2788_v48 = vmax.f32 %v364_v39, 0.0  ;;  %v2790_v49 = vmax.f32 %v365_v40, 0.0  ;;  %v2792_v50 = vmax.f32 %v366_v41, 0.0  ;;  %v2794_v51 = vmax.f32 %v367_v42, 0.0  ;;  %v2534_v40 = vld [vmem:[%s3271_s4 + $0x188] sm:$0xff]   ;;  %v2536_v42 = vld [vmem:[%s3271_s4 + $0x1d0] sm:$0xff]  }
  0x41   : > { %v2796_v52 = vmax.f32 %v368_v44, 0.0  ;;  %v2798_v53 = vmax.f32 %v369_v45, 0.0  ;;  %v2800_v54 = vmax.f32 %v370_v46, 0.0  ;;  %v2802_v55 = vmax.f32 %v371_v47, 0.0  ;;  %v2529_v46 = vld [vmem:[%s3271_s4 + $0x110] sm:$0xff]  }
  0x42   : > { %437 = vst [vmem:[#allocation2 + $0x11] sm:$0xff] %v2788_v48  ;;  %v493_v56 = vpack.c.bf16 %v2788_v48, %v477_v43  ;;  %438 = vst [vmem:[#allocation2 + $0x21] sm:$0xff] %v2790_v49  ;;  %v372_v57 = vadd.f32 %v362_v31, %v350_v33  ;;  %v373_v58 = vadd.f32 %v362_v31, %v351_v34  ;;  %v2532_v33 = vld [vmem:[%s3271_s4 + $0x1c8] sm:$0xff]  }
  0x43   : > { %439 = vst [vmem:[#allocation2 + $0x31] sm:$0xff] %v2792_v50  ;;  %440 = vst [vmem:[#allocation2 + $0x41] sm:$0xff] %v2794_v51  ;;  %v374_v59 = vadd.f32 %v362_v31, %v352_v35  ;;  %v375_v60 = vadd.f32 %v362_v31, %v353_v36  ;;  %v376_v63 = vadd.f32 %v362_v31, %v354_v37  ;;  %v2526_v34 = vld [vmem:[%s3271_s4 + $0x108] sm:$0xff]   ;;  %v2527_v37 = vld [vmem:[%s3271_s4 + $0x150] sm:$0xff]  }
  0x44   : > { %441 = vst [vmem:[#allocation2 + $0x51] sm:$0xff] %v2796_v52  ;;  %442 = vst [vmem:[#allocation2 + $0x61] sm:$0xff] %v2798_v53  ;;  %1278 = vmatprep.mubr.bf16.mxu0 %v493_v56  ;;  %v2813_v61 = vmax.f32 %v372_v57, 0.0  ;;  %v2815_v62 = vmax.f32 %v373_v58, 0.0  ;;  %v377_v0 = vadd.f32 %v362_v31, %v355_v38  ;;  %v356_v3 = vmul.f32 %v2105_v21, %v340_v16  ;;  %v2531_v56 = vld [vmem:[%s3271_s4 + $0x158] sm:$0xff]   ;;  %v2538_v57 = vld [vmem:[%s3271_s4 + $0x190] sm:$0xff]  }
  0x45   : > { %443 = vst [vmem:[#allocation2 + $0x71] sm:$0xff] %v2800_v54  ;;  %444 = vst [vmem:[#allocation2 + $0x81] sm:$0xff] %v2802_v55  ;;  %v2817_v1 = vmax.f32 %v374_v59, 0.0  ;;  %v2819_v2 = vmax.f32 %v375_v60, 0.0  ;;  %v357_v4 = vmul.f32 %v2106_v22, %v340_v16  ;;  %v2823_v5 = vmax.f32 %v376_v63, 0.0  ;;  %v2540_v58 = vld [vmem:[%s3271_s4 + $0x1d8] sm:$0xff]  }
  0x46   : > { %445 = vst [vmem:[#allocation2 + $0xb1] sm:$0xff] %v2813_v61  ;;  %446 = vst [vmem:[#allocation2 + $0xc1] sm:$0xff] %v2815_v62  ;;  %v2825_v6 = vmax.f32 %v377_v0, 0.0  ;;  %v565_v7 = vpack.c.bf16 %v2790_v49, %v2788_v48  ;;  %v378_v10 = vadd.f32 %v362_v31, %v356_v3  ;;  %v566_v12 = vpack.c.bf16 %v2794_v51, %v2792_v50  ;;  %v2533_v59 = vld [vmem:[%s3271_s4 + $0x118] sm:$0xff]   ;;  %v2535_v0 = vld [vmem:[%s3271_s4 + $0x160] sm:$0xff]  }
  0x47   : > { %447 = vst [vmem:[#allocation2 + $0xd1] sm:$0xff] %v2817_v1  ;;  %448 = vst [vmem:[#allocation2 + $0xe1] sm:$0xff] %v2819_v2  ;;  %v379_v11 = vadd.f32 %v362_v31, %v357_v4  ;;  %v2838_v14 = vpack.c.bf16 %v2792_v50, %v2790_v49  ;;  %v567_v15 = vpack.c.bf16 %v2798_v53, %v2796_v52  ;;  %v2525_v31 = vld [vmem:[%s3271_s4 + $0x148] sm:$0xff]   ;;  %v2558_v48 = vld [vmem:[%s3271_s4 + $0x218] sm:$0xff]  }
  0x48   : > { %449 = vst [vmem:[#allocation2 + $0xf1] sm:$0xff] %v2823_v5  ;;  %450 = vst [vmem:[#allocation2 + $0x101] sm:$0xff] %v2825_v6  ;;  %v568_v16 = vpack.c.bf16 %v2802_v55, %v2800_v54  ;;  %v2848_v20 = vmax.f32 %v378_v10, 0.0  ;;  %v569_v22 = vpack.c.bf16 %v2815_v62, %v2813_v61  ;;  %v570_v23 = vpack.c.bf16 %v2819_v2, %v2817_v1 }
  0x49   : > { %v525_v17 = vld [vmem:[#allocation2 + $0x10] sm:$0xff]  ;;  %v526_v18 = vld [vmem:[#allocation2 + $0x20] sm:$0xff]  ;;  %v2850_v21 = vmax.f32 %v379_v11, 0.0  ;;  %v571_v29 = vpack.c.bf16 %v2825_v6, %v2823_v5  ;;  %v2896_v44 = vpack.c.bf16 %v2796_v52, %v2794_v51 }
  0x4a   : > { %v2846_v19 = vld [vmem:[#allocation2 + $0x12] sm:$0xff]  ;;  %v541_v24 = vpack.c.bf16 %v526_v18, %v525_v17  ;;  %v469_v25 = vpack.c.bf16 %v525_v17, %v2574_v9  ;;  %v528_v28 = vld [vmem:[#allocation2 + $0x40] sm:$0xff]  ;;  %451 = vst [vmem:[#allocation2 + $0x111] sm:$0xff] %v2848_v20  ;;  %v2941_v17 = vpack.c.bf16 %v2800_v54, %v2798_v53 }
  0x4b   : > { %v517_v26 = vpack.c.bf16 %v2846_v19, %v501_v8  ;;  %v527_v27 = vld [vmem:[#allocation2 + $0x30] sm:$0xff]  ;;  %452 = vst [vmem:[#allocation2 + $0x121] sm:$0xff] %v2850_v21  ;;  %v2875_v35 = vld [vmem:[#allocation2 + $0x22] sm:$0xff]  ;;  %v572_v47 = vpack.c.bf16 %v2850_v21, %v2848_v20  ;;  %v2542_v8 = vld [vmem:[%s3271_s4 + $0x198] sm:$0xff]  }
  0x4c   : > { %v542_v30 = vpack.c.bf16 %v528_v28, %v527_v27  ;;  %1375 = vmatprep.mubr.bf16.mxu1 %v541_v24  ;;  %1279 = vmatmul.mubr.bf16.vlgmr.msra.gmra.mrb[0].mxu0 %v469_v25  ;;  %v2877_v36 = vld [vmem:[#allocation2 + $0x32] sm:$0xff]  ;;  %v530_v39 = vld [vmem:[#allocation2 + $0x60] sm:$0xff]  ;;  %v2885_v41 = vpack.c.bf16 %v527_v27, %v526_v18  ;;  %v2539_v25 = vld [vmem:[%s3271_s4 + $0x168] sm:$0xff]  }
  0x4d   : > { %1376 = vmatmul.mubr.bf16.vlgmr.msra.gmra.mrb[0].mxu1 %v517_v26  ;;  %2290 = vmatpush3.bf16.msra.mxu0 %v2524_v13  ;;  %v529_v38 = vld [vmem:[#allocation2 + $0x50] sm:$0xff]  ;;  %v2892_v43 = vpack.c.bf16 %v2877_v36, %v2875_v35  ;;  %v2918_v60 = vld [vmem:[#allocation2 + $0x42] sm:$0xff]  ;;  %v2562_v53 = vld [vmem:[%s3271_s4 + $0x238] sm:$0xff]  }
  0x4e   : > { %1286 = vmatprep.mubr.bf16.mxu0 %v2838_v14  ;;  %1383 = vmatprep.mubr.bf16.mxu1 %v542_v30  ;;  %v543_v45 = vpack.c.bf16 %v530_v39, %v529_v38  ;;  %v2920_v63 = vld [vmem:[#allocation2 + $0x52] sm:$0xff]  ;;  %v2925_v4 = vld [vmem:[#allocation2 + $0x80] sm:$0xff]  ;;  %v2930_v10 = vpack.c.bf16 %v529_v38, %v528_v28  ;;  %v2547_v27 = vld [vmem:[%s3271_s4 + $0x1e8] sm:$0xff]  }
  0x4f   : > { %2291 = vmatprep.subr.bf16.mxu0 %v2525_v31  ;;  %2354 = vmatpush3.bf16.msra.mxu1 %v2530_v32  ;;  %v531_v3 = vld [vmem:[#allocation2 + $0x70] sm:$0xff]  ;;  %v2544_v11 = vld [vmem:[%s3271_s4 + $0x1e0] sm:$0xff]   ;;  %v2937_v13 = vpack.c.bf16 %v2920_v63, %v2918_v60  ;;  %v2541_v30 = vld [vmem:[%s3271_s4 + $0x128] sm:$0xff]  }
  0x50   : > { %2355 = vmatprep.subr.bf16.mxu1 %v2532_v33  ;;  %v544_v18 = vpack.c.bf16 %v2925_v4, %v531_v3  ;;  %v2537_v24 = vld [vmem:[%s3271_s4 + $0x120] sm:$0xff]   ;;  %v2964_v32 = vld [vmem:[#allocation2 + $0x72] sm:$0xff]  ;;  %v2548_v38 = vld [vmem:[%s3271_s4 + $0x1a8] sm:$0xff]  }
  0x51   : > { %2292 = vmatpush3.bf16.msra.mxu0 %v2526_v34  ;;  %v2546_v26 = vld [vmem:[%s3271_s4 + $0x1a0] sm:$0xff]   ;;  %v2543_v33 = vld [vmem:[%s3271_s4 + $0x170] sm:$0xff]  }
  0x52   : > { %2293 = vmatprep.subr.bf16.mxu0 %v2527_v37  ;;  %v485_v28 = vld [vmem:[#allocation2 + $0xa1] sm:$0xff]  ;;  %v533_v34 = vld [vmem:[#allocation2 + $0xb0] sm:$0xff] }
  0x53   : > { %2356 = vmatpush3.bf16.msra.mxu1 %v2534_v40  ;;  %v2962_v31 = vld [vmem:[#allocation2 + $0x62] sm:$0xff]  ;;  %v2972_v40 = vpack.c.bf16 %v531_v3, %v530_v39  ;;  %v2549_v39 = vld [vmem:[%s3271_s4 + $0x178] sm:$0xff]  }
  0x54   : > { %1287 = vmatmul.mubr.bf16.gmra.mrb[4].mxu0 %v2885_v41  ;;  %2357 = vmatprep.subr.bf16.mxu1 %v2536_v42  ;;  %v534_v37 = vld [vmem:[#allocation2 + $0xc0] sm:$0xff]  ;;  %v2551_v42 = vld [vmem:[%s3271_s4 + $0x1f0] sm:$0xff]  }
  0x55   : > { %1384 = vmatmul.mubr.bf16.gmra.mrb[4].mxu1 %v2892_v43  ;;  %1294 = vmatprep.mubr.bf16.mxu0 %v2896_v44  ;;  %v2996_v3 = vld [vmem:[#allocation2 + $0xb2] sm:$0xff]  ;;  %v3089_v49 = vld [vmem:[#allocation2 + $0x82] sm:$0xff] }
  0x56   : > { %1391 = vmatprep.mubr.bf16.mxu1 %v543_v45  ;;  %2294 = vmatpush3.bf16.msra.mxu0 %v2529_v46  ;;  %v2979_v45 = vpack.c.bf16 %v2964_v32, %v2962_v31  ;;  %v497_v46 = vpack.c.bf16 %v2813_v61, %v485_v28  ;;  %v3011_v28 = vpack.c.bf16 %v2817_v1, %v2815_v62  ;;  %v637_v61 = vld [vmem:[#allocation2 + $0x131] sm:$0xff] }
  0x57   : > { %2295 = vmatprep.subr.bf16.mxu0 %v2531_v56  ;;  %2358 = vmatpush3.bf16.msra.mxu1 %v2538_v57  ;;  %v545_v56 = vpack.c.bf16 %v534_v37, %v533_v34  ;;  %v2545_v57 = vld [vmem:[%s3271_s4 + $0x130] sm:$0xff]   ;;  %v592_v50 = vpack.c.bf16 %v3089_v49, %v2964_v32 }
  0x58   : > { %2359 = vmatprep.subr.bf16.mxu1 %v2540_v58  ;;  %v2552_v58 = vld [vmem:[%s3271_s4 + $0x1b0] sm:$0xff]  }
  0x5a   : > { %2296 = vmatpush3.bf16.msra.mxu0 %v2533_v59  ;;  %v2553_v59 = vld [vmem:[%s3271_s4 + $0x1f8] sm:$0xff]  }
  0x5b   : > { %2297 = vmatprep.subr.bf16.mxu0 %v2535_v0  ;;  %2360 = vmatpush3.bf16.msra.mxu1 %v2542_v8  ;;  %v509_v0 = vld [vmem:[#allocation2 + $0xa2] sm:$0xff]  ;;  %v2550_v8 = vld [vmem:[%s3271_s4 + $0x138] sm:$0xff]  }
  0x5c   : > { %1295 = vmatmul.mubr.bf16.gmra.mrb[8].mxu0 %v2930_v10  ;;  %2361 = vmatprep.subr.bf16.mxu1 %v2544_v11  ;;  %v2554_v11 = vld [vmem:[%s3271_s4 + $0x1b8] sm:$0xff]  }
  0x5d   : > { %1392 = vmatmul.mubr.bf16.gmra.mrb[8].mxu1 %v2937_v13  ;;  %1302 = vmatprep.mubr.bf16.mxu0 %v2941_v17 }
  0x5e   : > { %1399 = vmatprep.mubr.bf16.mxu1 %v544_v18  ;;  %2298 = vmatpush3.bf16.msra.mxu0 %v2537_v24  ;;  %v535_v18 = vld [vmem:[#allocation2 + $0xd0] sm:$0xff]  ;;  %v536_v24 = vld [vmem:[#allocation2 + $0xe0] sm:$0xff] }
  0x5f   : > { %2299 = vmatprep.subr.bf16.mxu0 %v2539_v25  ;;  %2362 = vmatpush3.bf16.msra.mxu1 %v2546_v26  ;;  %v2555_v25 = vld [vmem:[%s3271_s4 + $0x200] sm:$0xff]   ;;  %v473_v26 = vpack.c.bf16 %v533_v34, %v2574_v9  ;;  %v3016_v9 = vld [vmem:[#allocation2 + $0xd2] sm:$0xff] }
  0x60   : > { %2363 = vmatprep.subr.bf16.mxu1 %v2547_v27  ;;  %v521_v27 = vpack.c.bf16 %v2996_v3, %v509_v0  ;;  %v537_v34 = vld [vmem:[#allocation2 + $0xf0] sm:$0xff] }
  0x61   : > { %v3037_v0 = vpack.c.bf16 %v537_v34, %v536_v24 }
  0x62   : > { %2300 = vmatpush3.bf16.msra.mxu0 %v2541_v30  ;;  %v546_v30 = vpack.c.bf16 %v536_v24, %v535_v18  ;;  %v3053_v24 = vld [vmem:[#allocation2 + $0x112] sm:$0xff] }
  0x63   : > { %2301 = vmatprep.subr.bf16.mxu0 %v2543_v33  ;;  %2364 = vmatpush3.bf16.msra.mxu1 %v2548_v38  ;;  %v3014_v33 = vld [vmem:[#allocation2 + $0xc2] sm:$0xff] }
  0x64   : > { %1303 = vmatmul.mubr.bf16.gmra.mrb[12].mxu0 %v2972_v40  ;;  %2365 = vmatprep.subr.bf16.mxu1 %v2551_v42  ;;  %v538_v38 = vld [vmem:[#allocation2 + $0x100] sm:$0xff]  ;;  %v3018_v42 = vpack.c.bf16 %v535_v18, %v534_v37  ;;  %v3033_v37 = vld [vmem:[#allocation2 + $0xf2] sm:$0xff]  ;;  %v593_v52 = vpack.c.bf16 %v3014_v33, %v2996_v3 }
  0x65   : > { %1400 = vmatmul.mubr.bf16.gmra.mrb[12].mxu1 %v2979_v45  ;;  %1310 = vmatprep.mubr.bf16.mxu0 %v497_v46  ;;  %v3022_v46 = vpack.c.bf16 %v3016_v9, %v3014_v33 }
  0x66   : > { %1407 = vmatprep.mubr.bf16.mxu1 %v545_v56  ;;  %2302 = vmatpush3.bf16.msra.mxu0 %v2545_v57  ;;  %v3026_v56 = vpack.c.bf16 %v2823_v5, %v2819_v2  ;;  %v547_v57 = vpack.c.bf16 %v538_v38, %v537_v34  ;;  %v589_v34 = vpack.c.bf16 %v2875_v35, %v2846_v19  ;;  %v2559_v35 = vld [vmem:[%s3271_s4 + $0x220] sm:$0xff]   ;;  %v653_v2 = vld [vmem:[#allocation2 + $0x92] sm:$0xff] }
  0x67   : > { %2303 = vmatprep.subr.bf16.mxu0 %v2549_v39  ;;  %2366 = vmatpush3.bf16.msra.mxu1 %v2552_v58  ;;  %v3031_v39 = vld [vmem:[#allocation2 + $0xe2] sm:$0xff]  ;;  %v539_v58 = vld [vmem:[#allocation2 + $0x110] sm:$0xff]  ;;  %v591_v19 = vpack.c.bf16 %v2962_v31, %v2920_v63 }
  0x68   : > { %2367 = vmatprep.subr.bf16.mxu1 %v2553_v59  ;;  %v3035_v59 = vld [vmem:[#allocation2 + $0x120] sm:$0xff]  ;;  %v661_v5 = vld [vmem:[#allocation2 + $0x132] sm:$0xff] }
  0x69   : > { %v548_v18 = vpack.c.bf16 %v3035_v59, %v539_v58 }
  0x6a   : > { %2304 = vmatpush3.bf16.msra.mxu0 %v2550_v8  ;;  %v3041_v8 = vpack.c.bf16 %v3033_v37, %v3031_v39 }
  0x6b   : > { %2368 = vmatpush3.bf16.msra.mxu1 %v2554_v11  ;;  %2433 = vmatprep.subr.bf16.mxu0 %v2555_v25  ;;  %v3045_v11 = vpack.c.bf16 %v2848_v20, %v2825_v6  ;;  %v665_v6 = vpack.c.bf16 %v653_v2, %v3089_v49 }
  0x6c   : > { %1311 = vmatmul.mubr.bf16.gmra.mrb[16].mxu0 %v473_v26  ;;  %2465 = vmatprep.subr.bf16.mxu1 %v2555_v25  ;;  %v3051_v26 = vld [vmem:[#allocation2 + $0x102] sm:$0xff] }
  0x6d   : > { %1408 = vmatmul.mubr.bf16.gmra.mrb[16].mxu1 %v521_v27  ;;  %1318 = vmatprep.mubr.bf16.mxu0 %v3011_v28  ;;  %v3055_v27 = vpack.c.bf16 %v539_v58, %v538_v38  ;;  %v2556_v38 = vld [vmem:[%s3271_s4 + $0x208] sm:$0xff]   ;;  %v595_v54 = vpack.c.bf16 %v3051_v26, %v3033_v37 }
  0x6e   : > { %1415 = vmatprep.mubr.bf16.mxu1 %v546_v30  ;;  %v3059_v30 = vpack.c.bf16 %v3053_v24, %v3051_v26 }
  0x74   : > { %1319 = vmatmul.mubr.bf16.gmra.mrb[20].mxu0 %v3018_v42 }
  0x75   : > { %1416 = vmatmul.mubr.bf16.gmra.mrb[20].mxu1 %v3022_v46  ;;  %1326 = vmatprep.mubr.bf16.mxu0 %v3026_v56 }
  0x76   : > { %1423 = vmatprep.mubr.bf16.mxu1 %v547_v57  ;;  %v590_v57 = vpack.c.bf16 %v2918_v60, %v2877_v36  ;;  %v2561_v36 = vld [vmem:[%s3271_s4 + $0x230] sm:$0xff]  }
  0x7c   : > { %1327 = vmatmul.mubr.bf16.gmra.mrb[24].mxu0 %v3037_v0 }
  0x7d   : > { %1424 = vmatmul.mubr.bf16.gmra.mrb[24].mxu1 %v3041_v8  ;;  %1334 = vmatprep.mubr.bf16.mxu0 %v3045_v11 }
  0x7e   : > { %1431 = vmatprep.mubr.bf16.mxu1 %v548_v18 }
  0x84   : > { %1335 = vmatmul.mubr.bf16.gmra.mrb[28].mxu0 %v3055_v27 }
  0x85   : > { %1432 = vmatmul.mubr.bf16.gmra.mrb[28].mxu1 %v3059_v30  ;;  %1472 = vmatprep.mubr.bf16.mxu0 %v589_v34 }
  0x86   : > { %1569 = vmatprep.mubr.bf16.mxu1 %v2838_v14  ;;  %v2557_v14 = vld [vmem:[%s3271_s4 + $0x210] sm:$0xff]  }
  0x8c   : > { %1473 = vmatmul.mubr.bf16.vlgmr.msra.gmra.mrb[32].mxu0 %v565_v7  ;;  %v629_v7 = vld [vmem:[#allocation2 + $0x91] sm:$0xff] }
  0x8d   : > { %1570 = vmatmul.mubr.bf16.vlgmr.msra.gmra.mrb[32].mxu1 %v2885_v41  ;;  %2434 = vmatpush3.bf16.msra.mxu0 %v2555_v25  ;;  %v641_v51 = vpack.c.bf16 %v629_v7, %v2802_v55  ;;  %v2565_v41 = vld [vmem:[#allocation2] sm:$0xff] }
  0x8e   : > { %1480 = vmatprep.mubr.bf16.mxu0 %v590_v57  ;;  %1577 = vmatprep.mubr.bf16.mxu1 %v2896_v44  ;;  %v617_v44 = vpack.c.bf16 %v2565_v41, %v2925_v4  ;;  %v588_v55 = vld [vmem:[#allocation2 + $0x122] sm:$0xff]  ;;  %v621_v1 = vpack.c.bf16 %v2565_v41, %v3035_v59 }
  0x8f   : > { %2435 = vmatprep.subr.bf16.mxu0 %v2556_v38  ;;  %2473 = vmatpush3.bf16.msra.mxu1 %v2555_v25  ;;  %v596_v62 = vpack.c.bf16 %v588_v55, %v3053_v24 }
  0x90   : > { %2466 = vmatprep.subr.bf16.mxu1 %v2556_v38 }
  0x91   : > { %2436 = vmatpush3.bf16.msra.mxu0 %v2556_v38 }
  0x92   : > { %2437 = vmatprep.subr.bf16.mxu0 %v2557_v14 }
  0x93   : > { %2474 = vmatpush3.bf16.msra.mxu1 %v2556_v38 }
  0x94   : > { %1481 = vmatmul.mubr.bf16.gmra.mrb[36].mxu0 %v566_v12  ;;  %2467 = vmatprep.subr.bf16.mxu1 %v2557_v14  ;;  %v2560_v12 = vld [vmem:[%s3271_s4 + $0x228] sm:$0xff]  }
  0x95   : > { %1578 = vmatmul.mubr.bf16.gmra.mrb[36].mxu1 %v2930_v10  ;;  %1488 = vmatprep.mubr.bf16.mxu0 %v591_v19 }
  0x96   : > { %1585 = vmatprep.mubr.bf16.mxu1 %v2941_v17  ;;  %2438 = vmatpush3.bf16.msra.mxu0 %v2557_v14 }
  0x97   : > { %2439 = vmatprep.subr.bf16.mxu0 %v2558_v48  ;;  %2475 = vmatpush3.bf16.msra.mxu1 %v2557_v14 }
  0x98   : > { %2468 = vmatprep.subr.bf16.mxu1 %v2558_v48 }
  0x9a   : > { %2440 = vmatpush3.bf16.msra.mxu0 %v2558_v48 }
  0x9b   : > { %2441 = vmatprep.subr.bf16.mxu0 %v2559_v35  ;;  %2476 = vmatpush3.bf16.msra.mxu1 %v2558_v48 }
  0x9c   : > { %1489 = vmatmul.mubr.bf16.gmra.mrb[40].mxu0 %v567_v15  ;;  %2469 = vmatprep.subr.bf16.mxu1 %v2559_v35  ;;  %v594_v15 = vpack.c.bf16 %v3031_v39, %v3016_v9 }
  0x9d   : > { %1586 = vmatmul.mubr.bf16.gmra.mrb[40].mxu1 %v2972_v40  ;;  %1496 = vmatprep.mubr.bf16.mxu0 %v592_v50 }
  0x9e   : > { %1593 = vmatprep.mubr.bf16.mxu1 %v641_v51  ;;  %2442 = vmatpush3.bf16.msra.mxu0 %v2559_v35 }
  0x9f   : > { %2443 = vmatprep.subr.bf16.mxu0 %v2560_v12  ;;  %2477 = vmatpush3.bf16.msra.mxu1 %v2559_v35 }
  0xa0   : > { %2470 = vmatprep.subr.bf16.mxu1 %v2560_v12 }
  0xa2   : > { %2444 = vmatpush3.bf16.msra.mxu0 %v2560_v12 }
  0xa3   : > { %2445 = vmatprep.subr.bf16.mxu0 %v2561_v36  ;;  %2478 = vmatpush3.bf16.msra.mxu1 %v2560_v12 }
  0xa4   : > { %1497 = vmatmul.mubr.bf16.gmra.mrb[44].mxu0 %v568_v16  ;;  %2471 = vmatprep.subr.bf16.mxu1 %v2561_v36  ;;  %v645_v16 = vpack.c.bf16 %v637_v61, %v2850_v21 }
  0xa5   : > { %1594 = vmatmul.mubr.bf16.gmra.mrb[44].mxu1 %v617_v44  ;;  %1504 = vmatprep.mubr.bf16.mxu0 %v593_v52 }
  0xa6   : > { %1601 = vmatprep.mubr.bf16.mxu1 %v3011_v28  ;;  %2446 = vmatpush3.bf16.msra.mxu0 %v2561_v36 }
  0xa7   : > { %2447 = vmatprep.subr.bf16.mxu0 %v2562_v53  ;;  %2479 = vmatpush3.bf16.msra.mxu1 %v2561_v36 }
  0xa8   : > { %2472 = vmatprep.subr.bf16.mxu1 %v2562_v53 }
  0xaa   : > { %2448 = vmatpush3.bf16.msra.mxu0 %v2562_v53 }
  0xab   : > { %2480 = vmatpush3.bf16.msra.mxu1 %v2562_v53 }
  0xac   : > { %1505 = vmatmul.mubr.bf16.gmra.mrb[48].mxu0 %v569_v22  ;;  %v669_v22 = vpack.c.bf16 %v661_v5, %v588_v55 }
  0xad   : > { %1602 = vmatmul.mubr.bf16.gmra.mrb[48].mxu1 %v3018_v42  ;;  %1512 = vmatprep.mubr.bf16.mxu0 %v594_v15 }
  0xae   : > { %1609 = vmatprep.mubr.bf16.mxu1 %v3026_v56 }
  0xb4   : > { %1513 = vmatmul.mubr.bf16.gmra.mrb[52].mxu0 %v570_v23 }
  0xb5   : > { %1610 = vmatmul.mubr.bf16.gmra.mrb[52].mxu1 %v3037_v0  ;;  %1520 = vmatprep.mubr.bf16.mxu0 %v595_v54 }
  0xb6   : > { %1617 = vmatprep.mubr.bf16.mxu1 %v3045_v11 }
  0xbc   : > { %1521 = vmatmul.mubr.bf16.gmra.mrb[56].mxu0 %v571_v29 }
  0xbd   : > { %1618 = vmatmul.mubr.bf16.gmra.mrb[56].mxu1 %v3055_v27  ;;  %1528 = vmatprep.mubr.bf16.mxu0 %v596_v62 }
  0xbe   : > { %1625 = vmatprep.mubr.bf16.mxu1 %v645_v16 }
  0xc4   : > { %1529 = vmatmul.mubr.bf16.gmra.mrb[60].mxu0 %v572_v47 }
  0xc5   : > { %1626 = vmatmul.mubr.bf16.gmra.mrb[60].mxu1 %v621_v1  ;;  %2449 = vmatprep.mubr.bf16.mxu0 %v2892_v43 }
  0xc6   : > { %2457 = vmatprep.mubr.bf16.mxu1 %v3022_v46 }
  0xcc   : > { %2450 = vmatmul.mubr.bf16.vlgmr.msra.gmra.mrb[64].mxu0 %v2937_v13 }
  0xcd   : > { %2458 = vmatmul.mubr.bf16.vlgmr.msra.gmra.mrb[64].mxu1 %v3041_v8  ;;  %2453 = vmatprep.mubr.bf16.mxu0 %v2979_v45 }
  0xce   : > { %2461 = vmatprep.mubr.bf16.mxu1 %v3059_v30 }
  0xd4   : > { %2454 = vmatmul.mubr.bf16.gmra.mrb[68].mxu0 %v665_v6 }
  0xd5   : > { %2462 = vmatmul.mubr.bf16.gmra.mrb[68].mxu1 %v669_v22 }
 0x11f   : > { %v2177_v20 = vpop.f32.mrb[0].mxu0 }
 0x120   : > { %v2241_v21 = vpop.f32.mrb[0].mxu1  ;;  %v2178_v23 = vpop.f32.mrb[1].mxu0 }
 0x121   : > { %v2179_v29 = vadd.f32 %v2178_v23, %v2177_v20  ;;  %v2242_v43 = vpop.f32.mrb[1].mxu1  ;;  %v2180_v47 = vpop.f32.mrb[2].mxu0 }
 0x122   : > { %v2243_v60 = vadd.f32 %v2242_v43, %v2241_v21  ;;  %v2244_v63 = vpop.f32.mrb[2].mxu1  ;;  %v2181_v4 = vpop.f32.mrb[3].mxu0 }
 0x123   : > { %v2182_v10 = vadd.f32 %v2181_v4, %v2180_v47  ;;  %v2245_v13 = vpop.f32.mrb[3].mxu1 }
 0x124   : > { %v3148_v17 = vadd.f32 %v2243_v60, %v2179_v29  ;;  %v2246_v31 = vadd.f32 %v2245_v13, %v2244_v63 }
 0x126   : > { %v3150_v32 = vadd.f32 %v2246_v31, %v2182_v10 }
 0x127   : > { %v2183_v40 = vpop.f32.mrb[4].mxu0 }
 0x128   : > { %v2247_v45 = vpop.f32.mrb[4].mxu1  ;;  %v2184_v3 = vpop.f32.mrb[5].mxu0 }
 0x129   : > { %v2185_v25 = vadd.f32 %v2184_v3, %v2183_v40  ;;  %v2248_v28 = vpop.f32.mrb[5].mxu1  ;;  %v2186_v33 = vpop.f32.mrb[6].mxu0 }
 0x12a   : > { %v2249_v9 = vadd.f32 %v2248_v28, %v2247_v45  ;;  %v2250_v42 = vpop.f32.mrb[6].mxu1  ;;  %v2187_v46 = vpop.f32.mrb[7].mxu0 }
 0x12b   : > { %v2188_v56 = vadd.f32 %v2187_v46, %v2186_v33  ;;  %v2251_v39 = vpop.f32.mrb[7].mxu1 }
 0x12c   : > { %v3152_v37 = vadd.f32 %v2249_v9, %v2185_v25  ;;  %v2252_v58 = vadd.f32 %v2251_v39, %v2250_v42 }
 0x12e   : > { %v3154_v59 = vadd.f32 %v2252_v58, %v2188_v56 }
 0x12f   : > { %v2189_v0 = vpop.f32.mrb[8].mxu0 }
 0x130   : > { %v2253_v8 = vpop.f32.mrb[8].mxu1  ;;  %v2190_v11 = vpop.f32.mrb[9].mxu0 }
 0x131   : > { %v2191_v18 = vadd.f32 %v2190_v11, %v2189_v0  ;;  %v2254_v26 = vpop.f32.mrb[9].mxu1  ;;  %v2192_v24 = vpop.f32.mrb[10].mxu0 }
 0x132   : > { %v2255_v27 = vadd.f32 %v2254_v26, %v2253_v8  ;;  %v2256_v30 = vpop.f32.mrb[10].mxu1  ;;  %v2193_v34 = vpop.f32.mrb[11].mxu0 }
 0x133   : > { %v2194_v57 = vadd.f32 %v2193_v34, %v2192_v24  ;;  %v2257_v38 = vpop.f32.mrb[11].mxu1 }
 0x134   : > { %v3156_v14 = vadd.f32 %v2255_v27, %v2191_v18  ;;  %v2258_v19 = vadd.f32 %v2257_v38, %v2256_v30 }
 0x136   : > { %v3158_v48 = vadd.f32 %v2258_v19, %v2194_v57 }
 0x137   : > { %v2195_v49 = vpop.f32.mrb[12].mxu0 }
 0x138   : > { %v2259_v7 = vpop.f32.mrb[12].mxu1  ;;  %v2196_v35 = vpop.f32.mrb[13].mxu0 }
 0x139   : > { %v2197_v50 = vadd.f32 %v2196_v35, %v2195_v49  ;;  %v2260_v51 = vpop.f32.mrb[13].mxu1  ;;  %v2198_v12 = vpop.f32.mrb[14].mxu0 }
 0x13a   : > { %v2261_v36 = vadd.f32 %v2260_v51, %v2259_v7  ;;  %v2262_v41 = vpop.f32.mrb[14].mxu1  ;;  %v2199_v44 = vpop.f32.mrb[15].mxu0 }
 0x13b   : > { %v2200_v52 = vadd.f32 %v2199_v44, %v2198_v12  ;;  %v2263_v53 = vpop.f32.mrb[15].mxu1 }
 0x13c   : > { %v3160_v15 = vadd.f32 %v2261_v36, %v2197_v50  ;;  %v2264_v54 = vadd.f32 %v2263_v53, %v2262_v41 }
 0x13e   : > { %v3162_v55 = vadd.f32 %v2264_v54, %v2200_v52 }
 0x13f   : > { %v2201_v61 = vpop.f32.mrb[16].mxu0 }
 0x140   : > { %v2265_v62 = vpop.f32.mrb[16].mxu1  ;;  %v2202_v16 = vpop.f32.mrb[17].mxu0 }
 0x141   : > { %v2203_v1 = vadd.f32 %v2202_v16, %v2201_v61  ;;  %v2266_v2 = vpop.f32.mrb[17].mxu1  ;;  %v2204_v5 = vpop.f32.mrb[18].mxu0 }
 0x142   : > { %v2267_v6 = vadd.f32 %v2266_v2, %v2265_v62  ;;  %v2268_v22 = vpop.f32.mrb[18].mxu1  ;;  %v2205_v20 = vpop.f32.mrb[19].mxu0 }
 0x143   : > { %v2206_v21 = vadd.f32 %v2205_v20, %v2204_v5  ;;  %v2269_v23 = vpop.f32.mrb[19].mxu1 }
 0x144   : > { %v3164_v29 = vadd.f32 %v2267_v6, %v2203_v1  ;;  %v2270_v43 = vadd.f32 %v2269_v23, %v2268_v22 }
 0x146   : > { %v3166_v47 = vadd.f32 %v2270_v43, %v2206_v21 }
 0x147   : > { %v2207_v60 = vpop.f32.mrb[20].mxu0 }
 0x148   : > { %v2271_v63 = vpop.f32.mrb[20].mxu1  ;;  %v2208_v4 = vpop.f32.mrb[21].mxu0 }
 0x149   : > { %v2209_v10 = vadd.f32 %v2208_v4, %v2207_v60  ;;  %v2272_v13 = vpop.f32.mrb[21].mxu1  ;;  %v2210_v31 = vpop.f32.mrb[22].mxu0 }
 0x14a   : > { %v2273_v40 = vadd.f32 %v2272_v13, %v2271_v63  ;;  %v2274_v45 = vpop.f32.mrb[22].mxu1  ;;  %v2211_v3 = vpop.f32.mrb[23].mxu0 }
 0x14b   : > { %v2212_v25 = vadd.f32 %v2211_v3, %v2210_v31  ;;  %v2275_v28 = vpop.f32.mrb[23].mxu1 }
 0x14c   : > { %v3168_v33 = vadd.f32 %v2273_v40, %v2209_v10  ;;  %v2276_v9 = vadd.f32 %v2275_v28, %v2274_v45 }
 0x14e   : > { %v3170_v42 = vadd.f32 %v2276_v9, %v2212_v25 }
 0x14f   : > { %v2213_v46 = vpop.f32.mrb[24].mxu0 }
 0x150   : > { %v2277_v56 = vpop.f32.mrb[24].mxu1  ;;  %v2214_v39 = vpop.f32.mrb[25].mxu0 }
 0x151   : > { %v2215_v58 = vadd.f32 %v2214_v39, %v2213_v46  ;;  %v2278_v0 = vpop.f32.mrb[25].mxu1  ;;  %v2216_v8 = vpop.f32.mrb[26].mxu0 }
 0x152   : > { %v2279_v11 = vadd.f32 %v2278_v0, %v2277_v56  ;;  %v2280_v18 = vpop.f32.mrb[26].mxu1  ;;  %v2217_v26 = vpop.f32.mrb[27].mxu0 }
 0x153   : > { %v2218_v24 = vadd.f32 %v2217_v26, %v2216_v8  ;;  %v2281_v27 = vpop.f32.mrb[27].mxu1 }
 0x154   : > { %v3172_v30 = vadd.f32 %v2279_v11, %v2215_v58  ;;  %v2282_v34 = vadd.f32 %v2281_v27, %v2280_v18 }
 0x156   : > { %v3174_v57 = vadd.f32 %v2282_v34, %v2218_v24 }
 0x157   : > { %v2219_v38 = vpop.f32.mrb[28].mxu0 }
 0x158   : > { %v2283_v19 = vpop.f32.mrb[28].mxu1  ;;  %v2220_v49 = vpop.f32.mrb[29].mxu0 }
 0x159   : > { %v2221_v7 = vadd.f32 %v2220_v49, %v2219_v38  ;;  %v2284_v35 = vpop.f32.mrb[29].mxu1  ;;  %v2222_v50 = vpop.f32.mrb[30].mxu0 }
 0x15a   : > { %v2285_v51 = vadd.f32 %v2284_v35, %v2283_v19  ;;  %v2286_v12 = vpop.f32.mrb[30].mxu1  ;;  %v2223_v36 = vpop.f32.mrb[31].mxu0 }
 0x15b   : > { %v2224_v41 = vadd.f32 %v2223_v36, %v2222_v50  ;;  %v2287_v44 = vpop.f32.mrb[31].mxu1 }
 0x15c   : > { %v3176_v52 = vadd.f32 %v2285_v51, %v2221_v7  ;;  %v2288_v53 = vadd.f32 %v2287_v44, %v2286_v12 }
 0x15e   : > { %v3178_v54 = vadd.f32 %v2288_v53, %v2224_v41 }
 0x15f   : > { %v2305_v61 = vpop.f32.mrb[32].mxu0 }
 0x160   : > { %v2306_v62 = vpop.f32.mrb[33].mxu0  ;;  %v2369_v16 = vpop.f32.mrb[32].mxu1 }
 0x161   : > { %v2307_v1 = vadd.f32 %v2306_v62, %v2305_v61  ;;  %v2308_v2 = vpop.f32.mrb[34].mxu0  ;;  %v2370_v5 = vpop.f32.mrb[33].mxu1 }
 0x162   : > { %v2309_v6 = vpop.f32.mrb[35].mxu0  ;;  %v2371_v22 = vadd.f32 %v2370_v5, %v2369_v16  ;;  %v2372_v20 = vpop.f32.mrb[34].mxu1 }
 0x163   : > { %v1475_v21 = vadd.f32 %v2307_v1, %v3148_v17  ;;  %v2310_v23 = vadd.f32 %v2309_v6, %v2308_v2  ;;  %v2373_v43 = vpop.f32.mrb[35].mxu1 }
 0x164   : > { %v2374_v60 = vadd.f32 %v2373_v43, %v2372_v20 }
 0x165   : > { %v1478_v63 = vadd.f32 %v2310_v23, %v3150_v32  ;;  %v3182_v4 = vadd.f32 %v2371_v22, %v1475_v21 }
 0x167   : > { %v2311_v10 = vpop.f32.mrb[36].mxu0  ;;  %v3184_v13 = vadd.f32 %v2374_v60, %v1478_v63 }
 0x168   : > { %v2312_v31 = vpop.f32.mrb[37].mxu0  ;;  %v2375_v40 = vpop.f32.mrb[36].mxu1 }
 0x169   : > { %v2313_v45 = vadd.f32 %v2312_v31, %v2311_v10  ;;  %v2314_v3 = vpop.f32.mrb[38].mxu0  ;;  %v2376_v25 = vpop.f32.mrb[37].mxu1 }
 0x16a   : > { %v2315_v28 = vpop.f32.mrb[39].mxu0  ;;  %v2377_v9 = vadd.f32 %v2376_v25, %v2375_v40  ;;  %v2378_v46 = vpop.f32.mrb[38].mxu1 }
 0x16b   : > { %v1483_v17 = vadd.f32 %v2313_v45, %v3152_v37  ;;  %v2316_v56 = vadd.f32 %v2315_v28, %v2314_v3  ;;  %v2379_v39 = vpop.f32.mrb[39].mxu1 }
 0x16c   : > { %v2380_v58 = vadd.f32 %v2379_v39, %v2378_v46 }
 0x16d   : > { %v1486_v32 = vadd.f32 %v2316_v56, %v3154_v59  ;;  %v3188_v0 = vadd.f32 %v2377_v9, %v1483_v17 }
 0x16f   : > { %v2317_v8 = vpop.f32.mrb[40].mxu0  ;;  %v3190_v11 = vadd.f32 %v2380_v58, %v1486_v32 }
 0x170   : > { %v2318_v18 = vpop.f32.mrb[41].mxu0  ;;  %v2381_v26 = vpop.f32.mrb[40].mxu1 }
 0x171   : > { %v2319_v24 = vadd.f32 %v2318_v18, %v2317_v8  ;;  %v2320_v27 = vpop.f32.mrb[42].mxu0  ;;  %v2382_v34 = vpop.f32.mrb[41].mxu1 }
 0x172   : > { %v2321_v38 = vpop.f32.mrb[43].mxu0  ;;  %v2383_v19 = vadd.f32 %v2382_v34, %v2381_v26  ;;  %v2384_v49 = vpop.f32.mrb[42].mxu1 }
 0x173   : > { %v1491_v37 = vadd.f32 %v2319_v24, %v3156_v14  ;;  %v2322_v7 = vadd.f32 %v2321_v38, %v2320_v27  ;;  %v2385_v35 = vpop.f32.mrb[43].mxu1 }
 0x174   : > { %v2386_v50 = vadd.f32 %v2385_v35, %v2384_v49 }
 0x175   : > { %v1494_v59 = vadd.f32 %v2322_v7, %v3158_v48  ;;  %v3194_v51 = vadd.f32 %v2383_v19, %v1491_v37 }
 0x177   : > { %v2323_v12 = vpop.f32.mrb[44].mxu0  ;;  %v3196_v36 = vadd.f32 %v2386_v50, %v1494_v59 }
 0x178   : > { %v2324_v41 = vpop.f32.mrb[45].mxu0  ;;  %v2387_v44 = vpop.f32.mrb[44].mxu1 }
 0x179   : > { %v2325_v53 = vadd.f32 %v2324_v41, %v2323_v12  ;;  %v2326_v61 = vpop.f32.mrb[46].mxu0  ;;  %v2388_v62 = vpop.f32.mrb[45].mxu1 }
 0x17a   : > { %v2327_v16 = vpop.f32.mrb[47].mxu0  ;;  %v2389_v1 = vadd.f32 %v2388_v62, %v2387_v44  ;;  %v2390_v2 = vpop.f32.mrb[46].mxu1 }
 0x17b   : > { %v1499_v14 = vadd.f32 %v2325_v53, %v3160_v15  ;;  %v2328_v5 = vadd.f32 %v2327_v16, %v2326_v61  ;;  %v2391_v6 = vpop.f32.mrb[47].mxu1 }
 0x17c   : > { %v2392_v22 = vadd.f32 %v2391_v6, %v2390_v2 }
 0x17d   : > { %v1502_v48 = vadd.f32 %v2328_v5, %v3162_v55  ;;  %v3200_v20 = vadd.f32 %v2389_v1, %v1499_v14 }
 0x17f   : > { %v2329_v21 = vpop.f32.mrb[48].mxu0  ;;  %v3202_v23 = vadd.f32 %v2392_v22, %v1502_v48 }
 0x180   : > { %v2330_v43 = vpop.f32.mrb[49].mxu0  ;;  %v2393_v60 = vpop.f32.mrb[48].mxu1 }
 0x181   : > { %v2331_v63 = vadd.f32 %v2330_v43, %v2329_v21  ;;  %v2332_v10 = vpop.f32.mrb[50].mxu0  ;;  %v2394_v31 = vpop.f32.mrb[49].mxu1 }
 0x182   : > { %v2333_v40 = vpop.f32.mrb[51].mxu0  ;;  %v2395_v45 = vadd.f32 %v2394_v31, %v2393_v60  ;;  %v2396_v3 = vpop.f32.mrb[50].mxu1 }
 0x183   : > { %v1507_v15 = vadd.f32 %v2331_v63, %v3164_v29  ;;  %v2334_v25 = vadd.f32 %v2333_v40, %v2332_v10  ;;  %v2397_v28 = vpop.f32.mrb[51].mxu1 }
 0x184   : > { %v2398_v9 = vadd.f32 %v2397_v28, %v2396_v3 }
 0x185   : > { %v1510_v55 = vadd.f32 %v2334_v25, %v3166_v47  ;;  %v1604_v46 = vadd.f32 %v2395_v45, %v1507_v15 }
 0x187   : > { %v2335_v17 = vpop.f32.mrb[52].mxu0  ;;  %v3206_v56 = vadd.f32 %v2398_v9, %v1510_v55 }
 0x188   : > { %v2336_v39 = vpop.f32.mrb[53].mxu0  ;;  %v2399_v58 = vpop.f32.mrb[52].mxu1 }
 0x189   : > { %v2337_v32 = vadd.f32 %v2336_v39, %v2335_v17  ;;  %v2338_v8 = vpop.f32.mrb[54].mxu0  ;;  %v2400_v18 = vpop.f32.mrb[53].mxu1 }
 0x18a   : > { %v2339_v26 = vpop.f32.mrb[55].mxu0  ;;  %v2401_v24 = vadd.f32 %v2400_v18, %v2399_v58  ;;  %v2402_v27 = vpop.f32.mrb[54].mxu1 }
 0x18b   : > { %v1515_v34 = vadd.f32 %v2337_v32, %v3168_v33  ;;  %v2340_v29 = vadd.f32 %v2339_v26, %v2338_v8  ;;  %v2403_v38 = vpop.f32.mrb[55].mxu1 }
 0x18c   : > { %v2404_v19 = vadd.f32 %v2403_v38, %v2402_v27 }
 0x18d   : > { %v1518_v49 = vadd.f32 %v2340_v29, %v3170_v42  ;;  %v1612_v47 = vadd.f32 %v2401_v24, %v1515_v34 }
 0x18f   : > { %v2341_v37 = vpop.f32.mrb[56].mxu0  ;;  %v1615_v7 = vadd.f32 %v2404_v19, %v1518_v49 }
 0x190   : > { %v2342_v35 = vpop.f32.mrb[57].mxu0  ;;  %v2405_v50 = vpop.f32.mrb[56].mxu1 }
 0x191   : > { %v2343_v59 = vadd.f32 %v2342_v35, %v2341_v37  ;;  %v2344_v12 = vpop.f32.mrb[58].mxu0  ;;  %v2406_v41 = vpop.f32.mrb[57].mxu1 }
 0x192   : > { %v2345_v44 = vpop.f32.mrb[59].mxu0  ;;  %v2407_v53 = vadd.f32 %v2406_v41, %v2405_v50  ;;  %v2408_v61 = vpop.f32.mrb[58].mxu1 }
 0x193   : > { %v1523_v62 = vadd.f32 %v2343_v59, %v3172_v30  ;;  %v2346_v16 = vadd.f32 %v2345_v44, %v2344_v12  ;;  %v2409_v33 = vpop.f32.mrb[59].mxu1 }
 0x194   : > { %v2410_v1 = vadd.f32 %v2409_v33, %v2408_v61 }
 0x195   : > { %v1526_v2 = vadd.f32 %v2346_v16, %v3174_v57  ;;  %v1620_v14 = vadd.f32 %v2407_v53, %v1523_v62 }
 0x197   : > { %v2347_v42 = vpop.f32.mrb[60].mxu0  ;;  %v3212_v5 = vadd.f32 %v2410_v1, %v1526_v2 }
 0x198   : > { %v2348_v6 = vpop.f32.mrb[61].mxu0  ;;  %v2411_v22 = vpop.f32.mrb[60].mxu1 }
 0x199   : > { %v2349_v48 = vadd.f32 %v2348_v6, %v2347_v42  ;;  %v2350_v21 = vpop.f32.mrb[62].mxu0  ;;  %v2412_v43 = vpop.f32.mrb[61].mxu1 }
 0x19a   : > { %v2351_v60 = vpop.f32.mrb[63].mxu0  ;;  %v2413_v63 = vadd.f32 %v2412_v43, %v2411_v22  ;;  %v2414_v10 = vpop.f32.mrb[62].mxu1 }
 0x19b   : > { %v1531_v31 = vadd.f32 %v2349_v48, %v3176_v52  ;;  %v2352_v30 = vadd.f32 %v2351_v60, %v2350_v21  ;;  %v2415_v40 = vpop.f32.mrb[63].mxu1 }
 0x19c   : > { %v2416_v45 = vadd.f32 %v2415_v40, %v2414_v10 }
 0x19d   : > { %v1534_v57 = vadd.f32 %v2352_v30, %v3178_v54  ;;  %v1628_v3 = vadd.f32 %v2413_v63, %v1531_v31 }
 0x19f   : > { %v2451_v15 = vpop.f32.mrb[64].mxu0  ;;  %v1631_v25 = vadd.f32 %v2416_v45, %v1534_v57 }
 0x1a0   : > { %v1677_v28 = vadd.f32 %v2451_v15, %v3188_v0  ;;  %v2459_v9 = vpop.f32.mrb[64].mxu1  ;;  %v1668_v55 = vpop.f32.mrb[65].mxu0 }
 0x1a1   : > { %v3217_v17 = vadd.f32 %v2459_v9, %v1612_v47  ;;  %v1669_v39 = vadd.f32 %v1668_v55, %v3182_v4  ;;  %v1700_v58 = vpop.f32.mrb[65].mxu1  ;;  %v2452_v32 = vpop.f32.mrb[66].mxu0 }
 0x1a2   : > { %v3220_v52 = vadd.f32 %v1700_v58, %v1604_v46  ;;  %v1680_v8 = vadd.f32 %v2452_v32, %v3190_v11  ;;  %v2460_v18 = vpop.f32.mrb[66].mxu1  ;;  %v1671_v26 = vpop.f32.mrb[67].mxu0 }
 0x1a3   : > { %v3230_v54 = vadd.f32 %v2460_v18, %v1615_v7  ;;  %v1672_v4 = vadd.f32 %v1671_v26, %v3184_v13  ;;  %v1703_v0 = vpop.f32.mrb[67].mxu1  ;;  %v1832_v29 = vmul.f32 %v1669_v39, %v1669_v39  ;;  %v1834_v13 = vmul.f32 %v1677_v28, %v1677_v28 }
 0x1a4   : > { %v2115_v46 = vpack.c.bf16 %v1680_v8, %v1677_v28  ;;  %v1704_v11 = vadd.f32 %v1703_v0, %v3206_v56  ;;  %v1835_v53 = vmul.f32 %v1680_v8, %v1680_v8  ;;  %v1842_v55 = vmul.f32 %v3217_v17, %v3217_v17 }
 0x1a5   : > { %v2135_v24 = vpack.c.bf16 %v3230_v54, %v3217_v17  ;;  %v2110_v27 = vpack.c.bf16 %v1672_v4, %v1669_v39  ;;  %v1811_v34 = vadd.f32 %v1672_v4, %v1669_v39  ;;  %v1833_v38 = vmul.f32 %v1672_v4, %v1672_v4 }
 0x1a6   : > { %2154 = vst [vmem:[%s3228_s12 + $0x8] sm:$0xff] %v2115_v46   ;;  %v2130_v19 = vpack.c.bf16 %v1704_v11, %v3220_v52  ;;  %v1843_v32 = vmul.f32 %v3230_v54, %v3230_v54 }
 0x1a7   : > { %2158 = vst [vmem:[%s3228_s12 + $0x28] sm:$0xff] %v2135_v24   ;;  %2111 = vst [vmem:[%s3228_s12] sm:$0xff] %v2110_v27   ;;  %v1812_v49 = vadd.f32 %v1811_v34, %v1677_v28  ;;  %v2455_v47 = vpop.f32.mrb[68].mxu0  ;;  %v1848_v37 = vadd.f32 %v1833_v38, %v1832_v29 }
 0x1a8   : > { %2157 = vst [vmem:[%s3228_s12 + $0x20] sm:$0xff] %v2130_v19   ;;  %v1693_v7 = vadd.f32 %v2455_v47, %v3200_v20  ;;  %v2463_v56 = vpop.f32.mrb[68].mxu1  ;;  %v1684_v35 = vpop.f32.mrb[69].mxu0 }
 0x1a9   : > { %v1725_v50 = vadd.f32 %v2463_v56, %v1628_v3  ;;  %v1685_v59 = vadd.f32 %v1684_v35, %v3194_v51  ;;  %v1813_v12 = vadd.f32 %v1812_v49, %v1680_v8  ;;  %v1716_v41 = vpop.f32.mrb[69].mxu1  ;;  %v2456_v44 = vpop.f32.mrb[70].mxu0  ;;  %v1849_v61 = vadd.f32 %v1848_v37, %v1834_v13 }
 0x1aa   : > { %v1717_v62 = vadd.f32 %v1716_v41, %v1620_v14  ;;  %v1696_v16 = vadd.f32 %v2456_v44, %v3202_v23  ;;  %v2464_v33 = vpop.f32.mrb[70].mxu1  ;;  %v1687_v1 = vpop.f32.mrb[71].mxu0  ;;  %v1838_v31 = vmul.f32 %v1693_v7, %v1693_v7 }
 0x1ab   : > { %v1814_v2 = vadd.f32 %v1813_v12, %v1685_v59  ;;  %v1836_v42 = vmul.f32 %v1685_v59, %v1685_v59  ;;  %v1728_v20 = vadd.f32 %v2464_v33, %v1631_v25  ;;  %v1719_v6 = vpop.f32.mrb[71].mxu1  ;;  %v1850_v22 = vadd.f32 %v1849_v61, %v1835_v53 }
 0x1ac   : > { %v2125_v51 = vpack.c.bf16 %v1696_v16, %v1693_v7  ;;  %v1688_v21 = vadd.f32 %v1687_v1, %v3196_v36  ;;  %v1720_v43 = vadd.f32 %v1719_v6, %v3212_v5  ;;  %v1839_v45 = vmul.f32 %v1696_v16, %v1696_v16 }
 0x1ad   : > { %v2145_v48 = vpack.c.bf16 %v1728_v20, %v1725_v50  ;;  %v1851_v60 = vadd.f32 %v1850_v22, %v1836_v42  ;;  %v1840_v36 = vmul.f32 %v3220_v52, %v3220_v52  ;;  %v1841_v25 = vmul.f32 %v1704_v11, %v1704_v11 }
 0x1ae   : > { %2156 = vst [vmem:[%s3228_s12 + $0x18] sm:$0xff] %v2125_v51   ;;  %v2120_v14 = vpack.c.bf16 %v1688_v21, %v1685_v59  ;;  %v1815_v23 = vadd.f32 %v1814_v2, %v1688_v21  ;;  %v1837_v63 = vmul.f32 %v1688_v21, %v1688_v21  ;;  %v2140_v10 = vpack.c.bf16 %v1720_v43, %v1717_v62 }
 0x1af   : > { %2160 = vst [vmem:[%s3228_s12 + $0x38] sm:$0xff] %v2145_v48   ;;  %v1844_v26 = vmul.f32 %v1717_v62, %v1717_v62  ;;  %v1845_v46 = vmul.f32 %v1720_v43, %v1720_v43  ;;  %v1846_v24 = vmul.f32 %v1725_v50, %v1725_v50  ;;  %v1847_v29 = vmul.f32 %v1728_v20, %v1728_v20 }
 0x1b0   : > { %2155 = vst [vmem:[%s3228_s12 + $0x10] sm:$0xff] %v2120_v14   ;;  %v1816_v30 = vadd.f32 %v1815_v23, %v1693_v7  ;;  %v1852_v40 = vadd.f32 %v1851_v60, %v1837_v63  ;;  %2159 = vst [vmem:[%s3228_s12 + $0x30] sm:$0xff] %v2140_v10  }
 0x1b2   : > { %v1817_v57 = vadd.f32 %v1816_v30, %v1696_v16  ;;  %v1853_v3 = vadd.f32 %v1852_v40, %v1838_v31 }
 0x1b4   : > { %v1818_v5 = vadd.f32 %v1817_v57, %v3220_v52  ;;  %v1854_v15 = vadd.f32 %v1853_v3, %v1839_v45 }
 0x1b6   : > { %v1855_v28 = vadd.f32 %v1854_v15, %v1840_v36  ;;  %v1819_v9 = vadd.f32 %v1818_v5, %v1704_v11 }
 0x1b8   : > { %v1820_v39 = vadd.f32 %v1819_v9, %v3217_v17  ;;  %v1856_v58 = vadd.f32 %v1855_v28, %v1841_v25 }
 0x1ba   : > { %v1821_v8 = vadd.f32 %v1820_v39, %v3230_v54  ;;  %v1857_v18 = vadd.f32 %v1856_v58, %v1842_v55 }
 0x1bc   : > { %v1822_v4 = vadd.f32 %v1821_v8, %v1717_v62  ;;  %v1858_v52 = vadd.f32 %v1857_v18, %v1843_v32 }
 0x1be   : > { %v1823_v0 = vadd.f32 %v1822_v4, %v1720_v43  ;;  %v1859_v11 = vadd.f32 %v1858_v52, %v1844_v26 }
 0x1c0   : > { %v1824_v27 = vadd.f32 %v1823_v0, %v1725_v50  ;;  %v1860_v34 = vadd.f32 %v1859_v11, %v1845_v46 }
 0x1c2   : > { %v1825_v17 = vadd.f32 %v1824_v27, %v1728_v20  ;;  %v1861_v38 = vadd.f32 %v1860_v34, %v1846_v24 }
 0x1c4   : > { %v1826_v19 = vrot.slane %v1825_v17, 4  ;;  %v1862_v49 = vadd.f32 %v1861_v38, %v1847_v29 }
 0x1c6   : > { %v1827_v47 = vadd.f32 %v1826_v19, %v1825_v17  ;;  %v1863_v54 = vrot.slane %v1862_v49, 4 }
 0x1c8   : > { %v1828_v13 = vrot.slane %v1827_v47, 2  ;;  %v1864_v37 = vadd.f32 %v1863_v54, %v1862_v49 }
 0x1ca   : > { %v1829_v7 = vadd.f32 %v1828_v13, %v1827_v47  ;;  %v1865_v56 = vrot.slane %v1864_v37, 2 }
 0x1cc   : > { %v1830_v35 = vrot.slane %v1829_v7, 1  ;;  %v1866_v59 = vadd.f32 %v1865_v56, %v1864_v37 }
 0x1ce   : > { %v1867_v12 = vrot.slane %v1866_v59, 1  ;;  %v1831_v50 = vadd.f32 %v1830_v35, %v1829_v7 }
 0x1d0   : > { %v1868_v41 = vadd.f32 %v1867_v12, %v1866_v59 }
 0x1d2   : > { %v1870_v44 = vsel %vm1869_vm1, %v1831_v50, %v1868_v41 }
 0x1d3   : > { %1871 = vst [vmem:[%s265_s14] sm:$0x3] %v1870_v44 }
 0x1d4 PF: > { %s17_s21 = sadd.s32 1, %s2572_s21  }
 0x1d5   : > { %p14_p5 = scmp.ge.s32.totalorder %s17_s21, 4  }
 0x1d7   :  { %16 = sbr.rel (!%p14_p5) target bundleno = 1 (0x1), region = 84 }

// kernel: basic_block_forward.3
= control target key start
LH: loop header
LB: loop body
LE: loop exit
PB: predicated region body
PF: predicated region fallthrough
CT: control target
= control target key end

     0   :  { %s3312_s13 = smov 0   ;;  %s4029_s0 = inlined_call_operand.vmem [shape: f32[4,9,9,128], index: 0, kind: input, shape index: {}]   ;;  %s4030_s1 = inlined_call_operand.vmem [shape: f32[4,9,9,128], index: 1, kind: input, shape index: {}]   ;;  %s4031_s2 = inlined_call_operand.vmem [shape: f32[4,9,9,128], index: 2, kind: input, shape index: {}]   ;;  %s4032_s3 = inlined_call_operand.vmem [shape: f32[4,9,9,128], index: 3, kind: input, shape index: {}]   ;;  %s4033_s4 = inlined_call_operand.vmem [shape: bf16[1152,128], index: 4, kind: input, shape index: {}]   ;;  %s4034_s5 = inlined_call_operand.vmem [shape: bf16[256,128], index: 5, kind: input, shape index: {}]   ;;  %s4035_s6 = inlined_call_operand.vmem [shape: bf16[128,128], index: 6, kind: input, shape index: {}]   ;;  %s4036_s7 = inlined_call_operand.vmem [shape: bf16[256,128], index: 7, kind: output, shape index: {0}]   ;;  %s4037_s8 = inlined_call_operand.vmem [shape: f32[2,2,128], index: 8, kind: output, shape index: {1}]   ;;  %s4038_s9 = inlined_call_operand.vmem [shape: bf16[256,128], index: 9, kind: output, shape index: {2}]   ;;  %s4039_s10 = inlined_call_operand.vmem [shape: f32[2,2,128], index: 10, kind: output, shape index: {3}]  }
   0x1 LB: > { %s3318_s14 = sadd.s32 4294967295, %s3255_s13   ;;  %p2487_p0 = scmp.ge.s32.totalorder %s3255_s13, 1  ;;  %s3255_s13 = sphi %s3312_s13, %s21_s13  }
   0x2   : > { %p368_p1 = scmp.lt.s32.totalorder %s3255_s13, 3 }
   0x4   : > { %p369_p2 = pnand %p2487_p0, %p368_p1 }
   0x5   : > { %v3161_v0 = vld [vmem:[%s4033_s4 + $0x40] sm:$0xff] (!%p369_p2)   ;;  %v3165_v4 = vld [vmem:[%s4033_s4 + $0x48] sm:$0xff] (!%p369_p2)   ;;  %v3169_v8 = vld [vmem:[%s4033_s4 + $0x50] sm:$0xff] (!%p369_p2)   ;;  %s2488_s27 = sshll.u32 (!%p369_p2), %s3318_s14, 1  ;;  %p483_p5 = scmp.lt.s32.totalorder (!%p369_p2), %s3318_s14, 1  ;;  %vm1915_vm0 = vcmask (!%p369_p2), 1040384  }
   0x6   : > { %372 = sbr.rel (%p369_p2) target bundleno = 431 (0x1af), region = 48  ;;  %v3162_v1 = vld [vmem:[%s4033_s4 + $0xc0] sm:$0xff] (!%p369_p2)   ;;  %2800 = vmatprep.subr.bf16.mxu0 (!%p369_p2), %v3161_v0  ;;  %v3166_v5 = vld [vmem:[%s4033_s4 + $0xc8] sm:$0xff] (!%p369_p2)   ;;  %v3170_v9 = vld [vmem:[%s4033_s4 + $0xd0] sm:$0xff] (!%p369_p2)   ;;  %p444_p3 = scmp.lt.s32.totalorder (!%p369_p2), %s2488_s27, 3 }
   0x7   : > { %v3163_v2 = vld [vmem:[%s4033_s4] sm:$0xff] (!%p369_p2)   ;;  %2864 = vmatprep.subr.bf16.mxu1 (!%p369_p2), %v3162_v1  ;;  %v3167_v6 = vld [vmem:[%s4033_s4 + $0x8] sm:$0xff] (!%p369_p2)   ;;  %v3171_v10 = vld [vmem:[%s4033_s4 + $0x10] sm:$0xff] (!%p369_p2)  }
   0x8   : > { %v3164_v3 = vld [vmem:[%s4033_s4 + $0x80] sm:$0xff] (!%p369_p2)   ;;  %2801 = vmatpush3.bf16.msra.mxu0 (!%p369_p2), %v3163_v2  ;;  %v3168_v7 = vld [vmem:[%s4033_s4 + $0x88] sm:$0xff] (!%p369_p2)   ;;  %v3172_v11 = vld [vmem:[%s4033_s4 + $0x90] sm:$0xff] (!%p369_p2)  }
   0x9   : > { %2865 = vmatpush3.bf16.msra.mxu1 (!%p369_p2), %v3164_v3  ;;  %2802 = vmatprep.subr.bf16.mxu0 (!%p369_p2), %v3165_v4  ;;  %v3173_v12 = vld [vmem:[%s4033_s4 + $0x58] sm:$0xff] (!%p369_p2)   ;;  %v3177_v16 = vld [vmem:[%s4033_s4 + $0x60] sm:$0xff] (!%p369_p2)   ;;  %v3181_v20 = vld [vmem:[%s4033_s4 + $0x68] sm:$0xff] (!%p369_p2)  }
   0xa   : > { %2866 = vmatprep.subr.bf16.mxu1 (!%p369_p2), %v3166_v5  ;;  %v3174_v13 = vld [vmem:[%s4033_s4 + $0xd8] sm:$0xff] (!%p369_p2)   ;;  %v3178_v17 = vld [vmem:[%s4033_s4 + $0xe0] sm:$0xff] (!%p369_p2)   ;;  %v3182_v21 = vld [vmem:[%s4033_s4 + $0xe8] sm:$0xff] (!%p369_p2)  }
   0xb   : > { %v3175_v14 = vld [vmem:[%s4033_s4 + $0x18] sm:$0xff] (!%p369_p2)   ;;  %v3179_v18 = vld [vmem:[%s4033_s4 + $0x20] sm:$0xff] (!%p369_p2)   ;;  %v3183_v22 = vld [vmem:[%s4033_s4 + $0x28] sm:$0xff] (!%p369_p2)  }
   0xc   : > { %2803 = vmatpush3.bf16.msra.mxu0 (!%p369_p2), %v3167_v6  ;;  %v3176_v15 = vld [vmem:[%s4033_s4 + $0x98] sm:$0xff] (!%p369_p2)   ;;  %v3180_v19 = vld [vmem:[%s4033_s4 + $0xa0] sm:$0xff] (!%p369_p2)   ;;  %v3184_v23 = vld [vmem:[%s4033_s4 + $0xa8] sm:$0xff] (!%p369_p2)  }
   0xd   : > { %2867 = vmatpush3.bf16.msra.mxu1 %v3168_v7  ;;  %2804 = vmatprep.subr.bf16.mxu0 %v3169_v8  ;;  %s4041_s27 = smov (!%p444_p3, %s2488_s27), 3  ;;  %v3185_v24 = vld [vmem:[%s4033_s4 + $0x70] sm:$0xff]   ;;  %v3189_v28 = vld [vmem:[%s4033_s4 + $0x78] sm:$0xff]   ;;  %v3193_v44 = vld [vmem:[%s4033_s4 + $0x140] sm:$0xff]  }
   0xe   : > { %2868 = vmatprep.subr.bf16.mxu1 %v3170_v9  ;;  %v3186_v25 = vld [vmem:[%s4033_s4 + $0xf0] sm:$0xff]   ;;  %s3401_s15 = smul.u32 144, %s4041_s27  ;;  %v3190_v29 = vld [vmem:[%s4033_s4 + $0xf8] sm:$0xff]   ;;  %v3194_v45 = vld [vmem:[%s4033_s4 + $0x100] sm:$0xff]  }
   0xf   : > { %v3187_v26 = vld [vmem:[%s4033_s4 + $0x30] sm:$0xff]   ;;  %v3191_v30 = vld [vmem:[%s4033_s4 + $0x38] sm:$0xff]   ;;  %v3195_v46 = vld [vmem:[%s4033_s4 + $0x1c0] sm:$0xff]  }
  0x10   : > { %2805 = vmatpush3.bf16.msra.mxu0 %v3171_v10  ;;  %v3188_v27 = vld [vmem:[%s4033_s4 + $0xb0] sm:$0xff]   ;;  %s3419_s25 = scalar_lea.vmem %s4030_s1, %s3401_s15  ;;  %s3425_s29 = scalar_lea.vmem %s4031_s2, %s3401_s15  ;;  %v3192_v31 = vld [vmem:[%s4033_s4 + $0xb8] sm:$0xff]   ;;  %v3196_v47 = vld [vmem:[%s4033_s4 + $0x180] sm:$0xff]  }
  0x11   : > { %2869 = vmatpush3.bf16.msra.mxu1 %v3172_v11  ;;  %2806 = vmatprep.subr.bf16.mxu0 %v3173_v12  ;;  %s3434_s17 = scalar_lea.vmem %s4029_s0, %s3401_s15  ;;  %v522_v32 = vld [vmem:[%s3419_s25] sm:$0xff]  ;;  %v3441_v33 = vld [vmem:[%s3419_s25 + $0x10] sm:$0xff]  ;;  %v3197_v61 = vld [vmem:[%s4033_s4 + $0x148] sm:$0xff]   ;;  %s3749_s20 = scalar_lea.vmem %s4032_s3, %s3401_s15 }
  0x12   : > { %2870 = vmatprep.subr.bf16.mxu1 %v3174_v13  ;;  %v570_v34 = vld [vmem:[%s3425_s29] sm:$0xff]  ;;  %v538_v35 = vpack.c.bf16 %v3441_v33, %v522_v32  ;;  %v571_v36 = vld [vmem:[%s3425_s29 + $0x10] sm:$0xff]  ;;  %v3198_v62 = vld [vmem:[%s4033_s4 + $0x108] sm:$0xff]   ;;  %s2496_s15 = sshll.u32 %s3318_s14, 4  ;;  %s4045_s14 = smov (!%p483_p5, %s3318_s14), 1 }
  0x13   : > { %v498_v37 = vld [vmem:[%s3434_s17] sm:$0xff]  ;;  %v3448_v38 = vld [vmem:[%s3434_s17 + $0x10] sm:$0xff]  ;;  %v586_v39 = vpack.c.bf16 %v571_v36, %v570_v34  ;;  %v3199_v63 = vld [vmem:[%s4033_s4 + $0x1c8] sm:$0xff]   ;;  %p472_p4 = scmp.lt.s32.totalorder %s2496_s15, 31 }
  0x14   : > { %2807 = vmatpush3.bf16.msra.mxu0 %v3175_v14  ;;  %v514_v40 = vpack.c.bf16 %v3448_v38, %v498_v37  ;;  %v546_v41 = vld [vmem:[%s3434_s17 + $0x1] sm:$0xff]  ;;  %v3453_v42 = vld [vmem:[%s3434_s17 + $0x11] sm:$0xff]  ;;  %1324 = vmatprep.mubr.bf16.mxu0 %v538_v35 }
  0x15   : > { %2871 = vmatpush3.bf16.msra.mxu1 %v3176_v15  ;;  %2808 = vmatprep.subr.bf16.mxu0 %v3177_v16  ;;  %v562_v43 = vpack.c.bf16 %v3453_v42, %v546_v41  ;;  %v3469_v48 = vld [vmem:[%s3419_s25 + $0x20] sm:$0xff]  ;;  %v3472_v49 = vld [vmem:[%s3419_s25 + $0x30] sm:$0xff]  ;;  %v3200_v0 = vld [vmem:[%s4033_s4 + $0x188] sm:$0xff]   ;;  %s4043_s15 = smov (!%p472_p4, %s2496_s15), 31 }
  0x16   : > { %2872 = vmatprep.subr.bf16.mxu1 %v3178_v17  ;;  %1421 = vmatprep.mubr.bf16.mxu1 %v586_v39  ;;  %v572_v50 = vld [vmem:[%s3425_s29 + $0x20] sm:$0xff]  ;;  %v573_v51 = vld [vmem:[%s3425_s29 + $0x30] sm:$0xff]  ;;  %v539_v52 = vpack.c.bf16 %v3472_v49, %v3469_v48  ;;  %v3207_v34 = vld [vmem:[%s4033_s4 + $0x1d8] sm:$0xff]   ;;  %s3790_s19 = sshll.u32 %s4043_s15, 2 }
  0x17   : > { %v587_v53 = vpack.c.bf16 %v573_v51, %v572_v50  ;;  %v3479_v54 = vld [vmem:[%s3434_s17 + $0x20] sm:$0xff]  ;;  %v3482_v55 = vld [vmem:[%s3434_s17 + $0x30] sm:$0xff]  ;;  %v3208_v35 = vld [vmem:[%s4033_s4 + $0x198] sm:$0xff]   ;;  %s3805_s26 = scalar_lea.vmem %s4034_s5, %s3790_s19  ;;  %s3987_s28 = scalar_lea.vmem %s4036_s7, %s3790_s19 }
  0x18   : > { %2809 = vmatpush3.bf16.msra.mxu0 %v3179_v18  ;;  %v3485_v56 = vld [vmem:[%s3434_s17 + $0x21] sm:$0xff]  ;;  %v515_v57 = vpack.c.bf16 %v3482_v55, %v3479_v54  ;;  %v3490_v58 = vld [vmem:[%s3434_s17 + $0x31] sm:$0xff] }
  0x19   : > { %2873 = vmatpush3.bf16.msra.mxu1 %v3180_v19  ;;  %2810 = vmatprep.subr.bf16.mxu0 %v3181_v20  ;;  %v708_v59 = vpack.c.bf16 %v3485_v56, %v3453_v42  ;;  %v563_v60 = vpack.c.bf16 %v3490_v58, %v3485_v56  ;;  %v3509_v1 = vld [vmem:[%s3419_s25 + $0x40] sm:$0xff]  ;;  %v3512_v2 = vld [vmem:[%s3419_s25 + $0x50] sm:$0xff]  ;;  %v3244_v56 = vld [vmem:[%s3805_s26 + $0x18] sm:$0xff]  }
  0x1a   : > { %2874 = vmatprep.subr.bf16.mxu1 %v3182_v21  ;;  %v540_v3 = vpack.c.bf16 %v3512_v2, %v3509_v1  ;;  %v574_v4 = vld [vmem:[%s3425_s29 + $0x40] sm:$0xff]  ;;  %v575_v5 = vld [vmem:[%s3425_s29 + $0x50] sm:$0xff] }
  0x1b   : > { %v3519_v6 = vld [vmem:[%s3434_s17 + $0x40] sm:$0xff]  ;;  %v588_v7 = vpack.c.bf16 %v575_v5, %v574_v4  ;;  %v3522_v8 = vld [vmem:[%s3434_s17 + $0x50] sm:$0xff] }
  0x1c   : > { %2811 = vmatpush3.bf16.msra.mxu0 %v3183_v22  ;;  %v3525_v9 = vld [vmem:[%s3434_s17 + $0x41] sm:$0xff]  ;;  %v3528_v10 = vld [vmem:[%s3434_s17 + $0x51] sm:$0xff]  ;;  %v516_v11 = vpack.c.bf16 %v3522_v8, %v3519_v6 }
  0x1d   : > { %2875 = vmatpush3.bf16.msra.mxu1 %v3184_v23  ;;  %2812 = vmatprep.subr.bf16.mxu0 %v3185_v24  ;;  %v3201_v12 = vld [vmem:[%s4033_s4 + $0x150] sm:$0xff]   ;;  %v709_v13 = vpack.c.bf16 %v3525_v9, %v3490_v58  ;;  %v564_v14 = vpack.c.bf16 %v3528_v10, %v3525_v9  ;;  %v3549_v18 = vld [vmem:[%s3419_s25 + $0x60] sm:$0xff]  ;;  %v3246_v58 = vld [vmem:[%s3805_s26 + $0x28] sm:$0xff]  }
  0x1e   : > { %2876 = vmatprep.subr.bf16.mxu1 %v3186_v25  ;;  %v3202_v15 = vld [vmem:[%s4033_s4 + $0x110] sm:$0xff]   ;;  %v576_v20 = vld [vmem:[%s3425_s29 + $0x60] sm:$0xff] }
  0x1f   : > { %v3203_v16 = vld [vmem:[%s4033_s4 + $0x1d0] sm:$0xff]   ;;  %v3559_v23 = vld [vmem:[%s3434_s17 + $0x60] sm:$0xff] }
  0x20   : > { %2813 = vmatpush3.bf16.msra.mxu0 %v3187_v26  ;;  %v3204_v17 = vld [vmem:[%s4033_s4 + $0x190] sm:$0xff]   ;;  %v3565_v26 = vld [vmem:[%s3434_s17 + $0x61] sm:$0xff] }
  0x21   : > { %2877 = vmatpush3.bf16.msra.mxu1 %v3188_v27  ;;  %2814 = vmatprep.subr.bf16.mxu0 %v3189_v28  ;;  %v3552_v19 = vld [vmem:[%s3419_s25 + $0x70] sm:$0xff]  ;;  %v3205_v28 = vld [vmem:[%s4033_s4 + $0x158] sm:$0xff]   ;;  %v3590_v37 = vld [vmem:[%s3419_s25 + $0xa0] sm:$0xff] }
  0x22   : > { %2878 = vmatprep.subr.bf16.mxu1 %v3190_v29  ;;  %v541_v21 = vpack.c.bf16 %v3552_v19, %v3549_v18  ;;  %v577_v22 = vld [vmem:[%s3425_s29 + $0x70] sm:$0xff]  ;;  %v710_v29 = vpack.c.bf16 %v3565_v26, %v3528_v10  ;;  %v3209_v50 = vld [vmem:[%s4033_s4 + $0x160] sm:$0xff]  }
  0x23   : > { %v3562_v24 = vld [vmem:[%s3434_s17 + $0x70] sm:$0xff]  ;;  %v589_v25 = vpack.c.bf16 %v577_v22, %v576_v20  ;;  %v3210_v51 = vld [vmem:[%s4033_s4 + $0x120] sm:$0xff]   ;;  %v3216_v20 = vld [vmem:[%s4033_s4 + $0x1a8] sm:$0xff]  }
  0x24   : > { %2815 = vmatpush3.bf16.msra.mxu0 %v3191_v30  ;;  %v3568_v27 = vld [vmem:[%s3434_s17 + $0x71] sm:$0xff]  ;;  %v517_v30 = vpack.c.bf16 %v3562_v24, %v3559_v23 }
  0x25   : > { %2879 = vmatpush3.bf16.msra.mxu1 %v3192_v31  ;;  %2928 = vmatprep.subr.bf16.mxu0 %v3193_v44  ;;  %v3206_v31 = vld [vmem:[%s4033_s4 + $0x118] sm:$0xff]   ;;  %v565_v32 = vpack.c.bf16 %v3568_v27, %v3565_v26  ;;  %v530_v36 = vld [vmem:[%s3419_s25 + $0x90] sm:$0xff] }
  0x26   : > { %2992 = vmatprep.subr.bf16.mxu1 %v3195_v46  ;;  %v578_v39 = vld [vmem:[%s3425_s29 + $0x90] sm:$0xff]  ;;  %v542_v41 = vpack.c.bf16 %v3590_v37, %v530_v36  ;;  %v3248_v26 = vld [vmem:[%s3805_s26 + $0x38] sm:$0xff]  }
  0x27   : > { %1325 = vmatmul.mubr.bf16.vlgmr.msra.gmra.mrb[0].mxu0 %v514_v40  ;;  %v579_v40 = vld [vmem:[%s3425_s29 + $0xa0] sm:$0xff]  ;;  %v506_v44 = vld [vmem:[%s3434_s17 + $0x90] sm:$0xff] }
  0x28   : > { %1422 = vmatmul.mubr.bf16.vlgmr.msra.gmra.mrb[0].mxu1 %v562_v43  ;;  %2929 = vmatpush3.bf16.msra.mxu0 %v3194_v45  ;;  %v590_v43 = vpack.c.bf16 %v579_v40, %v578_v39  ;;  %v3597_v45 = vld [vmem:[%s3434_s17 + $0xa0] sm:$0xff]  ;;  %v554_v46 = vld [vmem:[%s3434_s17 + $0x91] sm:$0xff] }
  0x29   : > { %2993 = vmatpush3.bf16.msra.mxu1 %v3196_v47  ;;  %1332 = vmatprep.mubr.bf16.mxu0 %v539_v52  ;;  %v3601_v47 = vld [vmem:[%s3434_s17 + $0xa1] sm:$0xff]  ;;  %v518_v52 = vpack.c.bf16 %v3597_v45, %v506_v44  ;;  %v3628_v5 = vld [vmem:[%s3434_s17 + $0xb0] sm:$0xff] }
  0x2a   : > { %1429 = vmatprep.mubr.bf16.mxu1 %v587_v53  ;;  %2930 = vmatprep.subr.bf16.mxu0 %v3197_v61  ;;  %v3211_v53 = vld [vmem:[%s4033_s4 + $0x1e0] sm:$0xff]   ;;  %v3618_v61 = vld [vmem:[%s3419_s25 + $0xb0] sm:$0xff] }
  0x2b   : > { %2994 = vmatprep.subr.bf16.mxu1 %v3199_v63  ;;  %v3656_v22 = vld [vmem:[%s3419_s25 + $0xd0] sm:$0xff]  ;;  %v3674_v39 = vld [vmem:[%s3434_s17 + $0xe0] sm:$0xff] }
  0x2c   : > { %2931 = vmatpush3.bf16.msra.mxu0 %v3198_v62  ;;  %v3621_v62 = vld [vmem:[%s3419_s25 + $0xc0] sm:$0xff]  ;;  %v3671_v36 = vld [vmem:[%s3434_s17 + $0xd0] sm:$0xff] }
  0x2d   : > { %2995 = vmatpush3.bf16.msra.mxu1 %v3200_v0  ;;  %2932 = vmatprep.subr.bf16.mxu0 %v3201_v12  ;;  %v543_v63 = vpack.c.bf16 %v3621_v62, %v3618_v61  ;;  %v580_v0 = vld [vmem:[%s3425_s29 + $0xb0] sm:$0xff]  ;;  %v3637_v12 = vld [vmem:[%s3434_s17 + $0xc1] sm:$0xff] }
  0x2e   : > { %2996 = vmatprep.subr.bf16.mxu1 %v3203_v16  ;;  %v3214_v16 = vld [vmem:[%s4033_s4 + $0x128] sm:$0xff]   ;;  %v3217_v40 = vld [vmem:[%s4033_s4 + $0x170] sm:$0xff]  }
  0x2f   : > { %1333 = vmatmul.mubr.bf16.gmra.mrb[4].mxu0 %v515_v57  ;;  %v566_v57 = vpack.c.bf16 %v3601_v47, %v554_v46  ;;  %v3218_v44 = vld [vmem:[%s4033_s4 + $0x130] sm:$0xff]  }
  0x30   : > { %1430 = vmatmul.mubr.bf16.gmra.mrb[4].mxu1 %v563_v60  ;;  %1340 = vmatprep.mubr.bf16.mxu0 %v540_v3  ;;  %v3212_v60 = vld [vmem:[%s4033_s4 + $0x1a0] sm:$0xff]   ;;  %v3219_v46 = vld [vmem:[%s4033_s4 + $0x1f0] sm:$0xff]  }
  0x31   : > { %1437 = vmatprep.mubr.bf16.mxu1 %v588_v7  ;;  %2933 = vmatpush3.bf16.msra.mxu0 %v3202_v15  ;;  %v581_v3 = vld [vmem:[%s3425_s29 + $0xc0] sm:$0xff]  ;;  %v3247_v9 = vld [vmem:[%s3805_s26 + $0x30] sm:$0xff]  }
  0x32   : > { %2997 = vmatpush3.bf16.msra.mxu1 %v3204_v17  ;;  %2934 = vmatprep.subr.bf16.mxu0 %v3205_v28  ;;  %v591_v4 = vpack.c.bf16 %v581_v3, %v580_v0  ;;  %v3631_v7 = vld [vmem:[%s3434_s17 + $0xc0] sm:$0xff]  ;;  %v3215_v17 = vld [vmem:[%s4033_s4 + $0x1e8] sm:$0xff]   ;;  %v582_v28 = vld [vmem:[%s3425_s29 + $0xd0] sm:$0xff] }
  0x33   : > { %2998 = vmatprep.subr.bf16.mxu1 %v3207_v34  ;;  %v2551_v10 = vld [vmem:[%s3434_s17 + $0x111] sm:$0xff] }
  0x35   : > { %2935 = vmatpush3.bf16.msra.mxu0 %v3206_v31 }
  0x36   : > { %2999 = vmatpush3.bf16.msra.mxu1 %v3208_v35  ;;  %2936 = vmatprep.subr.bf16.mxu0 %v3209_v50  ;;  %v3668_v35 = vld [vmem:[%s3434_s17 + $0xd1] sm:$0xff] }
  0x37   : > { %1341 = vmatmul.mubr.bf16.gmra.mrb[8].mxu0 %v516_v11  ;;  %3000 = vmatprep.subr.bf16.mxu1 %v3211_v53  ;;  %v3634_v11 = vld [vmem:[%s3434_s17 + $0xb1] sm:$0xff] }
  0x38   : > { %1438 = vmatmul.mubr.bf16.gmra.mrb[8].mxu1 %v564_v14  ;;  %1348 = vmatprep.mubr.bf16.mxu0 %v541_v21  ;;  %v3213_v14 = vld [vmem:[%s4033_s4 + $0x168] sm:$0xff]   ;;  %v712_v15 = vpack.c.bf16 %v3634_v11, %v3601_v47  ;;  %v519_v21 = vpack.c.bf16 %v3631_v7, %v3628_v5  ;;  %v3220_v50 = vld [vmem:[%s4033_s4 + $0x1b0] sm:$0xff]  }
  0x39   : > { %1445 = vmatprep.mubr.bf16.mxu1 %v589_v25  ;;  %2937 = vmatpush3.bf16.msra.mxu0 %v3210_v51  ;;  %v3659_v25 = vld [vmem:[%s3419_s25 + $0xe0] sm:$0xff]  ;;  %v3694_v51 = vld [vmem:[%s3419_s25 + $0xf0] sm:$0xff] }
  0x3a   : > { %3001 = vmatpush3.bf16.msra.mxu1 %v3212_v60  ;;  %2938 = vmatprep.subr.bf16.mxu0 %v3213_v14  ;;  %v544_v31 = vpack.c.bf16 %v3659_v25, %v3656_v22  ;;  %v584_v53 = vld [vmem:[%s3425_s29 + $0xf0] sm:$0xff]  ;;  %v520_v60 = vpack.c.bf16 %v3674_v39, %v3671_v36 }
  0x3b   : > { %3002 = vmatprep.subr.bf16.mxu1 %v3215_v17  ;;  %v3716_v17 = vld [vmem:[%s3434_s17 + $0xf0] sm:$0xff] }
  0x3d   : > { %2939 = vmatpush3.bf16.msra.mxu0 %v3214_v16  ;;  %v3221_v16 = vld [vmem:[%s4033_s4 + $0x178] sm:$0xff]  }
  0x3e   : > { %3003 = vmatpush3.bf16.msra.mxu1 %v3216_v20  ;;  %2940 = vmatprep.subr.bf16.mxu0 %v3217_v40  ;;  %v3222_v20 = vld [vmem:[%s4033_s4 + $0x138] sm:$0xff]   ;;  %v3225_v40 = vld [vmem:[%s4033_s4 + $0x200] sm:$0xff]  }
  0x3f   : > { %1349 = vmatmul.mubr.bf16.gmra.mrb[12].mxu0 %v517_v30  ;;  %v567_v30 = vpack.c.bf16 %v3637_v12, %v3634_v11  ;;  %3004 = vmatprep.subr.bf16.mxu1 %v3219_v46  ;;  %v3226_v46 = vld [vmem:[%s4035_s6] sm:$0xff]  }
  0x40   : > { %1446 = vmatmul.mubr.bf16.gmra.mrb[12].mxu1 %v565_v32  ;;  %1356 = vmatprep.mubr.bf16.mxu0 %v542_v41  ;;  %v583_v32 = vld [vmem:[%s3425_s29 + $0xe0] sm:$0xff]  ;;  %v713_v41 = vpack.c.bf16 %v3668_v35, %v3637_v12 }
  0x41   : > { %1453 = vmatprep.mubr.bf16.mxu1 %v590_v43  ;;  %v592_v34 = vpack.c.bf16 %v583_v32, %v582_v28  ;;  %v3682_v43 = vld [vmem:[%s3434_s17 + $0xe1] sm:$0xff]  ;;  %2941 = vmatpush3.bf16.msra.mxu0 %v3218_v44 }
  0x42   : > { %3005 = vmatpush3.bf16.msra.mxu1 %v3220_v50  ;;  %v568_v0 = vpack.c.bf16 %v3682_v43, %v3668_v35  ;;  %2942 = vmatprep.subr.bf16.mxu0 %v3221_v16  ;;  %v3725_v28 = vld [vmem:[%s3434_s17 + $0x100] sm:$0xff] }
  0x43   : > { %v618_v32 = vld [vmem:[%s3425_s29 + $0x1] sm:$0xff]  ;;  %v521_v44 = vpack.c.bf16 %v3725_v28, %v3716_v17 }
  0x45   : > { %2943 = vmatpush3.bf16.msra.mxu0 %v3222_v20  ;;  %v659_v20 = vpack.c.bf16 %v3479_v54, %v3448_v38  ;;  %v623_v38 = vld [vmem:[%s3425_s29 + $0x51] sm:$0xff] }
  0x46   : > { %3088 = vmatprep.subr.bf16.mxu0 %v3225_v40  ;;  %v3230_v54 = vld [vmem:[%s4035_s6 + $0x10] sm:$0xff]  }
  0x47   : > { %1357 = vmatmul.mubr.bf16.gmra.mrb[16].mxu0 %v518_v52  ;;  %v3697_v52 = vld [vmem:[%s3419_s25 + $0x100] sm:$0xff] }
  0x48   : > { %1454 = vmatmul.mubr.bf16.gmra.mrb[16].mxu1 %v566_v57  ;;  %1364 = vmatprep.mubr.bf16.mxu0 %v543_v63  ;;  %v585_v57 = vld [vmem:[%s3425_s29 + $0x100] sm:$0xff]  ;;  %v3704_v63 = vld [vmem:[%s3434_s17 + $0xf1] sm:$0xff]  ;;  %v545_v3 = vpack.c.bf16 %v3697_v52, %v3694_v51 }
  0x49   : > { %1461 = vmatprep.mubr.bf16.mxu1 %v591_v4  ;;  %v714_v4 = vpack.c.bf16 %v3704_v63, %v3682_v43  ;;  %v593_v14 = vpack.c.bf16 %v585_v57, %v584_v53  ;;  %v684_v57 = vpack.c.bf16 %v3469_v48, %v3441_v33  ;;  %v685_v33 = vpack.c.bf16 %v3509_v1, %v3472_v49  ;;  %v596_v48 = vld [vmem:[%s3749_s20 + $0x20] sm:$0xff]  ;;  %v3229_v49 = vld [vmem:[%s4033_s4 + $0x210] sm:$0xff]  }
  0x4f   : > { %1365 = vmatmul.mubr.bf16.gmra.mrb[20].mxu0 %v519_v21  ;;  %v3223_v21 = vld [vmem:[%s4033_s4 + $0x1f8] sm:$0xff]  }
  0x50   : > { %1462 = vmatmul.mubr.bf16.gmra.mrb[20].mxu1 %v567_v30  ;;  %1372 = vmatprep.mubr.bf16.mxu0 %v544_v31  ;;  %v3728_v30 = vld [vmem:[%s3434_s17 + $0x101] sm:$0xff]  ;;  %v3224_v31 = vld [vmem:[%s4033_s4 + $0x1b8] sm:$0xff]  }
  0x51   : > { %1469 = vmatprep.mubr.bf16.mxu1 %v592_v34  ;;  %v619_v34 = vld [vmem:[%s3425_s29 + $0x11] sm:$0xff]  ;;  %3006 = vmatprep.subr.bf16.mxu1 %v3223_v21  ;;  %v569_v50 = vpack.c.bf16 %v3728_v30, %v3704_v63 }
  0x52   : > { %3007 = vmatpush3.bf16.msra.mxu1 %v3224_v31  ;;  %v634_v53 = vpack.c.bf16 %v619_v34, %v618_v32  ;;  %v3227_v31 = vld [vmem:[%s4033_s4 + $0x208] sm:$0xff]   ;;  %v597_v32 = vld [vmem:[%s3749_s20 + $0x30] sm:$0xff] }
  0x53   : > { %3120 = vmatprep.subr.bf16.mxu1 %v3226_v46  ;;  %v3228_v34 = vld [vmem:[%s4035_s6 + $0x8] sm:$0xff]   ;;  %v611_v1 = vpack.c.bf16 %v597_v32, %v596_v48  ;;  %v601_v48 = vld [vmem:[%s3749_s20 + $0x70] sm:$0xff]  ;;  %v2511_v32 = vld [vmem:[%s3434_s17 + $0x80] sm:$0xff] }
  0x57   : > { %1373 = vmatmul.mubr.bf16.gmra.mrb[24].mxu0 %v520_v60  ;;  %v594_v60 = vld [vmem:[%s3749_s20] sm:$0xff] }
  0x58   : > { %1470 = vmatmul.mubr.bf16.gmra.mrb[24].mxu1 %v568_v0  ;;  %1380 = vmatprep.mubr.bf16.mxu0 %v545_v3  ;;  %v595_v0 = vld [vmem:[%s3749_s20 + $0x10] sm:$0xff]  ;;  %v620_v3 = vld [vmem:[%s3425_s29 + $0x21] sm:$0xff] }
  0x59   : > { %1477 = vmatprep.mubr.bf16.mxu1 %v593_v14  ;;  %v621_v14 = vld [vmem:[%s3425_s29 + $0x31] sm:$0xff]  ;;  %v610_v16 = vpack.c.bf16 %v595_v0, %v594_v60  ;;  %v2527_v60 = vld [vmem:[%s3419_s25 + $0x80] sm:$0xff] }
  0x5a   : > { %v635_v21 = vpack.c.bf16 %v621_v14, %v620_v3  ;;  %v3233_v0 = vld [vmem:[%s4033_s4 + $0x220] sm:$0xff]  }
  0x5b   : > { %v3234_v14 = vld [vmem:[%s4035_s6 + $0x20] sm:$0xff]  }
  0x5f   : > { %1381 = vmatmul.mubr.bf16.gmra.mrb[28].mxu0 %v521_v44  ;;  %v622_v44 = vld [vmem:[%s3425_s29 + $0x41] sm:$0xff] }
  0x60   : > { %1478 = vmatmul.mubr.bf16.gmra.mrb[28].mxu1 %v569_v50  ;;  %1518 = vmatprep.mubr.bf16.mxu0 %v634_v53  ;;  %v686_v50 = vpack.c.bf16 %v3549_v18, %v3512_v2  ;;  %v3231_v53 = vld [vmem:[%s4033_s4 + $0x218] sm:$0xff]   ;;  %v624_v2 = vld [vmem:[%s3425_s29 + $0x61] sm:$0xff] }
  0x61   : > { %1615 = vmatprep.mubr.bf16.mxu1 %v684_v57  ;;  %v599_v57 = vld [vmem:[%s3749_s20 + $0x50] sm:$0xff] }
  0x62   : > { %v625_v18 = vld [vmem:[%s3425_s29 + $0x71] sm:$0xff] }
  0x67   : > { %1519 = vmatmul.mubr.bf16.vlgmr.msra.gmra.mrb[32].mxu0 %v610_v16  ;;  %v661_v16 = vpack.c.bf16 %v3559_v23, %v3522_v8  ;;  %v3236_v8 = vld [vmem:[%s4035_s6 + $0x28] sm:$0xff]   ;;  %v626_v23 = vld [vmem:[%s3425_s29 + $0x91] sm:$0xff] }
  0x68   : > { %1616 = vmatmul.mubr.bf16.vlgmr.msra.gmra.mrb[32].mxu1 %v659_v20  ;;  %3089 = vmatpush3.bf16.msra.mxu0 %v3225_v40  ;;  %v660_v40 = vpack.c.bf16 %v3519_v6, %v3482_v55  ;;  %v3232_v55 = vld [vmem:[%s4035_s6 + $0x18] sm:$0xff]   ;;  %v598_v6 = vld [vmem:[%s3749_s20 + $0x40] sm:$0xff]  ;;  %v637_v20 = vpack.c.bf16 %v625_v18, %v624_v2  ;;  %v604_v2 = vld [vmem:[%s3749_s20 + $0xb0] sm:$0xff] }
  0x69   : > { %3121 = vmatpush3.bf16.msra.mxu1 %v3226_v46  ;;  %1526 = vmatprep.mubr.bf16.mxu0 %v635_v21  ;;  %v636_v46 = vpack.c.bf16 %v623_v38, %v622_v44  ;;  %v612_v3 = vpack.c.bf16 %v599_v57, %v598_v6  ;;  %v687_v21 = vpack.c.bf16 %v2527_v60, %v3552_v19  ;;  %v627_v19 = vld [vmem:[%s3425_s29 + $0xa1] sm:$0xff]  ;;  %v3238_v38 = vld [vmem:[%s4035_s6 + $0x30] sm:$0xff]  }
  0x6a   : > { %1623 = vmatprep.mubr.bf16.mxu1 %v685_v33  ;;  %3090 = vmatprep.subr.bf16.mxu0 %v3227_v31  ;;  %v600_v33 = vld [vmem:[%s3749_s20 + $0x60] sm:$0xff]  ;;  %v689_v57 = vpack.c.bf16 %v3656_v22, %v3621_v62  ;;  %v630_v60 = vld [vmem:[%s3425_s29 + $0xd1] sm:$0xff]  ;;  %v690_v22 = vpack.c.bf16 %v3694_v51, %v3659_v25 }
  0x6b   : > { %3122 = vmatprep.subr.bf16.mxu1 %v3228_v34  ;;  %v613_v44 = vpack.c.bf16 %v601_v48, %v600_v33  ;;  %v605_v18 = vld [vmem:[%s3749_s20 + $0xc0] sm:$0xff]  ;;  %v608_v51 = vld [vmem:[%s3749_s20 + $0xf0] sm:$0xff] }
  0x6c   : > { %3091 = vmatpush3.bf16.msra.mxu0 %v3227_v31  ;;  %v3235_v31 = vld [vmem:[%s4033_s4 + $0x228] sm:$0xff]   ;;  %v609_v48 = vld [vmem:[%s3749_s20 + $0x100] sm:$0xff] }
  0x6d   : > { %3123 = vmatpush3.bf16.msra.mxu1 %v3228_v34  ;;  %3092 = vmatprep.subr.bf16.mxu0 %v3229_v49  ;;  %v3237_v34 = vld [vmem:[%s4033_s4 + $0x230] sm:$0xff]  }
  0x6e   : > { %3124 = vmatprep.subr.bf16.mxu1 %v3230_v54 }
  0x6f   : > { %1527 = vmatmul.mubr.bf16.gmra.mrb[36].mxu0 %v611_v1  ;;  %v688_v1 = vpack.c.bf16 %v3618_v61, %v3590_v37  ;;  %v628_v37 = vld [vmem:[%s3425_s29 + $0xb1] sm:$0xff]  ;;  %v629_v61 = vld [vmem:[%s3425_s29 + $0xc1] sm:$0xff] }
  0x70   : > { %1624 = vmatmul.mubr.bf16.gmra.mrb[36].mxu1 %v660_v40  ;;  %1534 = vmatprep.mubr.bf16.mxu0 %v636_v46  ;;  %v3239_v40 = vld [vmem:[%s4033_s4 + $0x238] sm:$0xff]   ;;  %v639_v6 = vpack.c.bf16 %v629_v61, %v628_v37 }
  0x71   : > { %1631 = vmatprep.mubr.bf16.mxu1 %v686_v50  ;;  %3093 = vmatpush3.bf16.msra.mxu0 %v3229_v49  ;;  %v662_v49 = vpack.c.bf16 %v2511_v32, %v3562_v24  ;;  %v3240_v46 = vld [vmem:[%s4035_s6 + $0x38] sm:$0xff]   ;;  %v602_v24 = vld [vmem:[%s3749_s20 + $0x90] sm:$0xff]  ;;  %v603_v50 = vld [vmem:[%s3749_s20 + $0xa0] sm:$0xff]  ;;  %v617_v32 = vpack.c.bf16 %v609_v48, %v608_v51 }
  0x72   : > { %3125 = vmatpush3.bf16.msra.mxu1 %v3230_v54  ;;  %3094 = vmatprep.subr.bf16.mxu0 %v3231_v53  ;;  %v638_v54 = vpack.c.bf16 %v627_v19, %v626_v23  ;;  %v3241_v23 = vld [vmem:[%s3805_s26] sm:$0xff]  }
  0x73   : > { %3126 = vmatprep.subr.bf16.mxu1 %v3232_v55 }
  0x75   : > { %3095 = vmatpush3.bf16.msra.mxu0 %v3231_v53  ;;  %v614_v53 = vpack.c.bf16 %v603_v50, %v602_v24 }
  0x76   : > { %3127 = vmatpush3.bf16.msra.mxu1 %v3232_v55  ;;  %3096 = vmatprep.subr.bf16.mxu0 %v3233_v0  ;;  %v663_v55 = vpack.c.bf16 %v3628_v5, %v3597_v45  ;;  %v615_v45 = vpack.c.bf16 %v605_v18, %v604_v2  ;;  %v664_v5 = vpack.c.bf16 %v3671_v36, %v3631_v7 }
  0x77   : > { %1535 = vmatmul.mubr.bf16.gmra.mrb[40].mxu0 %v612_v3  ;;  %3128 = vmatprep.subr.bf16.mxu1 %v3234_v14  ;;  %v606_v3 = vld [vmem:[%s3749_s20 + $0xd0] sm:$0xff]  ;;  %v665_v7 = vpack.c.bf16 %v3716_v17, %v3674_v39  ;;  %v3242_v39 = vld [vmem:[%s3805_s26 + $0x8] sm:$0xff]  }
  0x78   : > { %1632 = vmatmul.mubr.bf16.gmra.mrb[40].mxu1 %v661_v16  ;;  %1542 = vmatprep.mubr.bf16.mxu0 %v637_v20  ;;  %v632_v16 = vld [vmem:[%s3425_s29 + $0xf1] sm:$0xff]  ;;  %v633_v20 = vld [vmem:[%s3425_s29 + $0x101] sm:$0xff] }
  0x79   : > { %1639 = vmatprep.mubr.bf16.mxu1 %v687_v21  ;;  %3097 = vmatpush3.bf16.msra.mxu0 %v3233_v0  ;;  %v631_v0 = vld [vmem:[%s3425_s29 + $0xe1] sm:$0xff]  ;;  %v2535_v21 = vld [vmem:[%s3419_s25 + $0x110] sm:$0xff]  ;;  %v641_v36 = vpack.c.bf16 %v633_v20, %v632_v16 }
  0x7a   : > { %3129 = vmatpush3.bf16.msra.mxu1 %v3234_v14  ;;  %3098 = vmatprep.subr.bf16.mxu0 %v3235_v31  ;;  %v640_v62 = vpack.c.bf16 %v631_v0, %v630_v60  ;;  %v607_v14 = vld [vmem:[%s3749_s20 + $0xe0] sm:$0xff]  ;;  %v691_v25 = vpack.c.bf16 %v2535_v21, %v3697_v52  ;;  %v3243_v52 = vld [vmem:[%s3805_s26 + $0x10] sm:$0xff]  }
  0x7b   : > { %3130 = vmatprep.subr.bf16.mxu1 %v3236_v8  ;;  %v616_v33 = vpack.c.bf16 %v607_v14, %v606_v3  ;;  %v2543_v17 = vld [vmem:[%s3434_s17 + $0x81] sm:$0xff] }
  0x7c   : > { %v711_v42 = vpack.c.bf16 %v2543_v17, %v3568_v27 }
  0x7d   : > { %3099 = vmatpush3.bf16.msra.mxu0 %v3235_v31  ;;  %v2519_v31 = vld [vmem:[%s3434_s17 + $0x110] sm:$0xff]  ;;  %s3981_s17 = scalar_lea.vmem %s4038_s9, %s3790_s19  ;;  %s2500_s19 = sshll.u32 %s4045_s14, 1 }
  0x7e   : > { %3131 = vmatpush3.bf16.msra.mxu1 %v3236_v8  ;;  %3100 = vmatprep.subr.bf16.mxu0 %v3237_v34  ;;  %v666_v8 = vpack.c.bf16 %v2519_v31, %v3725_v28  ;;  %s496_s12 = scalar_lea.vmem %s4039_s10, %s2500_s19  ;;  %s486_s21 = scalar_lea.vmem %s4037_s8, %s2500_s19 }
  0x7f   : > { %1543 = vmatmul.mubr.bf16.gmra.mrb[44].mxu0 %v613_v44  ;;  %3132 = vmatprep.subr.bf16.mxu1 %v3238_v38 }
  0x80   : > { %1640 = vmatmul.mubr.bf16.gmra.mrb[44].mxu1 %v662_v49  ;;  %1550 = vmatprep.mubr.bf16.mxu0 %v638_v54 }
  0x81   : > { %1647 = vmatprep.mubr.bf16.mxu1 %v688_v1  ;;  %3101 = vmatpush3.bf16.msra.mxu0 %v3237_v34 }
  0x82   : > { %3133 = vmatpush3.bf16.msra.mxu1 %v3238_v38  ;;  %3102 = vmatprep.subr.bf16.mxu0 %v3239_v40 }
  0x83   : > { %3134 = vmatprep.subr.bf16.mxu1 %v3240_v46 }
  0x85   : > { %3103 = vmatpush3.bf16.msra.mxu0 %v3239_v40 }
  0x86   : > { %3135 = vmatpush3.bf16.msra.mxu1 %v3240_v46 }
  0x87   : > { %1551 = vmatmul.mubr.bf16.gmra.mrb[48].mxu0 %v614_v53 }
  0x88   : > { %1648 = vmatmul.mubr.bf16.gmra.mrb[48].mxu1 %v663_v55  ;;  %1558 = vmatprep.mubr.bf16.mxu0 %v639_v6 }
  0x89   : > { %1655 = vmatprep.mubr.bf16.mxu1 %v689_v57 }
  0x8f   : > { %1559 = vmatmul.mubr.bf16.gmra.mrb[52].mxu0 %v615_v45 }
  0x90   : > { %1656 = vmatmul.mubr.bf16.gmra.mrb[52].mxu1 %v664_v5  ;;  %1566 = vmatprep.mubr.bf16.mxu0 %v640_v62 }
  0x91   : > { %1663 = vmatprep.mubr.bf16.mxu1 %v690_v22 }
  0x97   : > { %1567 = vmatmul.mubr.bf16.gmra.mrb[56].mxu0 %v616_v33 }
  0x98   : > { %1664 = vmatmul.mubr.bf16.gmra.mrb[56].mxu1 %v665_v7  ;;  %1574 = vmatprep.mubr.bf16.mxu0 %v641_v36 }
  0x99   : > { %1671 = vmatprep.mubr.bf16.mxu1 %v691_v25 }
  0x9f   : > { %1575 = vmatmul.mubr.bf16.gmra.mrb[60].mxu0 %v617_v32 }
  0xa0   : > { %1672 = vmatmul.mubr.bf16.gmra.mrb[60].mxu1 %v666_v8  ;;  %3104 = vmatprep.mubr.bf16.mxu0 %v708_v59  ;;  %v3245_v59 = vld [vmem:[%s3805_s26 + $0x20] sm:$0xff]  }
  0xa1   : > { %3136 = vmatprep.mubr.bf16.mxu1 %v3241_v23 }
  0xa7   : > { %3105 = vmatmul.mubr.bf16.vlgmr.msra.gmra.mrb[64].mxu0 %v709_v13  ;;  %v715_v13 = vpack.c.bf16 %v2551_v10, %v3728_v30 }
  0xa8   : > { %3137 = vmatmul.mubr.bf16.vlgmr.msra.gmra.mrb[64].mxu1 %v3242_v39  ;;  %3108 = vmatprep.mubr.bf16.mxu0 %v710_v29 }
  0xa9   : > { %3140 = vmatprep.mubr.bf16.mxu1 %v3243_v52 }
  0xaf   : > { %3109 = vmatmul.mubr.bf16.gmra.mrb[68].mxu0 %v711_v42 }
  0xb0   : > { %3141 = vmatmul.mubr.bf16.gmra.mrb[68].mxu1 %v3244_v56  ;;  %3112 = vmatprep.mubr.bf16.mxu0 %v712_v15 }
  0xb1   : > { %3144 = vmatprep.mubr.bf16.mxu1 %v3245_v59 }
  0xb7   : > { %3113 = vmatmul.mubr.bf16.gmra.mrb[72].mxu0 %v713_v41 }
  0xb8   : > { %3145 = vmatmul.mubr.bf16.gmra.mrb[72].mxu1 %v3246_v58  ;;  %3116 = vmatprep.mubr.bf16.mxu0 %v714_v4 }
  0xb9   : > { %3148 = vmatprep.mubr.bf16.mxu1 %v3247_v9 }
  0xbf   : > { %3117 = vmatmul.mubr.bf16.gmra.mrb[76].mxu0 %v715_v13 }
  0xc0   : > { %3149 = vmatmul.mubr.bf16.gmra.mrb[76].mxu1 %v3248_v26 }
  0xfa   : > { %v2816_v27 = vpop.f32.mrb[0].mxu0 }
  0xfb   : > { %v2880_v29 = vpop.f32.mrb[0].mxu1  ;;  %v2817_v47 = vpop.f32.mrb[1].mxu0 }
  0xfc   : > { %v2818_v11 = vadd.f32 %v2817_v47, %v2816_v27  ;;  %v2881_v15 = vpop.f32.mrb[1].mxu1  ;;  %v2819_v28 = vpop.f32.mrb[2].mxu0 }
  0xfd   : > { %v2882_v12 = vadd.f32 %v2881_v15, %v2880_v29  ;;  %v2883_v35 = vpop.f32.mrb[2].mxu1  ;;  %v2820_v41 = vpop.f32.mrb[3].mxu0 }
  0xfe   : > { %v2821_v19 = vadd.f32 %v2820_v41, %v2819_v28  ;;  %v2884_v34 = vpop.f32.mrb[3].mxu1 }
  0xff   : > { %v3894_v43 = vadd.f32 %v2882_v12, %v2818_v11  ;;  %v2885_v63 = vadd.f32 %v2884_v34, %v2883_v35 }
 0x101   : > { %v3896_v4 = vadd.f32 %v2885_v63, %v2821_v19 }
 0x102   : > { %v2822_v30 = vpop.f32.mrb[4].mxu0 }
 0x103   : > { %v2886_v44 = vpop.f32.mrb[4].mxu1  ;;  %v2823_v38 = vpop.f32.mrb[5].mxu0 }
 0x104   : > { %v2824_v49 = vadd.f32 %v2823_v38, %v2822_v30  ;;  %v2887_v54 = vpop.f32.mrb[5].mxu1  ;;  %v2825_v1 = vpop.f32.mrb[6].mxu0 }
 0x105   : > { %v2888_v40 = vadd.f32 %v2887_v54, %v2886_v44  ;;  %v2889_v46 = vpop.f32.mrb[6].mxu1  ;;  %v2826_v24 = vpop.f32.mrb[7].mxu0 }
 0x106   : > { %v2827_v50 = vadd.f32 %v2826_v24, %v2825_v1  ;;  %v2890_v37 = vpop.f32.mrb[7].mxu1 }
 0x107   : > { %v3898_v61 = vadd.f32 %v2888_v40, %v2824_v49  ;;  %v2891_v53 = vadd.f32 %v2890_v37, %v2889_v46 }
 0x109   : > { %v3900_v55 = vadd.f32 %v2891_v53, %v2827_v50 }
 0x10a   : > { %v2828_v6 = vpop.f32.mrb[8].mxu0 }
 0x10b   : > { %v2892_v57 = vpop.f32.mrb[8].mxu1  ;;  %v2829_v2 = vpop.f32.mrb[9].mxu0 }
 0x10c   : > { %v2830_v18 = vadd.f32 %v2829_v2, %v2828_v6  ;;  %v2893_v60 = vpop.f32.mrb[9].mxu1  ;;  %v2831_v0 = vpop.f32.mrb[10].mxu0 }
 0x10d   : > { %v2894_v45 = vadd.f32 %v2893_v60, %v2892_v57  ;;  %v2895_v5 = vpop.f32.mrb[10].mxu1  ;;  %v2832_v62 = vpop.f32.mrb[11].mxu0 }
 0x10e   : > { %v2833_v22 = vadd.f32 %v2832_v62, %v2831_v0  ;;  %v2896_v3 = vpop.f32.mrb[11].mxu1 }
 0x10f   : > { %v3902_v14 = vadd.f32 %v2894_v45, %v2830_v18  ;;  %v2897_v16 = vadd.f32 %v2896_v3, %v2895_v5 }
 0x111   : > { %v3904_v20 = vadd.f32 %v2897_v16, %v2833_v22 }
 0x112   : > { %v2834_v21 = vpop.f32.mrb[12].mxu0 }
 0x113   : > { %v2898_v33 = vpop.f32.mrb[12].mxu1  ;;  %v2835_v7 = vpop.f32.mrb[13].mxu0 }
 0x114   : > { %v2836_v36 = vadd.f32 %v2835_v7, %v2834_v21  ;;  %v2899_v25 = vpop.f32.mrb[13].mxu1  ;;  %v2837_v51 = vpop.f32.mrb[14].mxu0 }
 0x115   : > { %v2900_v48 = vadd.f32 %v2899_v25, %v2898_v33  ;;  %v2901_v31 = vpop.f32.mrb[14].mxu1  ;;  %v2838_v32 = vpop.f32.mrb[15].mxu0 }
 0x116   : > { %v2839_v8 = vadd.f32 %v2838_v32, %v2837_v51  ;;  %v2902_v23 = vpop.f32.mrb[15].mxu1 }
 0x117   : > { %v3906_v39 = vadd.f32 %v2900_v48, %v2836_v36  ;;  %v2903_v52 = vadd.f32 %v2902_v23, %v2901_v31 }
 0x119   : > { %v3908_v17 = vadd.f32 %v2903_v52, %v2839_v8 }
 0x11a   : > { %v2840_v42 = vpop.f32.mrb[16].mxu0 }
 0x11b   : > { %v2904_v56 = vpop.f32.mrb[16].mxu1  ;;  %v2841_v59 = vpop.f32.mrb[17].mxu0 }
 0x11c   : > { %v2842_v58 = vadd.f32 %v2841_v59, %v2840_v42  ;;  %v2905_v9 = vpop.f32.mrb[17].mxu1  ;;  %v2843_v10 = vpop.f32.mrb[18].mxu0 }
 0x11d   : > { %v2906_v13 = vadd.f32 %v2905_v9, %v2904_v56  ;;  %v2907_v26 = vpop.f32.mrb[18].mxu1  ;;  %v2844_v27 = vpop.f32.mrb[19].mxu0 }
 0x11e   : > { %v2845_v29 = vadd.f32 %v2844_v27, %v2843_v10  ;;  %v2908_v47 = vpop.f32.mrb[19].mxu1 }
 0x11f   : > { %v3910_v11 = vadd.f32 %v2906_v13, %v2842_v58  ;;  %v2909_v15 = vadd.f32 %v2908_v47, %v2907_v26 }
 0x121   : > { %v3912_v28 = vadd.f32 %v2909_v15, %v2845_v29 }
 0x122   : > { %v2846_v12 = vpop.f32.mrb[20].mxu0 }
 0x123   : > { %v2910_v35 = vpop.f32.mrb[20].mxu1  ;;  %v2847_v41 = vpop.f32.mrb[21].mxu0 }
 0x124   : > { %v2848_v19 = vadd.f32 %v2847_v41, %v2846_v12  ;;  %v2911_v34 = vpop.f32.mrb[21].mxu1  ;;  %v2849_v63 = vpop.f32.mrb[22].mxu0 }
 0x125   : > { %v2912_v30 = vadd.f32 %v2911_v34, %v2910_v35  ;;  %v2913_v44 = vpop.f32.mrb[22].mxu1  ;;  %v2850_v38 = vpop.f32.mrb[23].mxu0 }
 0x126   : > { %v2851_v49 = vadd.f32 %v2850_v38, %v2849_v63  ;;  %v2914_v54 = vpop.f32.mrb[23].mxu1 }
 0x127   : > { %v3914_v1 = vadd.f32 %v2912_v30, %v2848_v19  ;;  %v2915_v40 = vadd.f32 %v2914_v54, %v2913_v44 }
 0x129   : > { %v3916_v46 = vadd.f32 %v2915_v40, %v2851_v49 }
 0x12a   : > { %v2852_v24 = vpop.f32.mrb[24].mxu0 }
 0x12b   : > { %v2916_v50 = vpop.f32.mrb[24].mxu1  ;;  %v2853_v37 = vpop.f32.mrb[25].mxu0 }
 0x12c   : > { %v2854_v53 = vadd.f32 %v2853_v37, %v2852_v24  ;;  %v2917_v6 = vpop.f32.mrb[25].mxu1  ;;  %v2855_v57 = vpop.f32.mrb[26].mxu0 }
 0x12d   : > { %v2918_v2 = vadd.f32 %v2917_v6, %v2916_v50  ;;  %v2919_v18 = vpop.f32.mrb[26].mxu1  ;;  %v2856_v60 = vpop.f32.mrb[27].mxu0 }
 0x12e   : > { %v2857_v0 = vadd.f32 %v2856_v60, %v2855_v57  ;;  %v2920_v45 = vpop.f32.mrb[27].mxu1 }
 0x12f   : > { %v3918_v5 = vadd.f32 %v2918_v2, %v2854_v53  ;;  %v2921_v62 = vadd.f32 %v2920_v45, %v2919_v18 }
 0x131   : > { %v3920_v22 = vadd.f32 %v2921_v62, %v2857_v0 }
 0x132   : > { %v2858_v3 = vpop.f32.mrb[28].mxu0 }
 0x133   : > { %v2922_v16 = vpop.f32.mrb[28].mxu1  ;;  %v2859_v21 = vpop.f32.mrb[29].mxu0 }
 0x134   : > { %v2860_v33 = vadd.f32 %v2859_v21, %v2858_v3  ;;  %v2923_v7 = vpop.f32.mrb[29].mxu1  ;;  %v2861_v36 = vpop.f32.mrb[30].mxu0 }
 0x135   : > { %v2924_v25 = vadd.f32 %v2923_v7, %v2922_v16  ;;  %v2925_v51 = vpop.f32.mrb[30].mxu1  ;;  %v2862_v48 = vpop.f32.mrb[31].mxu0 }
 0x136   : > { %v2863_v31 = vadd.f32 %v2862_v48, %v2861_v36  ;;  %v2926_v32 = vpop.f32.mrb[31].mxu1 }
 0x137   : > { %v3922_v8 = vadd.f32 %v2924_v25, %v2860_v33  ;;  %v2927_v23 = vadd.f32 %v2926_v32, %v2925_v51 }
 0x139   : > { %v3924_v52 = vadd.f32 %v2927_v23, %v2863_v31 }
 0x13a   : > { %v2944_v42 = vpop.f32.mrb[32].mxu0 }
 0x13b   : > { %v3008_v56 = vpop.f32.mrb[32].mxu1  ;;  %v2945_v59 = vpop.f32.mrb[33].mxu0 }
 0x13c   : > { %v2946_v58 = vadd.f32 %v2945_v59, %v2944_v42  ;;  %v3009_v9 = vpop.f32.mrb[33].mxu1  ;;  %v2947_v10 = vpop.f32.mrb[34].mxu0 }
 0x13d   : > { %v3010_v13 = vadd.f32 %v3009_v9, %v3008_v56  ;;  %v3011_v26 = vpop.f32.mrb[34].mxu1  ;;  %v2948_v27 = vpop.f32.mrb[35].mxu0 }
 0x13e   : > { %v1521_v29 = vadd.f32 %v2946_v58, %v3894_v43  ;;  %v2949_v47 = vadd.f32 %v2948_v27, %v2947_v10  ;;  %v3012_v15 = vpop.f32.mrb[35].mxu1 }
 0x13f   : > { %v3013_v12 = vadd.f32 %v3012_v15, %v3011_v26 }
 0x140   : > { %v1524_v35 = vadd.f32 %v2949_v47, %v3896_v4  ;;  %v3928_v41 = vadd.f32 %v3010_v13, %v1521_v29 }
 0x142   : > { %v2950_v19 = vpop.f32.mrb[36].mxu0  ;;  %v3930_v34 = vadd.f32 %v3013_v12, %v1524_v35 }
 0x143   : > { %v3014_v63 = vpop.f32.mrb[36].mxu1  ;;  %v2951_v30 = vpop.f32.mrb[37].mxu0 }
 0x144   : > { %v2952_v44 = vadd.f32 %v2951_v30, %v2950_v19  ;;  %v3015_v38 = vpop.f32.mrb[37].mxu1  ;;  %v2953_v49 = vpop.f32.mrb[38].mxu0 }
 0x145   : > { %v3016_v54 = vadd.f32 %v3015_v38, %v3014_v63  ;;  %v3017_v40 = vpop.f32.mrb[38].mxu1  ;;  %v2954_v24 = vpop.f32.mrb[39].mxu0 }
 0x146   : > { %v1529_v43 = vadd.f32 %v2952_v44, %v3898_v61  ;;  %v2955_v50 = vadd.f32 %v2954_v24, %v2953_v49  ;;  %v3018_v37 = vpop.f32.mrb[39].mxu1 }
 0x147   : > { %v3019_v53 = vadd.f32 %v3018_v37, %v3017_v40 }
 0x148   : > { %v1532_v4 = vadd.f32 %v2955_v50, %v3900_v55  ;;  %v3934_v6 = vadd.f32 %v3016_v54, %v1529_v43 }
 0x14a   : > { %v2956_v57 = vpop.f32.mrb[40].mxu0  ;;  %v3936_v2 = vadd.f32 %v3019_v53, %v1532_v4 }
 0x14b   : > { %v3020_v18 = vpop.f32.mrb[40].mxu1  ;;  %v2957_v60 = vpop.f32.mrb[41].mxu0 }
 0x14c   : > { %v2958_v0 = vadd.f32 %v2957_v60, %v2956_v57  ;;  %v3021_v45 = vpop.f32.mrb[41].mxu1  ;;  %v2959_v62 = vpop.f32.mrb[42].mxu0 }
 0x14d   : > { %v3022_v3 = vadd.f32 %v3021_v45, %v3020_v18  ;;  %v3023_v16 = vpop.f32.mrb[42].mxu1  ;;  %v2960_v21 = vpop.f32.mrb[43].mxu0 }
 0x14e   : > { %v1537_v61 = vadd.f32 %v2958_v0, %v3902_v14  ;;  %v2961_v33 = vadd.f32 %v2960_v21, %v2959_v62  ;;  %v3024_v7 = vpop.f32.mrb[43].mxu1 }
 0x14f   : > { %v3025_v36 = vadd.f32 %v3024_v7, %v3023_v16 }
 0x150   : > { %v1540_v55 = vadd.f32 %v2961_v33, %v3904_v20  ;;  %v3940_v25 = vadd.f32 %v3022_v3, %v1537_v61 }
 0x152   : > { %v2962_v51 = vpop.f32.mrb[44].mxu0  ;;  %v3942_v48 = vadd.f32 %v3025_v36, %v1540_v55 }
 0x153   : > { %v3026_v31 = vpop.f32.mrb[44].mxu1  ;;  %v2963_v32 = vpop.f32.mrb[45].mxu0 }
 0x154   : > { %v2964_v23 = vadd.f32 %v2963_v32, %v2962_v51  ;;  %v3027_v42 = vpop.f32.mrb[45].mxu1  ;;  %v2965_v56 = vpop.f32.mrb[46].mxu0 }
 0x155   : > { %v3028_v59 = vadd.f32 %v3027_v42, %v3026_v31  ;;  %v3029_v58 = vpop.f32.mrb[46].mxu1  ;;  %v2966_v9 = vpop.f32.mrb[47].mxu0 }
 0x156   : > { %v1545_v14 = vadd.f32 %v2964_v23, %v3906_v39  ;;  %v2967_v10 = vadd.f32 %v2966_v9, %v2965_v56  ;;  %v3030_v13 = vpop.f32.mrb[47].mxu1 }
 0x157   : > { %v3031_v26 = vadd.f32 %v3030_v13, %v3029_v58 }
 0x158   : > { %v1548_v20 = vadd.f32 %v2967_v10, %v3908_v17  ;;  %v3946_v27 = vadd.f32 %v3028_v59, %v1545_v14 }
 0x15a   : > { %v2968_v29 = vpop.f32.mrb[48].mxu0  ;;  %v3948_v47 = vadd.f32 %v3031_v26, %v1548_v20 }
 0x15b   : > { %v3032_v15 = vpop.f32.mrb[48].mxu1  ;;  %v2969_v12 = vpop.f32.mrb[49].mxu0 }
 0x15c   : > { %v2970_v35 = vadd.f32 %v2969_v12, %v2968_v29  ;;  %v3033_v19 = vpop.f32.mrb[49].mxu1  ;;  %v2971_v63 = vpop.f32.mrb[50].mxu0 }
 0x15d   : > { %v3034_v30 = vadd.f32 %v3033_v19, %v3032_v15  ;;  %v3035_v44 = vpop.f32.mrb[50].mxu1  ;;  %v2972_v38 = vpop.f32.mrb[51].mxu0 }
 0x15e   : > { %v1553_v39 = vadd.f32 %v2970_v35, %v3910_v11  ;;  %v2973_v49 = vadd.f32 %v2972_v38, %v2971_v63  ;;  %v3036_v54 = vpop.f32.mrb[51].mxu1 }
 0x15f   : > { %v3037_v40 = vadd.f32 %v3036_v54, %v3035_v44 }
 0x160   : > { %v1556_v17 = vadd.f32 %v2973_v49, %v3912_v28  ;;  %v3952_v24 = vadd.f32 %v3034_v30, %v1553_v39 }
 0x162   : > { %v2974_v43 = vpop.f32.mrb[52].mxu0  ;;  %v3954_v50 = vadd.f32 %v3037_v40, %v1556_v17 }
 0x163   : > { %v3038_v37 = vpop.f32.mrb[52].mxu1  ;;  %v2975_v53 = vpop.f32.mrb[53].mxu0 }
 0x164   : > { %v2976_v4 = vadd.f32 %v2975_v53, %v2974_v43  ;;  %v3039_v57 = vpop.f32.mrb[53].mxu1  ;;  %v2977_v18 = vpop.f32.mrb[54].mxu0 }
 0x165   : > { %v3040_v60 = vadd.f32 %v3039_v57, %v3038_v37  ;;  %v3041_v0 = vpop.f32.mrb[54].mxu1  ;;  %v2978_v45 = vpop.f32.mrb[55].mxu0 }
 0x166   : > { %v1561_v11 = vadd.f32 %v2976_v4, %v3914_v1  ;;  %v2979_v62 = vadd.f32 %v2978_v45, %v2977_v18  ;;  %v3042_v3 = vpop.f32.mrb[55].mxu1 }
 0x167   : > { %v3043_v16 = vadd.f32 %v3042_v3, %v3041_v0 }
 0x168   : > { %v1564_v28 = vadd.f32 %v2979_v62, %v3916_v46  ;;  %v3958_v21 = vadd.f32 %v3040_v60, %v1561_v11 }
 0x16a   : > { %v2980_v61 = vpop.f32.mrb[56].mxu0  ;;  %v3960_v33 = vadd.f32 %v3043_v16, %v1564_v28 }
 0x16b   : > { %v3044_v7 = vpop.f32.mrb[56].mxu1  ;;  %v2981_v36 = vpop.f32.mrb[57].mxu0 }
 0x16c   : > { %v2982_v55 = vadd.f32 %v2981_v36, %v2980_v61  ;;  %v3045_v51 = vpop.f32.mrb[57].mxu1  ;;  %v2983_v31 = vpop.f32.mrb[58].mxu0 }
 0x16d   : > { %v3046_v32 = vadd.f32 %v3045_v51, %v3044_v7  ;;  %v3047_v23 = vpop.f32.mrb[58].mxu1  ;;  %v2984_v42 = vpop.f32.mrb[59].mxu0 }
 0x16e   : > { %v1569_v1 = vadd.f32 %v2982_v55, %v3918_v5  ;;  %v2985_v56 = vadd.f32 %v2984_v42, %v2983_v31  ;;  %v3048_v59 = vpop.f32.mrb[59].mxu1 }
 0x16f   : > { %v3049_v58 = vadd.f32 %v3048_v59, %v3047_v23 }
 0x170   : > { %v1572_v46 = vadd.f32 %v2985_v56, %v3920_v22  ;;  %v3964_v9 = vadd.f32 %v3046_v32, %v1569_v1 }
 0x172   : > { %v2986_v14 = vpop.f32.mrb[60].mxu0  ;;  %v3966_v10 = vadd.f32 %v3049_v58, %v1572_v46 }
 0x173   : > { %v3050_v13 = vpop.f32.mrb[60].mxu1  ;;  %v2987_v26 = vpop.f32.mrb[61].mxu0 }
 0x174   : > { %v2988_v20 = vadd.f32 %v2987_v26, %v2986_v14  ;;  %v3051_v29 = vpop.f32.mrb[61].mxu1  ;;  %v2989_v15 = vpop.f32.mrb[62].mxu0 }
 0x175   : > { %v3052_v12 = vadd.f32 %v3051_v29, %v3050_v13  ;;  %v3053_v35 = vpop.f32.mrb[62].mxu1  ;;  %v2990_v19 = vpop.f32.mrb[63].mxu0 }
 0x176   : > { %v1577_v5 = vadd.f32 %v2988_v20, %v3922_v8  ;;  %v2991_v63 = vadd.f32 %v2990_v19, %v2989_v15  ;;  %v3054_v30 = vpop.f32.mrb[63].mxu1 }
 0x177   : > { %v3055_v44 = vadd.f32 %v3054_v30, %v3053_v35 }
 0x178   : > { %v1580_v22 = vadd.f32 %v2991_v63, %v3924_v52  ;;  %v3970_v38 = vadd.f32 %v3052_v12, %v1577_v5 }
 0x17a   : > { %v3106_v39 = vpop.f32.mrb[64].mxu0  ;;  %v3972_v49 = vadd.f32 %v3055_v44, %v1580_v22 }
 0x17b   : > { %v1723_v54 = vadd.f32 %v3106_v39, %v3934_v6  ;;  %v3138_v40 = vpop.f32.mrb[64].mxu1  ;;  %v1714_v17 = vpop.f32.mrb[65].mxu0 }
 0x17c   : > { %v1715_v43 = vadd.f32 %v1714_v17, %v3928_v41  ;;  %v2080_v37 = vpop.f32.mrb[65].mxu1  ;;  %v3107_v53 = vpop.f32.mrb[66].mxu0  ;;  %v2246_v28 = vmul.f32 %v3138_v40, %v3138_v40 }
 0x17d   : > { %v1726_v8 = vadd.f32 %v3107_v53, %v3936_v2  ;;  %v3139_v52 = vpop.f32.mrb[66].mxu1  ;;  %v1717_v4 = vpop.f32.mrb[67].mxu0  ;;  %v2244_v57 = vmul.f32 %v2080_v37, %v2080_v37  ;;  %v1880_v7 = vmul.f32 %v1723_v54, %v1723_v54 }
 0x17e   : > { %v2754_v41 = vpack.c.bf16 %v3139_v52, %v3138_v40  ;;  %v1718_v6 = vadd.f32 %v1717_v4, %v3930_v34  ;;  %v2083_v2 = vpop.f32.mrb[67].mxu1  ;;  %v1878_v18 = vmul.f32 %v1715_v43, %v1715_v43  ;;  %v2247_v31 = vmul.f32 %v3139_v52, %v3139_v52 }
 0x17f   : > { %v2714_v60 = vpack.c.bf16 %v1726_v8, %v1723_v54  ;;  %v2749_v0 = vpack.c.bf16 %v2083_v2, %v2080_v37  ;;  %v2223_v45 = vadd.f32 %v2083_v2, %v2080_v37  ;;  %v2245_v16 = vmul.f32 %v2083_v2, %v2083_v2 }
 0x180   : > { %2793 = vst [vmem:[%s3981_s17 + $0x8] sm:$0xff] %v2754_v41   ;;  %v2709_v11 = vpack.c.bf16 %v1718_v6, %v1715_v43  ;;  %v1857_v62 = vadd.f32 %v1718_v6, %v1715_v43  ;;  %v1879_v3 = vmul.f32 %v1718_v6, %v1718_v6  ;;  %v1881_v56 = vmul.f32 %v1726_v8, %v1726_v8 }
 0x181   : > { %2786 = vst [vmem:[%s3987_s28 + $0x8] sm:$0xff] %v2714_v60   ;;  %2750 = vst [vmem:[%s3981_s17] sm:$0xff] %v2749_v0   ;;  %v2224_v61 = vadd.f32 %v3138_v40, %v2223_v45  ;;  %v2260_v34 = vadd.f32 %v2245_v16, %v2244_v57 }
 0x182   : > { %2710 = vst [vmem:[%s3987_s28] sm:$0xff] %v2709_v11   ;;  %v1858_v36 = vadd.f32 %v1857_v62, %v1723_v54  ;;  %v1894_v55 = vadd.f32 %v1879_v3, %v1878_v18  ;;  %v3110_v51 = vpop.f32.mrb[68].mxu0 }
 0x183   : > { %v1739_v32 = vadd.f32 %v3110_v51, %v3946_v27  ;;  %v3142_v23 = vpop.f32.mrb[68].mxu1  ;;  %v1730_v42 = vpop.f32.mrb[69].mxu0  ;;  %v2225_v1 = vadd.f32 %v3139_v52, %v2224_v61  ;;  %v2261_v58 = vadd.f32 %v2260_v34, %v2246_v28 }
 0x184   : > { %v1895_v59 = vadd.f32 %v1894_v55, %v1880_v7  ;;  %v1731_v46 = vadd.f32 %v1730_v42, %v3940_v25  ;;  %v2096_v14 = vpop.f32.mrb[69].mxu1  ;;  %v3111_v13 = vpop.f32.mrb[70].mxu0  ;;  %v1859_v26 = vadd.f32 %v1858_v36, %v1726_v8  ;;  %v2250_v53 = vmul.f32 %v3142_v23, %v3142_v23 }
 0x185   : > { %v2226_v20 = vadd.f32 %v2225_v1, %v2096_v14  ;;  %v2248_v29 = vmul.f32 %v2096_v14, %v2096_v14  ;;  %v3143_v15 = vpop.f32.mrb[70].mxu1  ;;  %v1733_v12 = vpop.f32.mrb[71].mxu0  ;;  %v2262_v27 = vadd.f32 %v2261_v58, %v2247_v31  ;;  %v1742_v5 = vadd.f32 %v3111_v13, %v3948_v47 }
 0x186   : > { %v1882_v35 = vmul.f32 %v1731_v46, %v1731_v46  ;;  %v1896_v19 = vadd.f32 %v1895_v59, %v1881_v56  ;;  %v2099_v63 = vpop.f32.mrb[71].mxu1  ;;  %v1860_v30 = vadd.f32 %v1859_v26, %v1731_v46  ;;  %v2764_v44 = vpack.c.bf16 %v3143_v15, %v3142_v23 }
 0x187   : > { %v1734_v25 = vadd.f32 %v1733_v12, %v3942_v48  ;;  %v2263_v39 = vadd.f32 %v2262_v27, %v2248_v29  ;;  %v2724_v54 = vpack.c.bf16 %v1742_v5, %v1739_v32  ;;  %v2759_v37 = vpack.c.bf16 %v2099_v63, %v2096_v14 }
 0x188   : > { %v1897_v22 = vadd.f32 %v1896_v19, %v1882_v35  ;;  %2795 = vst [vmem:[%s3981_s17 + $0x18] sm:$0xff] %v2764_v44   ;;  %v2227_v8 = vadd.f32 %v2226_v20, %v2099_v63  ;;  %v2249_v52 = vmul.f32 %v2099_v63, %v2099_v63  ;;  %v1884_v4 = vmul.f32 %v1739_v32, %v1739_v32 }
 0x189   : > { %v2719_v40 = vpack.c.bf16 %v1734_v25, %v1731_v46  ;;  %v1861_v17 = vadd.f32 %v1860_v30, %v1734_v25  ;;  %v1883_v43 = vmul.f32 %v1734_v25, %v1734_v25  ;;  %2788 = vst [vmem:[%s3987_s28 + $0x18] sm:$0xff] %v2724_v54   ;;  %2794 = vst [vmem:[%s3981_s17 + $0x10] sm:$0xff] %v2759_v37  }
 0x18a   : > { %v3114_v47 = vpop.f32.mrb[72].mxu0  ;;  %v2251_v18 = vmul.f32 %v3143_v15, %v3143_v15  ;;  %v2228_v60 = vadd.f32 %v3142_v23, %v2227_v8  ;;  %v2264_v0 = vadd.f32 %v2263_v39, %v2249_v52  ;;  %v1885_v3 = vmul.f32 %v1742_v5, %v1742_v5 }
 0x18b   : > { %2787 = vst [vmem:[%s3987_s28 + $0x10] sm:$0xff] %v2719_v40   ;;  %v1862_v57 = vadd.f32 %v1861_v17, %v1739_v32  ;;  %v1898_v41 = vadd.f32 %v1897_v22, %v1883_v43  ;;  %v1755_v48 = vadd.f32 %v3114_v47, %v3958_v21  ;;  %v3146_v6 = vpop.f32.mrb[72].mxu1  ;;  %v1746_v2 = vpop.f32.mrb[73].mxu0 }
 0x18c   : > { %v1747_v45 = vadd.f32 %v1746_v2, %v3952_v24  ;;  %v2112_v11 = vpop.f32.mrb[73].mxu1  ;;  %v3115_v62 = vpop.f32.mrb[74].mxu0  ;;  %v2265_v55 = vadd.f32 %v2264_v0, %v2250_v53  ;;  %v2229_v51 = vadd.f32 %v3143_v15, %v2228_v60  ;;  %v2254_v13 = vmul.f32 %v3146_v6, %v3146_v6 }
 0x18d   : > { %v1899_v16 = vadd.f32 %v1898_v41, %v1884_v4  ;;  %v1863_v28 = vadd.f32 %v1862_v57, %v1742_v5  ;;  %v2252_v61 = vmul.f32 %v2112_v11, %v2112_v11  ;;  %v3147_v7 = vpop.f32.mrb[74].mxu1  ;;  %v1749_v36 = vpop.f32.mrb[75].mxu0  ;;  %v1758_v21 = vadd.f32 %v3115_v62, %v3960_v33 }
 0x18e   : > { %v1886_v34 = vmul.f32 %v1747_v45, %v1747_v45  ;;  %v2115_v31 = vpop.f32.mrb[75].mxu1  ;;  %v2774_v42 = vpack.c.bf16 %v3147_v7, %v3146_v6  ;;  %v2230_v24 = vadd.f32 %v2229_v51, %v2112_v11  ;;  %v2266_v1 = vadd.f32 %v2265_v55, %v2251_v18 }
 0x18f   : > { %v1864_v32 = vadd.f32 %v1863_v28, %v1747_v45  ;;  %v1900_v23 = vadd.f32 %v1899_v16, %v1885_v3  ;;  %v2734_v56 = vpack.c.bf16 %v1758_v21, %v1755_v48  ;;  %v1750_v58 = vadd.f32 %v1749_v36, %v3954_v50 }
 0x190   : > { %2797 = vst [vmem:[%s3981_s17 + $0x28] sm:$0xff] %v2774_v42   ;;  %v2769_v46 = vpack.c.bf16 %v2115_v31, %v2112_v11  ;;  %v2253_v14 = vmul.f32 %v2115_v31, %v2115_v31  ;;  %v2267_v26 = vadd.f32 %v2266_v1, %v2252_v61  ;;  %v2231_v20 = vadd.f32 %v2230_v24, %v2115_v31 }
 0x191   : > { %v1901_v59 = vadd.f32 %v1900_v23, %v1886_v34  ;;  %2790 = vst [vmem:[%s3987_s28 + $0x28] sm:$0xff] %v2734_v56   ;;  %v2729_v33 = vpack.c.bf16 %v1750_v58, %v1747_v45  ;;  %v1865_v15 = vadd.f32 %v1864_v32, %v1750_v58  ;;  %v1887_v12 = vmul.f32 %v1750_v58, %v1750_v58 }
 0x192   : > { %v3118_v29 = vpop.f32.mrb[76].mxu0  ;;  %2796 = vst [vmem:[%s3981_s17 + $0x20] sm:$0xff] %v2769_v46   ;;  %v1888_v5 = vmul.f32 %v1755_v48, %v1755_v48  ;;  %v2232_v63 = vadd.f32 %v3146_v6, %v2231_v20  ;;  %v2268_v30 = vadd.f32 %v2267_v26, %v2253_v14  ;;  %v1889_v22 = vmul.f32 %v1758_v21, %v1758_v21 }
 0x193   : > { %v1771_v35 = vadd.f32 %v3118_v29, %v3970_v38  ;;  %v3150_v19 = vpop.f32.mrb[76].mxu1  ;;  %v1762_v27 = vpop.f32.mrb[77].mxu0  ;;  %v2255_v39 = vmul.f32 %v3147_v7, %v3147_v7  ;;  %2789 = vst [vmem:[%s3987_s28 + $0x20] sm:$0xff] %v2729_v33   ;;  %v1866_v54 = vadd.f32 %v1865_v15, %v1755_v48  ;;  %v1902_v40 = vadd.f32 %v1901_v59, %v1887_v12 }
 0x194   : > { %v1763_v50 = vadd.f32 %v1762_v27, %v3964_v9  ;;  %v2128_v44 = vpop.f32.mrb[77].mxu1  ;;  %v3119_v25 = vpop.f32.mrb[78].mxu0  ;;  %v2269_v37 = vadd.f32 %v2268_v30, %v2254_v13  ;;  %v2233_v53 = vadd.f32 %v3147_v7, %v2232_v63  ;;  %v2258_v61 = vmul.f32 %v3150_v19, %v3150_v19 }
 0x195   : > { %v3151_v17 = vpop.f32.mrb[78].mxu1  ;;  %v1765_v43 = vpop.f32.mrb[79].mxu0  ;;  %v2256_v38 = vmul.f32 %v2128_v44, %v2128_v44  ;;  %v1774_v8 = vadd.f32 %v3119_v25, %v3972_v49  ;;  %v1903_v47 = vadd.f32 %v1902_v40, %v1888_v5  ;;  %v1867_v4 = vadd.f32 %v1866_v54, %v1758_v21 }
 0x196   : > { %v2131_v52 = vpop.f32.mrb[79].mxu1  ;;  %v1890_v9 = vmul.f32 %v1763_v50, %v1763_v50  ;;  %v2784_v57 = vpack.c.bf16 %v3151_v17, %v3150_v19  ;;  %v2234_v41 = vadd.f32 %v2233_v53, %v2128_v44  ;;  %v2270_v6 = vadd.f32 %v2269_v37, %v2255_v39 }
 0x197   : > { %v2744_v2 = vpack.c.bf16 %v1774_v8, %v1771_v35  ;;  %v1868_v48 = vadd.f32 %v1867_v4, %v1763_v50  ;;  %v1904_v18 = vadd.f32 %v1903_v47, %v1889_v22  ;;  %v1766_v60 = vadd.f32 %v1765_v43, %v3966_v10 }
 0x198   : > { %2799 = vst [vmem:[%s3981_s17 + $0x38] sm:$0xff] %v2784_v57   ;;  %v2779_v0 = vpack.c.bf16 %v2131_v52, %v2128_v44  ;;  %v2271_v45 = vadd.f32 %v2270_v6, %v2256_v38  ;;  %v2235_v11 = vadd.f32 %v2234_v41, %v2131_v52  ;;  %v2257_v49 = vmul.f32 %v2131_v52, %v2131_v52 }
 0x199   : > { %2792 = vst [vmem:[%s3987_s28 + $0x38] sm:$0xff] %v2744_v2   ;;  %v1905_v62 = vadd.f32 %v1904_v18, %v1890_v9  ;;  %v2739_v3 = vpack.c.bf16 %v1766_v60, %v1763_v50  ;;  %v1869_v16 = vadd.f32 %v1868_v48, %v1766_v60  ;;  %v1891_v28 = vmul.f32 %v1766_v60, %v1766_v60 }
 0x19a   : > { %2798 = vst [vmem:[%s3981_s17 + $0x30] sm:$0xff] %v2779_v0   ;;  %v2236_v7 = vadd.f32 %v3150_v19, %v2235_v11  ;;  %v2272_v36 = vadd.f32 %v2271_v45, %v2257_v49  ;;  %v1892_v55 = vmul.f32 %v1771_v35, %v1771_v35  ;;  %v2259_v21 = vmul.f32 %v3151_v17, %v3151_v17 }
 0x19b   : > { %2791 = vst [vmem:[%s3987_s28 + $0x30] sm:$0xff] %v2739_v3   ;;  %v1870_v34 = vadd.f32 %v1869_v16, %v1771_v35  ;;  %v1906_v51 = vadd.f32 %v1905_v62, %v1891_v28  ;;  %v1893_v32 = vmul.f32 %v1774_v8, %v1774_v8 }
 0x19c   : > { %v2237_v10 = vadd.f32 %v3151_v17, %v2236_v7  ;;  %v2273_v31 = vadd.f32 %v2272_v36, %v2258_v61 }
 0x19d   : > { %v1871_v23 = vadd.f32 %v1870_v34, %v1774_v8  ;;  %v1907_v42 = vadd.f32 %v1906_v51, %v1892_v55 }
 0x19e   : > { %v2238_v24 = vrot.slane %v2237_v10, 4  ;;  %v2274_v1 = vadd.f32 %v2273_v31, %v2259_v21 }
 0x19f   : > { %v1872_v56 = vrot.slane %v1871_v23, 4  ;;  %v1908_v59 = vadd.f32 %v1907_v42, %v1893_v32 }
 0x1a0   : > { %v2239_v58 = vadd.f32 %v2238_v24, %v2237_v10  ;;  %v2275_v46 = vrot.slane %v2274_v1, 4 }
 0x1a1   : > { %v1873_v14 = vadd.f32 %v1872_v56, %v1871_v23  ;;  %v1909_v13 = vrot.slane %v1908_v59, 4 }
 0x1a2   : > { %v2240_v26 = vrot.slane %v2239_v58, 2  ;;  %v2276_v20 = vadd.f32 %v2275_v46, %v2274_v1 }
 0x1a3   : > { %v1874_v29 = vrot.slane %v1873_v14, 2  ;;  %v1910_v33 = vadd.f32 %v1909_v13, %v1908_v59 }
 0x1a4   : > { %v2241_v15 = vadd.f32 %v2240_v26, %v2239_v58  ;;  %v2277_v12 = vrot.slane %v2276_v20, 2 }
 0x1a5   : > { %v1875_v35 = vadd.f32 %v1874_v29, %v1873_v14  ;;  %v1911_v19 = vrot.slane %v1910_v33, 2 }
 0x1a6   : > { %v2242_v27 = vrot.slane %v2241_v15, 1  ;;  %v2278_v5 = vadd.f32 %v2277_v12, %v2276_v20 }
 0x1a7   : > { %v1876_v63 = vrot.slane %v1875_v35, 1  ;;  %v1912_v30 = vadd.f32 %v1911_v19, %v1910_v33 }
 0x1a8   : > { %v2279_v50 = vrot.slane %v2278_v5, 1  ;;  %v2243_v25 = vadd.f32 %v2242_v27, %v2241_v15 }
 0x1a9   : > { %v1913_v44 = vrot.slane %v1912_v30, 1  ;;  %v1877_v39 = vadd.f32 %v1876_v63, %v1875_v35 }
 0x1aa   : > { %v2280_v22 = vadd.f32 %v2279_v50, %v2278_v5 }
 0x1ab   : > { %v1914_v54 = vadd.f32 %v1913_v44, %v1912_v30 }
 0x1ac   : > { %v2281_v40 = vsel %vm1915_vm0, %v2243_v25, %v2280_v22 }
 0x1ad   : > { %v1916_v17 = vsel %vm1915_vm0, %v1877_v39, %v1914_v54  ;;  %2282 = vst [vmem:[%s496_s12] sm:$0x3] %v2281_v40 }
 0x1ae   : > { %1917 = vst [vmem:[%s486_s21] sm:$0x3] %v1916_v17 }
 0x1af PF: > { %s21_s13 = sadd.s32 1, %s3255_s13  }
 0x1b0   : > { %p18_p6 = scmp.ge.s32.totalorder %s21_s13, 4  }
 0x1b2   :  { %20 = sbr.rel (!%p18_p6) target bundleno = 1 (0x1), region = 128 }

</bundles_post_ra>
